<compile_context>
chip_gen: v6e
topology: v6e:2x2x1
jax: 0.10.0
libtpu: 0.0.40
codegen_flags: <defaults>
</compile_context>

<pallas_src>
import functools

import jax
import jax.numpy as jnp
from jax.experimental import pallas as pl
from jax.experimental.pallas import tpu as pltpu


_IN_EPS = 1e-5                      # torch.nn.InstanceNorm2d default
_MXU_DTYPE = jnp.bfloat16           # MXU operand dtype (f32 accumulation)
_VMEM_LIMIT = 48 * 1024 * 1024      # safe on v5e/v6e (128 MiB) and v7x (64 MiB)


def _round_up(x, m):
    return ((x + m - 1) // m) * m


# ----------------------------------------------------------------------------
# Tiled MXU matmul + bias (+ optional fused tanh epilogue)
# ----------------------------------------------------------------------------
def _matmul_bias_kernel(a_ref, b_ref, bias_ref, o_ref, acc_ref, *, activation):
    @pl.when(pl.program_id(2) == 0)
    def _():
        acc_ref[...] = jnp.zeros_like(acc_ref)

    acc_ref[...] += jnp.dot(a_ref[...], b_ref[...],
                            preferred_element_type=jnp.float32)

    @pl.when(pl.program_id(2) == pl.num_programs(2) - 1)
    def _():
        y = acc_ref[...] + bias_ref[...]
        if activation == 'tanh':
            y = jnp.tanh(y)          # EUP slot: essentially free in the epilogue
        o_ref[...] = y.astype(o_ref.dtype)


def matmul_bias(a, b, bias, activation=None, tm=256, tn=256, tk=512):
    """(M,K) @ (K,N) + bias on the MXU, tiled with a f32 VMEM accumulator.

    Operands are zero-padded up to tile multiples (exact for the dot) and cast
    to bf16; the accumulator and output stay f32.  Output lanes are padded to a
    multiple of 128 so stores are unmasked (lane-dense)."""
    M, K = a.shape
    K2, N = b.shape
    assert K == K2
    tm = min(tm, _round_up(M, 8))
    tn = min(tn, _round_up(N, 128))
    tk = min(tk, _round_up(K, 128))
    Mp, Kp, Np = _round_up(M, tm), _round_up(K, tk), _round_up(N, tn)

    a_p = jnp.pad(a.astype(_MXU_DTYPE), ((0, Mp - M), (0, Kp - K)))
    b_p = jnp.pad(b.astype(_MXU_DTYPE), ((0, Kp - K), (0, Np - N)))
    bias_p = jnp.pad(bias.astype(jnp.float32).reshape(1, N), ((0, 0), (0, Np - N)))

    grid = (Mp // tm, Np // tn, Kp // tk)
    cost = pl.CostEstimate(
        flops=2 * Mp * Np * Kp,
        transcendentals=(Mp * Np) if activation == 'tanh' else 0,
        bytes_accessed=2 * Mp * Kp + 2 * Kp * Np + 4 * Np + 4 * Mp * Np,
    )

    out = pl.pallas_call(
        functools.partial(_matmul_bias_kernel, activation=activation),
        out_shape=jax.ShapeDtypeStruct((Mp, Np), jnp.float32),
        grid_spec=pltpu.PrefetchScalarGridSpec(
            num_scalar_prefetch=0,
            grid=grid,
            in_specs=[
                pl.BlockSpec((tm, tk), lambda i, j, k: (i, k)),
                pl.BlockSpec((tk, tn), lambda i, j, k: (k, j)),
                pl.BlockSpec((1, tn), lambda i, j, k: (0, j)),
            ],
            out_specs=pl.BlockSpec((tm, tn), lambda i, j, k: (i, j)),
            scratch_shapes=[pltpu.VMEM((tm, tn), jnp.float32)],
        ),
        compiler_params=pltpu.CompilerParams(
            dimension_semantics=("parallel", "parallel", "arbitrary"),
            vmem_limit_bytes=_VMEM_LIMIT,
        ),
        cost_estimate=cost,
    )(a_p, b_p, bias_p)
    return out[:M, :N]


# ----------------------------------------------------------------------------
# Fused InstanceNorm kernels (no transposes: operate on (N*H*W, C) slabs)
# ----------------------------------------------------------------------------
def _in_kernel(x_ref, o_ref, *, relu):
    x = x_ref[...]                                   # (H*W, tile_C) of one image
    mean = jnp.mean(x, axis=0, keepdims=True)
    xc = x - mean
    var = jnp.mean(xc * xc, axis=0, keepdims=True)
    y = xc * jax.lax.rsqrt(var + _IN_EPS)
    if relu:
        y = jnp.maximum(y, 0.0)
    o_ref[...] = y


def _in_residual_kernel(x_ref, r_ref, o_ref):
    x = x_ref[...]
    mean = jnp.mean(x, axis=0, keepdims=True)
    xc = x - mean
    var = jnp.mean(xc * xc, axis=0, keepdims=True)
    o_ref[...] = xc * jax.lax.rsqrt(var + _IN_EPS) + r_ref[...]


def _in_call(kernel, inputs, n, hw, c):
    # Channel tiling: channels are independent under InstanceNorm, so the grid
    # can shard over them; per-(n,c) stats reduce over H*W inside the block.
    tc = 128 if c % 128 == 0 else c
    spec = pl.BlockSpec((hw, tc), lambda i, j: (i, j))
    return pl.pallas_call(
        kernel,
        out_shape=jax.ShapeDtypeStruct((n * hw, c), jnp.float32),
        grid=(n, c // tc),
        in_specs=[spec] * len(inputs),
        out_specs=spec,
        compiler_params=pltpu.CompilerParams(
            dimension_semantics=("parallel", "parallel"),
            vmem_limit_bytes=_VMEM_LIMIT,
        ),
    )(*inputs)


def instance_norm_relu(x_nhwc):
    n, h, w, c = x_nhwc.shape
    y = _in_call(functools.partial(_in_kernel, relu=True),
                 [x_nhwc.reshape(n * h * w, c)], n, h * w, c)
    return y.reshape(n, h, w, c)


def instance_norm_residual(x_nhwc, res_nhwc):
    n, h, w, c = x_nhwc.shape
    y = _in_call(_in_residual_kernel,
                 [x_nhwc.reshape(n * h * w, c),
                  res_nhwc.reshape(n * h * w, c)], n, h * w, c)
    return y.reshape(n, h, w, c)


# ----------------------------------------------------------------------------
# Convolution glue (im2col in plain JAX, matmul in Pallas)
# ----------------------------------------------------------------------------
def _im2col(x, kh, kw, stride):
    N, H, W, C = x.shape
    oh = (H - kh) // stride + 1
    ow = (W - kw) // stride + 1
    cols = []
    for i in range(kh):
        for j in range(kw):
            cols.append(
                x[:, i:i + (oh - 1) * stride + 1:stride,
                     j:j + (ow - 1) * stride + 1:stride, :])
    p = jnp.stack(cols, axis=3)                      # (N, oh, ow, kh*kw, C)
    return p.reshape(N * oh * ow, kh * kw * C), (N, oh, ow)


def conv2d(x_nhwc, w, b, stride=1, pad=0, pad_mode='zero', activation=None):
    """w in PyTorch Conv2d layout (Cout, Cin, kh, kw)."""
    if pad > 0:
        mode = 'reflect' if pad_mode == 'reflect' else 'constant'
        x = jnp.pad(x_nhwc, ((0, 0), (pad, pad), (pad, pad), (0, 0)), mode=mode)
    else:
        x = x_nhwc
    cout, cin, kh, kw = w.shape
    patches, (n, oh, ow) = _im2col(x, kh, kw, stride)
    w_mat = jnp.transpose(w, (2, 3, 1, 0)).reshape(kh * kw * cin, cout)
    out = matmul_bias(patches, w_mat, b, activation=activation)
    return out.reshape(n, oh, ow, cout)


# (output phase, tap offset) -> kernel index for ConvTranspose(k=3, s=2, p=1, op=1)
_KIDX = {(0, 0): 1, (1, 0): 2, (1, 1): 0}


def _deconv_phase_weight(w):
    """Sub-pixel weight matrix for ConvTranspose2d(k=3, s=2, p=1, op=1).
    w: PyTorch layout (Cin, Cout, 3, 3).  Returns (4*Cin, 4*Cout) where rows
    are ordered (dy, dx, ci) over the 2x2 input-tap neighbourhood and columns
    are ordered (phase_a, phase_b, co) over the 2x2 output phases."""
    cin, cout = w.shape[0], w.shape[1]
    wm = jnp.zeros((2, 2, cin, 2, 2, cout), jnp.float32)
    for dy in range(2):
        for dx in range(2):
            for a in range(2):
                for b in range(2):
                    kh = _KIDX.get((a, dy))
                    kw = _KIDX.get((b, dx))
                    if kh is None or kw is None:
                        continue
                    wm = wm.at[dy, dx, :, a, b, :].set(w[:, :, kh, kw])
    return wm.reshape(4 * cin, 4 * cout)


def conv_transpose2d(x_nhwc, w, b):
    """ConvTranspose2d(k=3, stride=2, padding=1, output_padding=1) via sub-pixel
    phase decomposition: one matmul over the 2x2 tap neighbourhood of the
    undilated input produces all 4 output phases, which are pixel-shuffled into
    the 2x-upsampled grid (identical result, ~4x fewer FLOPs/bytes than
    convolving the zero-dilated tensor)."""
    n, h, wd, cin = x_nhwc.shape
    cout = w.shape[1]
    xe = jnp.pad(x_nhwc, ((0, 0), (0, 1), (0, 1), (0, 0)))     # bottom/right zero
    taps = [xe[:, dy:dy + h, dx:dx + wd, :] for dy in range(2) for dx in range(2)]
    patches = jnp.stack(taps, axis=3).reshape(n * h * wd, 4 * cin)
    w_mat = _deconv_phase_weight(w)
    bias4 = jnp.tile(b.astype(jnp.float32), 4)
    out = matmul_bias(patches, w_mat, bias4)                   # (n*h*wd, 4*cout)
    out = out.reshape(n, h, wd, 2, 2, cout)                    # (..., a, b, co)
    out = out.transpose(0, 1, 3, 2, 4, 5).reshape(n, 2 * h, 2 * wd, cout)
    return out


# ----------------------------------------------------------------------------
# Parameters (init_weights 'normal', gain=0.02, bias=0; InstanceNorm has no params)
# ----------------------------------------------------------------------------
def init_params(key, input_nc, output_nc, ngf, n_blocks=6):
    def w_init(k, shape):
        return 0.02 * jax.random.normal(k, shape, jnp.float32)

    keys = iter(jax.random.split(key, 8 + 2 * n_blocks))
    p = {}
    p['c0_w'] = w_init(next(keys), (ngf, input_nc, 7, 7))
    p['c0_b'] = jnp.zeros((ngf,), jnp.float32)
    p['d0_w'] = w_init(next(keys), (ngf * 2, ngf, 3, 3))
    p['d0_b'] = jnp.zeros((ngf * 2,), jnp.float32)
    p['d1_w'] = w_init(next(keys), (ngf * 4, ngf * 2, 3, 3))
    p['d1_b'] = jnp.zeros((ngf * 4,), jnp.float32)
    for i in range(n_blocks):
        p[f'r{i}_w1'] = w_init(next(keys), (ngf * 4, ngf * 4, 3, 3))
        p[f'r{i}_b1'] = jnp.zeros((ngf * 4,), jnp.float32)
        p[f'r{i}_w2'] = w_init(next(keys), (ngf * 4, ngf * 4, 3, 3))
        p[f'r{i}_b2'] = jnp.zeros((ngf * 4,), jnp.float32)
    p['u0_w'] = w_init(next(keys), (ngf * 4, ngf * 2, 3, 3))   # ConvTranspose layout
    p['u0_b'] = jnp.zeros((ngf * 2,), jnp.float32)
    p['u1_w'] = w_init(next(keys), (ngf * 2, ngf, 3, 3))
    p['u1_b'] = jnp.zeros((ngf,), jnp.float32)
    p['cf_w'] = w_init(next(keys), (output_nc, ngf, 7, 7))
    p['cf_b'] = jnp.zeros((output_nc,), jnp.float32)
    return p


# ----------------------------------------------------------------------------
# Define_G forward (treeresnet branch, with_tanh=True, use_dropout=False)
# ----------------------------------------------------------------------------
def define_g_forward(params, x_nchw, n_blocks=6):
    x = x_nchw.astype(jnp.float32).transpose(0, 2, 3, 1)       # NCHW -> NHWC
    # ReflectionPad(3) + Conv7x7 + IN + ReLU
    h = conv2d(x, params['c0_w'], params['c0_b'], stride=1, pad=3, pad_mode='reflect')
    h = instance_norm_relu(h)
    # two stride-2 downsamples
    h = conv2d(h, params['d0_w'], params['d0_b'], stride=2, pad=1)
    h = instance_norm_relu(h)
    h = conv2d(h, params['d1_w'], params['d1_b'], stride=2, pad=1)
    h = instance_norm_relu(h)
    # residual blocks
    for i in range(n_blocks):
        r = conv2d(h, params[f'r{i}_w1'], params[f'r{i}_b1'],
                   stride=1, pad=1, pad_mode='reflect')
        r = instance_norm_relu(r)
        r = conv2d(r, params[f'r{i}_w2'], params[f'r{i}_b2'],
                   stride=1, pad=1, pad_mode='reflect')
        h = instance_norm_residual(r, h)
    # two stride-2 upsamples (ConvTranspose2d via sub-pixel phases)
    h = conv_transpose2d(h, params['u0_w'], params['u0_b'])
    h = instance_norm_relu(h)
    h = conv_transpose2d(h, params['u1_w'], params['u1_b'])
    h = instance_norm_relu(h)
    # ReflectionPad(3) + Conv7x7 + Tanh (tanh fused into the matmul epilogue)
    h = conv2d(h, params['cf_w'], params['cf_b'], stride=1, pad=3,
               pad_mode='reflect', activation='tanh')
    return h.transpose(0, 3, 1, 2)                              # NHWC -> NCHW


if __name__ == "__main__":
    key = jax.random.PRNGKey(0)
    k_param, k_x = jax.random.split(key)

    batch, input_nc, output_nc, ngf, spatial = 2, 3, 3, 8, 16
    params = init_params(k_param, input_nc, output_nc, ngf)
    x = jax.random.normal(k_x, (batch, input_nc, spatial, spatial), jnp.float32)

    fwd = jax.jit(functools.partial(define_g_forward, n_blocks=6))
    y = fwd(params, x)
    jax.block_until_ready(y)

    assert y.shape == (batch, output_nc, spatial, spatial), y.shape
    assert y.dtype == jnp.float32
    assert bool(jnp.all(jnp.isfinite(y)))
    print("KERNEL_OK")
</pallas_src>

<mosaic_0001>
module attributes {stable_mosaic.version = 11 : i64} {
  func.func @_matmul_bias_kernel(%arg0: i32, %arg1: i32, %arg2: i32, %arg3: memref<256x256xbf16, #tpu.memory_space<vmem>>, %arg4: memref<256x128xbf16, #tpu.memory_space<vmem>>, %arg5: memref<1x128xf32, #tpu.memory_space<vmem>>, %arg6: memref<256x128xf32, #tpu.memory_space<vmem>>, %arg7: memref<256x128xf32, #tpu.memory_space<vmem>>) attributes {dimension_semantics = [#tpu.dimension_semantics<parallel>, #tpu.dimension_semantics<parallel>, #tpu.dimension_semantics<arbitrary>], iteration_bounds = array<i64: 2, 1, 1>, scalar_prefetch = 0 : i64, scratch_operands = 1 : i64, tpu.core_type = #tpu.core_type<tc>, window_params = [{transform_indices = @transform_0, window_bounds = array<i64: 256, 256>}, {transform_indices = @transform_1, window_bounds = array<i64: 256, 128>}, {transform_indices = @transform_2, window_bounds = array<i64: 1, 128>}, {transform_indices = @transform_3, window_bounds = array<i64: 256, 128>}]} {
    %c0_i32 = arith.constant 0 : i32
    %0 = arith.cmpi eq, %arg2, %c0_i32 : i32
    %1 = arith.extui %0 : i1 to i32
    %c0_i32_0 = arith.constant 0 : i32
    %2 = arith.cmpi ne, %1, %c0_i32_0 : i32
    scf.if %2 {
      %cst_10 = arith.constant 0.000000e+00 : f32
      %12 = vector.broadcast %cst_10 : f32 to vector<256x128xf32>
      %c0_11 = arith.constant 0 : index
      %c0_12 = arith.constant 0 : index
      %13 = vector.load %arg7[%c0_11, %c0_12] : memref<256x128xf32, #tpu.memory_space<vmem>>, vector<256x128xf32>
      tpu.vector_store %arg7[%c0_11, %c0_12], %12 {strides = array<i32>} : memref<256x128xf32, #tpu.memory_space<vmem>>, vector<256x128xf32>,
    } else {
    }
    %c0 = arith.constant 0 : index
    %c0_1 = arith.constant 0 : index
    %3 = vector.load %arg7[%c0, %c0_1] : memref<256x128xf32, #tpu.memory_space<vmem>>, vector<256x128xf32>
    %c0_2 = arith.constant 0 : index
    %c0_3 = arith.constant 0 : index
    %4 = vector.load %arg3[%c0_2, %c0_3] : memref<256x256xbf16, #tpu.memory_space<vmem>>, vector<256x256xbf16>
    %c0_4 = arith.constant 0 : index
    %c0_5 = arith.constant 0 : index
    %5 = vector.load %arg4[%c0_4, %c0_5] : memref<256x128xbf16, #tpu.memory_space<vmem>>, vector<256x128xbf16>
    %cst = arith.constant dense<0.000000e+00> : vector<256x128xf32>
    %6 = tpu.matmul %4, %5, %cst {dimension_numbers = #tpu.dot_dimension_numbers<[1], [0], [0], [1], [0, 0, 1, 1], [], []>} : vector<256x256xbf16>, vector<256x128xbf16>, vector<256x128xf32> -> vector<256x128xf32>
    %7 = arith.addf %3, %6 : vector<256x128xf32>
    %c0_6 = arith.constant 0 : index
    %c0_7 = arith.constant 0 : index
    %8 = vector.load %arg7[%c0_6, %c0_7] : memref<256x128xf32, #tpu.memory_space<vmem>>, vector<256x128xf32>
    tpu.vector_store %arg7[%c0_6, %c0_7], %7 {strides = array<i32>} : memref<256x128xf32, #tpu.memory_space<vmem>>, vector<256x128xf32>,
    %c0_i32_8 = arith.constant 0 : i32
    %9 = arith.cmpi eq, %arg2, %c0_i32_8 : i32
    %10 = arith.extui %9 : i1 to i32
    %c0_i32_9 = arith.constant 0 : i32
    %11 = arith.cmpi ne, %10, %c0_i32_9 : i32
    scf.if %11 {
      %c0_10 = arith.constant 0 : index
      %c0_11 = arith.constant 0 : index
      %12 = vector.load %arg7[%c0_10, %c0_11] : memref<256x128xf32, #tpu.memory_space<vmem>>, vector<256x128xf32>
      %c0_12 = arith.constant 0 : index
      %c0_13 = arith.constant 0 : index
      %13 = vector.load %arg5[%c0_12, %c0_13] : memref<1x128xf32, #tpu.memory_space<vmem>>, vector<1x128xf32>
      %14 = vector.broadcast %13 : vector<1x128xf32> to vector<256x128xf32>
      %15 = arith.addf %12, %14 : vector<256x128xf32>
      %c0_14 = arith.constant 0 : index
      %c0_15 = arith.constant 0 : index
      %16 = vector.load %arg6[%c0_14, %c0_15] : memref<256x128xf32, #tpu.memory_space<vmem>>, vector<256x128xf32>
      tpu.vector_store %arg6[%c0_14, %c0_15], %15 {strides = array<i32>} : memref<256x128xf32, #tpu.memory_space<vmem>>, vector<256x128xf32>,
    } else {
    }
    return
  }
  func.func @transform_0(%arg0: i32, %arg1: i32, %arg2: i32) -> (i32, i32) {
    %c0_i32 = arith.constant 0 : i32
    return %arg0, %arg2 : i32, i32
  }
  func.func @transform_1(%arg0: i32, %arg1: i32, %arg2: i32) -> (i32, i32) {
    %c0_i32 = arith.constant 0 : i32
    return %arg2, %arg1 : i32, i32
  }
  func.func @transform_2(%arg0: i32, %arg1: i32, %arg2: i32) -> (i32, i32) {
    %c0_i32 = arith.constant 0 : i32
    %c0_i32_0 = arith.constant 0 : i32
    return %c0_i32, %arg1 : i32, i32
  }
  func.func @transform_3(%arg0: i32, %arg1: i32, %arg2: i32) -> (i32, i32) {
    %c0_i32 = arith.constant 0 : i32
    return %arg0, %arg1 : i32, i32
  }
}

module attributes {stable_mosaic.version = 11 : i64} {
  func.func @_in_kernel(%arg0: i32, %arg1: i32, %arg2: memref<256x8xf32, #tpu.memory_space<vmem>>, %arg3: memref<256x8xf32, #tpu.memory_space<vmem>>) attributes {dimension_semantics = [#tpu.dimension_semantics<parallel>, #tpu.dimension_semantics<parallel>], iteration_bounds = array<i64: 2, 1>, scalar_prefetch = 0 : i64, scratch_operands = 0 : i64, tpu.core_type = #tpu.core_type<tc>, window_params = [{transform_indices = @transform_0, window_bounds = array<i64: 256, 8>}, {transform_indices = @transform_1, window_bounds = array<i64: 256, 8>}]} {
    %c0 = arith.constant 0 : index
    %c0_0 = arith.constant 0 : index
    %0 = vector.load %arg2[%c0, %c0_0] : memref<256x8xf32, #tpu.memory_space<vmem>>, vector<256x8xf32>
    %cst = arith.constant dense<0.000000e+00> : vector<8xf32>
    %1 = vector.multi_reduction <add>, %0, %cst [0] : vector<256x8xf32> to vector<8xf32>
    %2 = vector.shape_cast %1 : vector<8xf32> to vector<1x8xf32>
    %cst_1 = arith.constant 2.560000e+02 : f32
    %3 = vector.broadcast %cst_1 : f32 to vector<1x8xf32>
    %4 = arith.divf %2, %3 : vector<1x8xf32>
    %5 = vector.broadcast %4 : vector<1x8xf32> to vector<256x8xf32>
    %6 = arith.subf %0, %5 : vector<256x8xf32>
    %7 = arith.mulf %6, %6 : vector<256x8xf32>
    %cst_2 = arith.constant dense<0.000000e+00> : vector<8xf32>
    %8 = vector.multi_reduction <add>, %7, %cst_2 [0] : vector<256x8xf32> to vector<8xf32>
    %9 = vector.shape_cast %8 : vector<8xf32> to vector<1x8xf32>
    %cst_3 = arith.constant 2.560000e+02 : f32
    %10 = vector.broadcast %cst_3 : f32 to vector<1x8xf32>
    %11 = arith.divf %9, %10 : vector<1x8xf32>
    %cst_4 = arith.constant 9.99999974E-6 : f32
    %12 = vector.broadcast %cst_4 : f32 to vector<1x8xf32>
    %13 = arith.addf %11, %12 : vector<1x8xf32>
    %14 = math.rsqrt %13 : vector<1x8xf32>
    %15 = vector.broadcast %14 : vector<1x8xf32> to vector<256x8xf32>
    %16 = arith.mulf %6, %15 : vector<256x8xf32>
    %cst_5 = arith.constant 0.000000e+00 : f32
    %17 = vector.broadcast %cst_5 : f32 to vector<256x8xf32>
    %18 = arith.maximumf %16, %17 : vector<256x8xf32>
    %c0_6 = arith.constant 0 : index
    %c0_7 = arith.constant 0 : index
    %19 = vector.load %arg3[%c0_6, %c0_7] : memref<256x8xf32, #tpu.memory_space<vmem>>, vector<256x8xf32>
    tpu.vector_store %arg3[%c0_6, %c0_7], %18 {strides = array<i32>} : memref<256x8xf32, #tpu.memory_space<vmem>>, vector<256x8xf32>,
    return
  }
  func.func @transform_0(%arg0: i32, %arg1: i32) -> (i32, i32) {
    %c0_i32 = arith.constant 0 : i32
    return %arg0, %arg1 : i32, i32
  }
  func.func @transform_1(%arg0: i32, %arg1: i32) -> (i32, i32) {
    %c0_i32 = arith.constant 0 : i32
    return %arg0, %arg1 : i32, i32
  }
}

module attributes {stable_mosaic.version = 11 : i64} {
  func.func @_matmul_bias_kernel(%arg0: i32, %arg1: i32, %arg2: i32, %arg3: memref<128x128xbf16, #tpu.memory_space<vmem>>, %arg4: memref<128x128xbf16, #tpu.memory_space<vmem>>, %arg5: memref<1x128xf32, #tpu.memory_space<vmem>>, %arg6: memref<128x128xf32, #tpu.memory_space<vmem>>, %arg7: memref<128x128xf32, #tpu.memory_space<vmem>>) attributes {dimension_semantics = [#tpu.dimension_semantics<parallel>, #tpu.dimension_semantics<parallel>, #tpu.dimension_semantics<arbitrary>], iteration_bounds = array<i64: 1, 1, 1>, scalar_prefetch = 0 : i64, scratch_operands = 1 : i64, tpu.core_type = #tpu.core_type<tc>, window_params = [{transform_indices = @transform_0, window_bounds = array<i64: 128, 128>}, {transform_indices = @transform_1, window_bounds = array<i64: 128, 128>}, {transform_indices = @transform_2, window_bounds = array<i64: 1, 128>}, {transform_indices = @transform_3, window_bounds = array<i64: 128, 128>}]} {
    %c0_i32 = arith.constant 0 : i32
    %0 = arith.cmpi eq, %arg2, %c0_i32 : i32
    %1 = arith.extui %0 : i1 to i32
    %c0_i32_0 = arith.constant 0 : i32
    %2 = arith.cmpi ne, %1, %c0_i32_0 : i32
    scf.if %2 {
      %cst_10 = arith.constant 0.000000e+00 : f32
      %12 = vector.broadcast %cst_10 : f32 to vector<128x128xf32>
      %c0_11 = arith.constant 0 : index
      %c0_12 = arith.constant 0 : index
      %13 = vector.load %arg7[%c0_11, %c0_12] : memref<128x128xf32, #tpu.memory_space<vmem>>, vector<128x128xf32>
      tpu.vector_store %arg7[%c0_11, %c0_12], %12 {strides = array<i32>} : memref<128x128xf32, #tpu.memory_space<vmem>>, vector<128x128xf32>,
    } else {
    }
    %c0 = arith.constant 0 : index
    %c0_1 = arith.constant 0 : index
    %3 = vector.load %arg7[%c0, %c0_1] : memref<128x128xf32, #tpu.memory_space<vmem>>, vector<128x128xf32>
    %c0_2 = arith.constant 0 : index
    %c0_3 = arith.constant 0 : index
    %4 = vector.load %arg3[%c0_2, %c0_3] : memref<128x128xbf16, #tpu.memory_space<vmem>>, vector<128x128xbf16>
    %c0_4 = arith.constant 0 : index
    %c0_5 = arith.constant 0 : index
    %5 = vector.load %arg4[%c0_4, %c0_5] : memref<128x128xbf16, #tpu.memory_space<vmem>>, vector<128x128xbf16>
    %cst = arith.constant dense<0.000000e+00> : vector<128x128xf32>
    %6 = tpu.matmul %4, %5, %cst {dimension_numbers = #tpu.dot_dimension_numbers<[1], [0], [0], [1], [0, 0, 1, 1], [], []>} : vector<128x128xbf16>, vector<128x128xbf16>, vector<128x128xf32> -> vector<128x128xf32>
    %7 = arith.addf %3, %6 : vector<128x128xf32>
    %c0_6 = arith.constant 0 : index
    %c0_7 = arith.constant 0 : index
    %8 = vector.load %arg7[%c0_6, %c0_7] : memref<128x128xf32, #tpu.memory_space<vmem>>, vector<128x128xf32>
    tpu.vector_store %arg7[%c0_6, %c0_7], %7 {strides = array<i32>} : memref<128x128xf32, #tpu.memory_space<vmem>>, vector<128x128xf32>,
    %c0_i32_8 = arith.constant 0 : i32
    %9 = arith.cmpi eq, %arg2, %c0_i32_8 : i32
    %10 = arith.extui %9 : i1 to i32
    %c0_i32_9 = arith.constant 0 : i32
    %11 = arith.cmpi ne, %10, %c0_i32_9 : i32
    scf.if %11 {
      %c0_10 = arith.constant 0 : index
      %c0_11 = arith.constant 0 : index
      %12 = vector.load %arg7[%c0_10, %c0_11] : memref<128x128xf32, #tpu.memory_space<vmem>>, vector<128x128xf32>
      %c0_12 = arith.constant 0 : index
      %c0_13 = arith.constant 0 : index
      %13 = vector.load %arg5[%c0_12, %c0_13] : memref<1x128xf32, #tpu.memory_space<vmem>>, vector<1x128xf32>
      %14 = vector.broadcast %13 : vector<1x128xf32> to vector<128x128xf32>
      %15 = arith.addf %12, %14 : vector<128x128xf32>
      %c0_14 = arith.constant 0 : index
      %c0_15 = arith.constant 0 : index
      %16 = vector.load %arg6[%c0_14, %c0_15] : memref<128x128xf32, #tpu.memory_space<vmem>>, vector<128x128xf32>
      tpu.vector_store %arg6[%c0_14, %c0_15], %15 {strides = array<i32>} : memref<128x128xf32, #tpu.memory_space<vmem>>, vector<128x128xf32>,
    } else {
    }
    return
  }
  func.func @transform_0(%arg0: i32, %arg1: i32, %arg2: i32) -> (i32, i32) {
    %c0_i32 = arith.constant 0 : i32
    return %arg0, %arg2 : i32, i32
  }
  func.func @transform_1(%arg0: i32, %arg1: i32, %arg2: i32) -> (i32, i32) {
    %c0_i32 = arith.constant 0 : i32
    return %arg2, %arg1 : i32, i32
  }
  func.func @transform_2(%arg0: i32, %arg1: i32, %arg2: i32) -> (i32, i32) {
    %c0_i32 = arith.constant 0 : i32
    %c0_i32_0 = arith.constant 0 : i32
    return %c0_i32, %arg1 : i32, i32
  }
  func.func @transform_3(%arg0: i32, %arg1: i32, %arg2: i32) -> (i32, i32) {
    %c0_i32 = arith.constant 0 : i32
    return %arg0, %arg1 : i32, i32
  }
}

module attributes {stable_mosaic.version = 11 : i64} {
  func.func @_in_kernel(%arg0: i32, %arg1: i32, %arg2: memref<64x16xf32, #tpu.memory_space<vmem>>, %arg3: memref<64x16xf32, #tpu.memory_space<vmem>>) attributes {dimension_semantics = [#tpu.dimension_semantics<parallel>, #tpu.dimension_semantics<parallel>], iteration_bounds = array<i64: 2, 1>, scalar_prefetch = 0 : i64, scratch_operands = 0 : i64, tpu.core_type = #tpu.core_type<tc>, window_params = [{transform_indices = @transform_0, window_bounds = array<i64: 64, 16>}, {transform_indices = @transform_1, window_bounds = array<i64: 64, 16>}]} {
    %c0 = arith.constant 0 : index
    %c0_0 = arith.constant 0 : index
    %0 = vector.load %arg2[%c0, %c0_0] : memref<64x16xf32, #tpu.memory_space<vmem>>, vector<64x16xf32>
    %cst = arith.constant dense<0.000000e+00> : vector<16xf32>
    %1 = vector.multi_reduction <add>, %0, %cst [0] : vector<64x16xf32> to vector<16xf32>
    %2 = vector.shape_cast %1 : vector<16xf32> to vector<1x16xf32>
    %cst_1 = arith.constant 6.400000e+01 : f32
    %3 = vector.broadcast %cst_1 : f32 to vector<1x16xf32>
    %4 = arith.divf %2, %3 : vector<1x16xf32>
    %5 = vector.broadcast %4 : vector<1x16xf32> to vector<64x16xf32>
    %6 = arith.subf %0, %5 : vector<64x16xf32>
    %7 = arith.mulf %6, %6 : vector<64x16xf32>
    %cst_2 = arith.constant dense<0.000000e+00> : vector<16xf32>
    %8 = vector.multi_reduction <add>, %7, %cst_2 [0] : vector<64x16xf32> to vector<16xf32>
    %9 = vector.shape_cast %8 : vector<16xf32> to vector<1x16xf32>
    %cst_3 = arith.constant 6.400000e+01 : f32
    %10 = vector.broadcast %cst_3 : f32 to vector<1x16xf32>
    %11 = arith.divf %9, %10 : vector<1x16xf32>
    %cst_4 = arith.constant 9.99999974E-6 : f32
    %12 = vector.broadcast %cst_4 : f32 to vector<1x16xf32>
    %13 = arith.addf %11, %12 : vector<1x16xf32>
    %14 = math.rsqrt %13 : vector<1x16xf32>
    %15 = vector.broadcast %14 : vector<1x16xf32> to vector<64x16xf32>
    %16 = arith.mulf %6, %15 : vector<64x16xf32>
    %cst_5 = arith.constant 0.000000e+00 : f32
    %17 = vector.broadcast %cst_5 : f32 to vector<64x16xf32>
    %18 = arith.maximumf %16, %17 : vector<64x16xf32>
    %c0_6 = arith.constant 0 : index
    %c0_7 = arith.constant 0 : index
    %19 = vector.load %arg3[%c0_6, %c0_7] : memref<64x16xf32, #tpu.memory_space<vmem>>, vector<64x16xf32>
    tpu.vector_store %arg3[%c0_6, %c0_7], %18 {strides = array<i32>} : memref<64x16xf32, #tpu.memory_space<vmem>>, vector<64x16xf32>,
    return
  }
  func.func @transform_0(%arg0: i32, %arg1: i32) -> (i32, i32) {
    %c0_i32 = arith.constant 0 : i32
    return %arg0, %arg1 : i32, i32
  }
  func.func @transform_1(%arg0: i32, %arg1: i32) -> (i32, i32) {
    %c0_i32 = arith.constant 0 : i32
    return %arg0, %arg1 : i32, i32
  }
}

module attributes {stable_mosaic.version = 11 : i64} {
  func.func @_matmul_bias_kernel(%arg0: i32, %arg1: i32, %arg2: i32, %arg3: memref<32x256xbf16, #tpu.memory_space<vmem>>, %arg4: memref<256x128xbf16, #tpu.memory_space<vmem>>, %arg5: memref<1x128xf32, #tpu.memory_space<vmem>>, %arg6: memref<32x128xf32, #tpu.memory_space<vmem>>, %arg7: memref<32x128xf32, #tpu.memory_space<vmem>>) attributes {dimension_semantics = [#tpu.dimension_semantics<parallel>, #tpu.dimension_semantics<parallel>, #tpu.dimension_semantics<arbitrary>], iteration_bounds = array<i64: 1, 1, 1>, scalar_prefetch = 0 : i64, scratch_operands = 1 : i64, tpu.core_type = #tpu.core_type<tc>, window_params = [{transform_indices = @transform_0, window_bounds = array<i64: 32, 256>}, {transform_indices = @transform_1, window_bounds = array<i64: 256, 128>}, {transform_indices = @transform_2, window_bounds = array<i64: 1, 128>}, {transform_indices = @transform_3, window_bounds = array<i64: 32, 128>}]} {
    %c0_i32 = arith.constant 0 : i32
    %0 = arith.cmpi eq, %arg2, %c0_i32 : i32
    %1 = arith.extui %0 : i1 to i32
    %c0_i32_0 = arith.constant 0 : i32
    %2 = arith.cmpi ne, %1, %c0_i32_0 : i32
    scf.if %2 {
      %cst_10 = arith.constant 0.000000e+00 : f32
      %12 = vector.broadcast %cst_10 : f32 to vector<32x128xf32>
      %c0_11 = arith.constant 0 : index
      %c0_12 = arith.constant 0 : index
      %13 = vector.load %arg7[%c0_11, %c0_12] : memref<32x128xf32, #tpu.memory_space<vmem>>, vector<32x128xf32>
      tpu.vector_store %arg7[%c0_11, %c0_12], %12 {strides = array<i32>} : memref<32x128xf32, #tpu.memory_space<vmem>>, vector<32x128xf32>,
    } else {
    }
    %c0 = arith.constant 0 : index
    %c0_1 = arith.constant 0 : index
    %3 = vector.load %arg7[%c0, %c0_1] : memref<32x128xf32, #tpu.memory_space<vmem>>, vector<32x128xf32>
    %c0_2 = arith.constant 0 : index
    %c0_3 = arith.constant 0 : index
    %4 = vector.load %arg3[%c0_2, %c0_3] : memref<32x256xbf16, #tpu.memory_space<vmem>>, vector<32x256xbf16>
    %c0_4 = arith.constant 0 : index
    %c0_5 = arith.constant 0 : index
    %5 = vector.load %arg4[%c0_4, %c0_5] : memref<256x128xbf16, #tpu.memory_space<vmem>>, vector<256x128xbf16>
    %cst = arith.constant dense<0.000000e+00> : vector<32x128xf32>
    %6 = tpu.matmul %4, %5, %cst {dimension_numbers = #tpu.dot_dimension_numbers<[1], [0], [0], [1], [0, 0, 1, 1], [], []>} : vector<32x256xbf16>, vector<256x128xbf16>, vector<32x128xf32> -> vector<32x128xf32>
    %7 = arith.addf %3, %6 : vector<32x128xf32>
    %c0_6 = arith.constant 0 : index
    %c0_7 = arith.constant 0 : index
    %8 = vector.load %arg7[%c0_6, %c0_7] : memref<32x128xf32, #tpu.memory_space<vmem>>, vector<32x128xf32>
    tpu.vector_store %arg7[%c0_6, %c0_7], %7 {strides = array<i32>} : memref<32x128xf32, #tpu.memory_space<vmem>>, vector<32x128xf32>,
    %c0_i32_8 = arith.constant 0 : i32
    %9 = arith.cmpi eq, %arg2, %c0_i32_8 : i32
    %10 = arith.extui %9 : i1 to i32
    %c0_i32_9 = arith.constant 0 : i32
    %11 = arith.cmpi ne, %10, %c0_i32_9 : i32
    scf.if %11 {
      %c0_10 = arith.constant 0 : index
      %c0_11 = arith.constant 0 : index
      %12 = vector.load %arg7[%c0_10, %c0_11] : memref<32x128xf32, #tpu.memory_space<vmem>>, vector<32x128xf32>
      %c0_12 = arith.constant 0 : index
      %c0_13 = arith.constant 0 : index
      %13 = vector.load %arg5[%c0_12, %c0_13] : memref<1x128xf32, #tpu.memory_space<vmem>>, vector<1x128xf32>
      %14 = vector.broadcast %13 : vector<1x128xf32> to vector<32x128xf32>
      %15 = arith.addf %12, %14 : vector<32x128xf32>
      %c0_14 = arith.constant 0 : index
      %c0_15 = arith.constant 0 : index
      %16 = vector.load %arg6[%c0_14, %c0_15] : memref<32x128xf32, #tpu.memory_space<vmem>>, vector<32x128xf32>
      tpu.vector_store %arg6[%c0_14, %c0_15], %15 {strides = array<i32>} : memref<32x128xf32, #tpu.memory_space<vmem>>, vector<32x128xf32>,
    } else {
    }
    return
  }
  func.func @transform_0(%arg0: i32, %arg1: i32, %arg2: i32) -> (i32, i32) {
    %c0_i32 = arith.constant 0 : i32
    return %arg0, %arg2 : i32, i32
  }
  func.func @transform_1(%arg0: i32, %arg1: i32, %arg2: i32) -> (i32, i32) {
    %c0_i32 = arith.constant 0 : i32
    return %arg2, %arg1 : i32, i32
  }
  func.func @transform_2(%arg0: i32, %arg1: i32, %arg2: i32) -> (i32, i32) {
    %c0_i32 = arith.constant 0 : i32
    %c0_i32_0 = arith.constant 0 : i32
    return %c0_i32, %arg1 : i32, i32
  }
  func.func @transform_3(%arg0: i32, %arg1: i32, %arg2: i32) -> (i32, i32) {
    %c0_i32 = arith.constant 0 : i32
    return %arg0, %arg1 : i32, i32
  }
}

module attributes {stable_mosaic.version = 11 : i64} {
  func.func @_in_kernel(%arg0: i32, %arg1: i32, %arg2: memref<16x32xf32, #tpu.memory_space<vmem>>, %arg3: memref<16x32xf32, #tpu.memory_space<vmem>>) attributes {dimension_semantics = [#tpu.dimension_semantics<parallel>, #tpu.dimension_semantics<parallel>], iteration_bounds = array<i64: 2, 1>, scalar_prefetch = 0 : i64, scratch_operands = 0 : i64, tpu.core_type = #tpu.core_type<tc>, window_params = [{transform_indices = @transform_0, window_bounds = array<i64: 16, 32>}, {transform_indices = @transform_1, window_bounds = array<i64: 16, 32>}]} {
    %c0 = arith.constant 0 : index
    %c0_0 = arith.constant 0 : index
    %0 = vector.load %arg2[%c0, %c0_0] : memref<16x32xf32, #tpu.memory_space<vmem>>, vector<16x32xf32>
    %cst = arith.constant dense<0.000000e+00> : vector<32xf32>
    %1 = vector.multi_reduction <add>, %0, %cst [0] : vector<16x32xf32> to vector<32xf32>
    %2 = vector.shape_cast %1 : vector<32xf32> to vector<1x32xf32>
    %cst_1 = arith.constant 1.600000e+01 : f32
    %3 = vector.broadcast %cst_1 : f32 to vector<1x32xf32>
    %4 = arith.divf %2, %3 : vector<1x32xf32>
    %5 = vector.broadcast %4 : vector<1x32xf32> to vector<16x32xf32>
    %6 = arith.subf %0, %5 : vector<16x32xf32>
    %7 = arith.mulf %6, %6 : vector<16x32xf32>
    %cst_2 = arith.constant dense<0.000000e+00> : vector<32xf32>
    %8 = vector.multi_reduction <add>, %7, %cst_2 [0] : vector<16x32xf32> to vector<32xf32>
    %9 = vector.shape_cast %8 : vector<32xf32> to vector<1x32xf32>
    %cst_3 = arith.constant 1.600000e+01 : f32
    %10 = vector.broadcast %cst_3 : f32 to vector<1x32xf32>
    %11 = arith.divf %9, %10 : vector<1x32xf32>
    %cst_4 = arith.constant 9.99999974E-6 : f32
    %12 = vector.broadcast %cst_4 : f32 to vector<1x32xf32>
    %13 = arith.addf %11, %12 : vector<1x32xf32>
    %14 = math.rsqrt %13 : vector<1x32xf32>
    %15 = vector.broadcast %14 : vector<1x32xf32> to vector<16x32xf32>
    %16 = arith.mulf %6, %15 : vector<16x32xf32>
    %cst_5 = arith.constant 0.000000e+00 : f32
    %17 = vector.broadcast %cst_5 : f32 to vector<16x32xf32>
    %18 = arith.maximumf %16, %17 : vector<16x32xf32>
    %c0_6 = arith.constant 0 : index
    %c0_7 = arith.constant 0 : index
    %19 = vector.load %arg3[%c0_6, %c0_7] : memref<16x32xf32, #tpu.memory_space<vmem>>, vector<16x32xf32>
    tpu.vector_store %arg3[%c0_6, %c0_7], %18 {strides = array<i32>} : memref<16x32xf32, #tpu.memory_space<vmem>>, vector<16x32xf32>,
    return
  }
  func.func @transform_0(%arg0: i32, %arg1: i32) -> (i32, i32) {
    %c0_i32 = arith.constant 0 : i32
    return %arg0, %arg1 : i32, i32
  }
  func.func @transform_1(%arg0: i32, %arg1: i32) -> (i32, i32) {
    %c0_i32 = arith.constant 0 : i32
    return %arg0, %arg1 : i32, i32
  }
}

module attributes {stable_mosaic.version = 11 : i64} {
  func.func @_matmul_bias_kernel(%arg0: i32, %arg1: i32, %arg2: i32, %arg3: memref<32x384xbf16, #tpu.memory_space<vmem>>, %arg4: memref<384x128xbf16, #tpu.memory_space<vmem>>, %arg5: memref<1x128xf32, #tpu.memory_space<vmem>>, %arg6: memref<32x128xf32, #tpu.memory_space<vmem>>, %arg7: memref<32x128xf32, #tpu.memory_space<vmem>>) attributes {dimension_semantics = [#tpu.dimension_semantics<parallel>, #tpu.dimension_semantics<parallel>, #tpu.dimension_semantics<arbitrary>], iteration_bounds = array<i64: 1, 1, 1>, scalar_prefetch = 0 : i64, scratch_operands = 1 : i64, tpu.core_type = #tpu.core_type<tc>, window_params = [{transform_indices = @transform_0, window_bounds = array<i64: 32, 384>}, {transform_indices = @transform_1, window_bounds = array<i64: 384, 128>}, {transform_indices = @transform_2, window_bounds = array<i64: 1, 128>}, {transform_indices = @transform_3, window_bounds = array<i64: 32, 128>}]} {
    %c0_i32 = arith.constant 0 : i32
    %0 = arith.cmpi eq, %arg2, %c0_i32 : i32
    %1 = arith.extui %0 : i1 to i32
    %c0_i32_0 = arith.constant 0 : i32
    %2 = arith.cmpi ne, %1, %c0_i32_0 : i32
    scf.if %2 {
      %cst_10 = arith.constant 0.000000e+00 : f32
      %12 = vector.broadcast %cst_10 : f32 to vector<32x128xf32>
      %c0_11 = arith.constant 0 : index
      %c0_12 = arith.constant 0 : index
      %13 = vector.load %arg7[%c0_11, %c0_12] : memref<32x128xf32, #tpu.memory_space<vmem>>, vector<32x128xf32>
      tpu.vector_store %arg7[%c0_11, %c0_12], %12 {strides = array<i32>} : memref<32x128xf32, #tpu.memory_space<vmem>>, vector<32x128xf32>,
    } else {
    }
    %c0 = arith.constant 0 : index
    %c0_1 = arith.constant 0 : index
    %3 = vector.load %arg7[%c0, %c0_1] : memref<32x128xf32, #tpu.memory_space<vmem>>, vector<32x128xf32>
    %c0_2 = arith.constant 0 : index
    %c0_3 = arith.constant 0 : index
    %4 = vector.load %arg3[%c0_2, %c0_3] : memref<32x384xbf16, #tpu.memory_space<vmem>>, vector<32x384xbf16>
    %c0_4 = arith.constant 0 : index
    %c0_5 = arith.constant 0 : index
    %5 = vector.load %arg4[%c0_4, %c0_5] : memref<384x128xbf16, #tpu.memory_space<vmem>>, vector<384x128xbf16>
    %cst = arith.constant dense<0.000000e+00> : vector<32x128xf32>
    %6 = tpu.matmul %4, %5, %cst {dimension_numbers = #tpu.dot_dimension_numbers<[1], [0], [0], [1], [0, 0, 1, 1], [], []>} : vector<32x384xbf16>, vector<384x128xbf16>, vector<32x128xf32> -> vector<32x128xf32>
    %7 = arith.addf %3, %6 : vector<32x128xf32>
    %c0_6 = arith.constant 0 : index
    %c0_7 = arith.constant 0 : index
    %8 = vector.load %arg7[%c0_6, %c0_7] : memref<32x128xf32, #tpu.memory_space<vmem>>, vector<32x128xf32>
    tpu.vector_store %arg7[%c0_6, %c0_7], %7 {strides = array<i32>} : memref<32x128xf32, #tpu.memory_space<vmem>>, vector<32x128xf32>,
    %c0_i32_8 = arith.constant 0 : i32
    %9 = arith.cmpi eq, %arg2, %c0_i32_8 : i32
    %10 = arith.extui %9 : i1 to i32
    %c0_i32_9 = arith.constant 0 : i32
    %11 = arith.cmpi ne, %10, %c0_i32_9 : i32
    scf.if %11 {
      %c0_10 = arith.constant 0 : index
      %c0_11 = arith.constant 0 : index
      %12 = vector.load %arg7[%c0_10, %c0_11] : memref<32x128xf32, #tpu.memory_space<vmem>>, vector<32x128xf32>
      %c0_12 = arith.constant 0 : index
      %c0_13 = arith.constant 0 : index
      %13 = vector.load %arg5[%c0_12, %c0_13] : memref<1x128xf32, #tpu.memory_space<vmem>>, vector<1x128xf32>
      %14 = vector.broadcast %13 : vector<1x128xf32> to vector<32x128xf32>
      %15 = arith.addf %12, %14 : vector<32x128xf32>
      %c0_14 = arith.constant 0 : index
      %c0_15 = arith.constant 0 : index
      %16 = vector.load %arg6[%c0_14, %c0_15] : memref<32x128xf32, #tpu.memory_space<vmem>>, vector<32x128xf32>
      tpu.vector_store %arg6[%c0_14, %c0_15], %15 {strides = array<i32>} : memref<32x128xf32, #tpu.memory_space<vmem>>, vector<32x128xf32>,
    } else {
    }
    return
  }
  func.func @transform_0(%arg0: i32, %arg1: i32, %arg2: i32) -> (i32, i32) {
    %c0_i32 = arith.constant 0 : i32
    return %arg0, %arg2 : i32, i32
  }
  func.func @transform_1(%arg0: i32, %arg1: i32, %arg2: i32) -> (i32, i32) {
    %c0_i32 = arith.constant 0 : i32
    return %arg2, %arg1 : i32, i32
  }
  func.func @transform_2(%arg0: i32, %arg1: i32, %arg2: i32) -> (i32, i32) {
    %c0_i32 = arith.constant 0 : i32
    %c0_i32_0 = arith.constant 0 : i32
    return %c0_i32, %arg1 : i32, i32
  }
  func.func @transform_3(%arg0: i32, %arg1: i32, %arg2: i32) -> (i32, i32) {
    %c0_i32 = arith.constant 0 : i32
    return %arg0, %arg1 : i32, i32
  }
}

module attributes {stable_mosaic.version = 11 : i64} {
  func.func @_in_residual_kernel(%arg0: i32, %arg1: i32, %arg2: memref<16x32xf32, #tpu.memory_space<vmem>>, %arg3: memref<16x32xf32, #tpu.memory_space<vmem>>, %arg4: memref<16x32xf32, #tpu.memory_space<vmem>>) attributes {dimension_semantics = [#tpu.dimension_semantics<parallel>, #tpu.dimension_semantics<parallel>], iteration_bounds = array<i64: 2, 1>, scalar_prefetch = 0 : i64, scratch_operands = 0 : i64, tpu.core_type = #tpu.core_type<tc>, window_params = [{transform_indices = @transform_0, window_bounds = array<i64: 16, 32>}, {transform_indices = @transform_1, window_bounds = array<i64: 16, 32>}, {transform_indices = @transform_2, window_bounds = array<i64: 16, 32>}]} {
    %c0 = arith.constant 0 : index
    %c0_0 = arith.constant 0 : index
    %0 = vector.load %arg2[%c0, %c0_0] : memref<16x32xf32, #tpu.memory_space<vmem>>, vector<16x32xf32>
    %cst = arith.constant dense<0.000000e+00> : vector<32xf32>
    %1 = vector.multi_reduction <add>, %0, %cst [0] : vector<16x32xf32> to vector<32xf32>
    %2 = vector.shape_cast %1 : vector<32xf32> to vector<1x32xf32>
    %cst_1 = arith.constant 1.600000e+01 : f32
    %3 = vector.broadcast %cst_1 : f32 to vector<1x32xf32>
    %4 = arith.divf %2, %3 : vector<1x32xf32>
    %5 = vector.broadcast %4 : vector<1x32xf32> to vector<16x32xf32>
    %6 = arith.subf %0, %5 : vector<16x32xf32>
    %7 = arith.mulf %6, %6 : vector<16x32xf32>
    %cst_2 = arith.constant dense<0.000000e+00> : vector<32xf32>
    %8 = vector.multi_reduction <add>, %7, %cst_2 [0] : vector<16x32xf32> to vector<32xf32>
    %9 = vector.shape_cast %8 : vector<32xf32> to vector<1x32xf32>
    %cst_3 = arith.constant 1.600000e+01 : f32
    %10 = vector.broadcast %cst_3 : f32 to vector<1x32xf32>
    %11 = arith.divf %9, %10 : vector<1x32xf32>
    %cst_4 = arith.constant 9.99999974E-6 : f32
    %12 = vector.broadcast %cst_4 : f32 to vector<1x32xf32>
    %13 = arith.addf %11, %12 : vector<1x32xf32>
    %14 = math.rsqrt %13 : vector<1x32xf32>
    %15 = vector.broadcast %14 : vector<1x32xf32> to vector<16x32xf32>
    %16 = arith.mulf %6, %15 : vector<16x32xf32>
    %c0_5 = arith.constant 0 : index
    %c0_6 = arith.constant 0 : index
    %17 = vector.load %arg3[%c0_5, %c0_6] : memref<16x32xf32, #tpu.memory_space<vmem>>, vector<16x32xf32>
    %18 = arith.addf %16, %17 : vector<16x32xf32>
    %c0_7 = arith.constant 0 : index
    %c0_8 = arith.constant 0 : index
    %19 = vector.load %arg4[%c0_7, %c0_8] : memref<16x32xf32, #tpu.memory_space<vmem>>, vector<16x32xf32>
    tpu.vector_store %arg4[%c0_7, %c0_8], %18 {strides = array<i32>} : memref<16x32xf32, #tpu.memory_space<vmem>>, vector<16x32xf32>,
    return
  }
  func.func @transform_0(%arg0: i32, %arg1: i32) -> (i32, i32) {
    %c0_i32 = arith.constant 0 : i32
    return %arg0, %arg1 : i32, i32
  }
  func.func @transform_1(%arg0: i32, %arg1: i32) -> (i32, i32) {
    %c0_i32 = arith.constant 0 : i32
    return %arg0, %arg1 : i32, i32
  }
  func.func @transform_2(%arg0: i32, %arg1: i32) -> (i32, i32) {
    %c0_i32 = arith.constant 0 : i32
    return %arg0, %arg1 : i32, i32
  }
}

module attributes {stable_mosaic.version = 11 : i64} {
  func.func @_matmul_bias_kernel(%arg0: i32, %arg1: i32, %arg2: i32, %arg3: memref<32x128xbf16, #tpu.memory_space<vmem>>, %arg4: memref<128x128xbf16, #tpu.memory_space<vmem>>, %arg5: memref<1x128xf32, #tpu.memory_space<vmem>>, %arg6: memref<32x128xf32, #tpu.memory_space<vmem>>, %arg7: memref<32x128xf32, #tpu.memory_space<vmem>>) attributes {dimension_semantics = [#tpu.dimension_semantics<parallel>, #tpu.dimension_semantics<parallel>, #tpu.dimension_semantics<arbitrary>], iteration_bounds = array<i64: 1, 1, 1>, scalar_prefetch = 0 : i64, scratch_operands = 1 : i64, tpu.core_type = #tpu.core_type<tc>, window_params = [{transform_indices = @transform_0, window_bounds = array<i64: 32, 128>}, {transform_indices = @transform_1, window_bounds = array<i64: 128, 128>}, {transform_indices = @transform_2, window_bounds = array<i64: 1, 128>}, {transform_indices = @transform_3, window_bounds = array<i64: 32, 128>}]} {
    %c0_i32 = arith.constant 0 : i32
    %0 = arith.cmpi eq, %arg2, %c0_i32 : i32
    %1 = arith.extui %0 : i1 to i32
    %c0_i32_0 = arith.constant 0 : i32
    %2 = arith.cmpi ne, %1, %c0_i32_0 : i32
    scf.if %2 {
      %cst_10 = arith.constant 0.000000e+00 : f32
      %12 = vector.broadcast %cst_10 : f32 to vector<32x128xf32>
      %c0_11 = arith.constant 0 : index
      %c0_12 = arith.constant 0 : index
      %13 = vector.load %arg7[%c0_11, %c0_12] : memref<32x128xf32, #tpu.memory_space<vmem>>, vector<32x128xf32>
      tpu.vector_store %arg7[%c0_11, %c0_12], %12 {strides = array<i32>} : memref<32x128xf32, #tpu.memory_space<vmem>>, vector<32x128xf32>,
    } else {
    }
    %c0 = arith.constant 0 : index
    %c0_1 = arith.constant 0 : index
    %3 = vector.load %arg7[%c0, %c0_1] : memref<32x128xf32, #tpu.memory_space<vmem>>, vector<32x128xf32>
    %c0_2 = arith.constant 0 : index
    %c0_3 = arith.constant 0 : index
    %4 = vector.load %arg3[%c0_2, %c0_3] : memref<32x128xbf16, #tpu.memory_space<vmem>>, vector<32x128xbf16>
    %c0_4 = arith.constant 0 : index
    %c0_5 = arith.constant 0 : index
    %5 = vector.load %arg4[%c0_4, %c0_5] : memref<128x128xbf16, #tpu.memory_space<vmem>>, vector<128x128xbf16>
    %cst = arith.constant dense<0.000000e+00> : vector<32x128xf32>
    %6 = tpu.matmul %4, %5, %cst {dimension_numbers = #tpu.dot_dimension_numbers<[1], [0], [0], [1], [0, 0, 1, 1], [], []>} : vector<32x128xbf16>, vector<128x128xbf16>, vector<32x128xf32> -> vector<32x128xf32>
    %7 = arith.addf %3, %6 : vector<32x128xf32>
    %c0_6 = arith.constant 0 : index
    %c0_7 = arith.constant 0 : index
    %8 = vector.load %arg7[%c0_6, %c0_7] : memref<32x128xf32, #tpu.memory_space<vmem>>, vector<32x128xf32>
    tpu.vector_store %arg7[%c0_6, %c0_7], %7 {strides = array<i32>} : memref<32x128xf32, #tpu.memory_space<vmem>>, vector<32x128xf32>,
    %c0_i32_8 = arith.constant 0 : i32
    %9 = arith.cmpi eq, %arg2, %c0_i32_8 : i32
    %10 = arith.extui %9 : i1 to i32
    %c0_i32_9 = arith.constant 0 : i32
    %11 = arith.cmpi ne, %10, %c0_i32_9 : i32
    scf.if %11 {
      %c0_10 = arith.constant 0 : index
      %c0_11 = arith.constant 0 : index
      %12 = vector.load %arg7[%c0_10, %c0_11] : memref<32x128xf32, #tpu.memory_space<vmem>>, vector<32x128xf32>
      %c0_12 = arith.constant 0 : index
      %c0_13 = arith.constant 0 : index
      %13 = vector.load %arg5[%c0_12, %c0_13] : memref<1x128xf32, #tpu.memory_space<vmem>>, vector<1x128xf32>
      %14 = vector.broadcast %13 : vector<1x128xf32> to vector<32x128xf32>
      %15 = arith.addf %12, %14 : vector<32x128xf32>
      %c0_14 = arith.constant 0 : index
      %c0_15 = arith.constant 0 : index
      %16 = vector.load %arg6[%c0_14, %c0_15] : memref<32x128xf32, #tpu.memory_space<vmem>>, vector<32x128xf32>
      tpu.vector_store %arg6[%c0_14, %c0_15], %15 {strides = array<i32>} : memref<32x128xf32, #tpu.memory_space<vmem>>, vector<32x128xf32>,
    } else {
    }
    return
  }
  func.func @transform_0(%arg0: i32, %arg1: i32, %arg2: i32) -> (i32, i32) {
    %c0_i32 = arith.constant 0 : i32
    return %arg0, %arg2 : i32, i32
  }
  func.func @transform_1(%arg0: i32, %arg1: i32, %arg2: i32) -> (i32, i32) {
    %c0_i32 = arith.constant 0 : i32
    return %arg2, %arg1 : i32, i32
  }
  func.func @transform_2(%arg0: i32, %arg1: i32, %arg2: i32) -> (i32, i32) {
    %c0_i32 = arith.constant 0 : i32
    %c0_i32_0 = arith.constant 0 : i32
    return %c0_i32, %arg1 : i32, i32
  }
  func.func @transform_3(%arg0: i32, %arg1: i32, %arg2: i32) -> (i32, i32) {
    %c0_i32 = arith.constant 0 : i32
    return %arg0, %arg1 : i32, i32
  }
}

module attributes {stable_mosaic.version = 11 : i64} {
  func.func @_matmul_bias_kernel(%arg0: i32, %arg1: i32, %arg2: i32, %arg3: memref<256x512xbf16, #tpu.memory_space<vmem>>, %arg4: memref<512x128xbf16, #tpu.memory_space<vmem>>, %arg5: memref<1x128xf32, #tpu.memory_space<vmem>>, %arg6: memref<256x128xf32, #tpu.memory_space<vmem>>, %arg7: memref<256x128xf32, #tpu.memory_space<vmem>>) attributes {dimension_semantics = [#tpu.dimension_semantics<parallel>, #tpu.dimension_semantics<parallel>, #tpu.dimension_semantics<arbitrary>], iteration_bounds = array<i64: 2, 1, 1>, scalar_prefetch = 0 : i64, scratch_operands = 1 : i64, tpu.core_type = #tpu.core_type<tc>, window_params = [{transform_indices = @transform_0, window_bounds = array<i64: 256, 512>}, {transform_indices = @transform_1, window_bounds = array<i64: 512, 128>}, {transform_indices = @transform_2, window_bounds = array<i64: 1, 128>}, {transform_indices = @transform_3, window_bounds = array<i64: 256, 128>}]} {
    %c0_i32 = arith.constant 0 : i32
    %0 = arith.cmpi eq, %arg2, %c0_i32 : i32
    %1 = arith.extui %0 : i1 to i32
    %c0_i32_0 = arith.constant 0 : i32
    %2 = arith.cmpi ne, %1, %c0_i32_0 : i32
    scf.if %2 {
      %cst_10 = arith.constant 0.000000e+00 : f32
      %12 = vector.broadcast %cst_10 : f32 to vector<256x128xf32>
      %c0_11 = arith.constant 0 : index
      %c0_12 = arith.constant 0 : index
      %13 = vector.load %arg7[%c0_11, %c0_12] : memref<256x128xf32, #tpu.memory_space<vmem>>, vector<256x128xf32>
      tpu.vector_store %arg7[%c0_11, %c0_12], %12 {strides = array<i32>} : memref<256x128xf32, #tpu.memory_space<vmem>>, vector<256x128xf32>,
    } else {
    }
    %c0 = arith.constant 0 : index
    %c0_1 = arith.constant 0 : index
    %3 = vector.load %arg7[%c0, %c0_1] : memref<256x128xf32, #tpu.memory_space<vmem>>, vector<256x128xf32>
    %c0_2 = arith.constant 0 : index
    %c0_3 = arith.constant 0 : index
    %4 = vector.load %arg3[%c0_2, %c0_3] : memref<256x512xbf16, #tpu.memory_space<vmem>>, vector<256x512xbf16>
    %c0_4 = arith.constant 0 : index
    %c0_5 = arith.constant 0 : index
    %5 = vector.load %arg4[%c0_4, %c0_5] : memref<512x128xbf16, #tpu.memory_space<vmem>>, vector<512x128xbf16>
    %cst = arith.constant dense<0.000000e+00> : vector<256x128xf32>
    %6 = tpu.matmul %4, %5, %cst {dimension_numbers = #tpu.dot_dimension_numbers<[1], [0], [0], [1], [0, 0, 1, 1], [], []>} : vector<256x512xbf16>, vector<512x128xbf16>, vector<256x128xf32> -> vector<256x128xf32>
    %7 = arith.addf %3, %6 : vector<256x128xf32>
    %c0_6 = arith.constant 0 : index
    %c0_7 = arith.constant 0 : index
    %8 = vector.load %arg7[%c0_6, %c0_7] : memref<256x128xf32, #tpu.memory_space<vmem>>, vector<256x128xf32>
    tpu.vector_store %arg7[%c0_6, %c0_7], %7 {strides = array<i32>} : memref<256x128xf32, #tpu.memory_space<vmem>>, vector<256x128xf32>,
    %c0_i32_8 = arith.constant 0 : i32
    %9 = arith.cmpi eq, %arg2, %c0_i32_8 : i32
    %10 = arith.extui %9 : i1 to i32
    %c0_i32_9 = arith.constant 0 : i32
    %11 = arith.cmpi ne, %10, %c0_i32_9 : i32
    scf.if %11 {
      %c0_10 = arith.constant 0 : index
      %c0_11 = arith.constant 0 : index
      %12 = vector.load %arg7[%c0_10, %c0_11] : memref<256x128xf32, #tpu.memory_space<vmem>>, vector<256x128xf32>
      %c0_12 = arith.constant 0 : index
      %c0_13 = arith.constant 0 : index
      %13 = vector.load %arg5[%c0_12, %c0_13] : memref<1x128xf32, #tpu.memory_space<vmem>>, vector<1x128xf32>
      %14 = vector.broadcast %13 : vector<1x128xf32> to vector<256x128xf32>
      %15 = arith.addf %12, %14 : vector<256x128xf32>
      %16 = math.tanh %15 : vector<256x128xf32>
      %c0_14 = arith.constant 0 : index
      %c0_15 = arith.constant 0 : index
      %17 = vector.load %arg6[%c0_14, %c0_15] : memref<256x128xf32, #tpu.memory_space<vmem>>, vector<256x128xf32>
      tpu.vector_store %arg6[%c0_14, %c0_15], %16 {strides = array<i32>} : memref<256x128xf32, #tpu.memory_space<vmem>>, vector<256x128xf32>,
    } else {
    }
    return
  }
  func.func @transform_0(%arg0: i32, %arg1: i32, %arg2: i32) -> (i32, i32) {
    %c0_i32 = arith.constant 0 : i32
    return %arg0, %arg2 : i32, i32
  }
  func.func @transform_1(%arg0: i32, %arg1: i32, %arg2: i32) -> (i32, i32) {
    %c0_i32 = arith.constant 0 : i32
    return %arg2, %arg1 : i32, i32
  }
  func.func @transform_2(%arg0: i32, %arg1: i32, %arg2: i32) -> (i32, i32) {
    %c0_i32 = arith.constant 0 : i32
    %c0_i32_0 = arith.constant 0 : i32
    return %c0_i32, %arg1 : i32, i32
  }
  func.func @transform_3(%arg0: i32, %arg1: i32, %arg2: i32) -> (i32, i32) {
    %c0_i32 = arith.constant 0 : i32
    return %arg0, %arg1 : i32, i32
  }
}

</mosaic_0001>

<bundles_post_ra>
// kernel: tile.13
= control target key start
LH: loop header
LB: loop body
LE: loop exit
PB: predicated region body
PF: predicated region fallthrough
CT: control target
= control target key end

     0   :  { %2 = vsyncpa [#allocation1], 0  ;;  %s42_s6 = smov [#allocation0]   ;;  %s59_s0 = inlined_call_operand.hbm [shape: f32[16], index: 0, kind: input, shape index: {}]   ;;  %s60_s1 = inlined_call_operand.vmem [shape: f32[4,16], index: 1, kind: output, shape index: {}]  }
   0x1   :  { %s9_s7 = sshll.u32 %s42_s6, 4  ;;  %s10_s7 = int_to_ptr.vmem [resolvable:$true] %s9_s7 }
   0x2   :  { %s28_s8 = scalar_lea.vmem %s10_s7, 16  ;;  %s32_s9 = scalar_lea.vmem %s10_s7, 32 }
   0x3   :  { %p29_p0 = scmp.ne.s32.totalorder %s10_s7, %s28_s8  ;;  %p33_p1 = scmp.lt.s32.totalorder %s10_s7, %s10_s7 }
   0x4   :  { %p34_p2 = scmp.lt.s32.totalorder %s32_s9, %s28_s8 }
   0x6   :  { %p35_p3 = por %p34_p2, %p33_p1 }
   0x8   :  { %p36_p4 = pnand %p35_p3, %p29_p0 }
   0xa   :  { %39 = shalt.err (!%p36_p4)
}
   0xb   :  { %12 = dma.hbm_to_vmem [thread:$0]  %s59_s0, 16, %s10_s7, [#allocation1]  }
   0xc   :  { %40 = dma.done.wait [#allocation1], 16  }
   0xd   :  { %41 = vsyncadd [#allocation1], 4294967280  ;;  %v16_v0 = vld [vmem:[#allocation0] ss:$0 sm:$0xff] }
   0xe   :  { %17 = vst [vmem:[%s60_s1] sm:$0xf] %v16_v0 }
   0xf   :  { %18 = vsyncpa [#allocation1], 1 }

// kernel: tile.14
= control target key start
LH: loop header
LB: loop body
LE: loop exit
PB: predicated region body
PF: predicated region fallthrough
CT: control target
= control target key end

     0   :  { %vm8_vm0 = vcmask 130048   ;;  %s40_s8 = smov 16   ;;  %s41_s9 = smov 32   ;;  %vm14_vm1 = vcmask 523648   ;;  %vm20_vm2 = vcmask 392448   ;;  %vm26_vm3 = vcmask 261248   ;;  %s58_s0 = inlined_call_operand.vmem [shape: f32[4,16], index: 0, kind: input, shape index: {}]   ;;  %s59_s1 = inlined_call_operand.vmem [shape: f32[1,64], index: 1, kind: output, shape index: {}]  }
   0x1   :  { %v5_v0 = vld [vmem:[%s58_s0] sm:$0xf]  ;;  %s39_s0 = smov 48  }
   0x2   :  { %6 = vst [vmem:[#allocation1] sm:$0xf] %v5_v0 }
   0x9   :  { %v11_v1 = vld [vmem:[#allocation1 + $0x3] sm:$0x1]   ;;  %v23_v2 = vld [vmem:[#allocation1 + $0x1] sm:$0x1]   ;;  %v7_v3 = vld [vmem:[#allocation1] sm:$0x1]  }
   0xa   :  { %12 = vrot.lane.b32.xlu0 %v11_v1, %s39_s0  ;;  %24 = vrot.lane.b32.xlu1 %v23_v2, %s40_s8  ;;  %v17_v4 = vld [vmem:[#allocation1 + $0x2] sm:$0x1]   ;;  %9 = vst.msk [vmem:[#allocation0] sm:$0x1] %vm8_vm0, %v7_v3  }
   0xe   :  { %18 = vrot.lane.b32.xlu0 %v17_v4, %s41_s9 }
  0x7c   :  { %v13_v5 = vpop.permute.xlu0 %12   ;;  %v25_v6 = vpop.permute.xlu1 %24  }
  0x7d   :  { %15 = vst.msk [vmem:[#allocation0] sm:$0x1] %vm14_vm1, %v13_v5  }
  0x80   :  { %v19_v7 = vpop.permute.xlu0 %18  }
  0x81   :  { %21 = vst.msk [vmem:[#allocation0] sm:$0x1] %vm20_vm2, %v19_v7  }
  0x82   :  { %27 = vst.msk [vmem:[#allocation0] sm:$0x1] %vm26_vm3, %v25_v6  }
  0x89   :  { %v32_v8 = vld [vmem:[#allocation0] sm:$0x1] }
  0x8a   :  { %35 = vst [vmem:[%s59_s1] sm:$0x1] %v32_v8 }

// kernel: tile.19
= control target key start
LH: loop header
LB: loop body
LE: loop exit
PB: predicated region body
PF: predicated region fallthrough
CT: control target
= control target key end

     0   :  { %vm8_vm0 = vcmask 64512   ;;  %s40_s8 = smov 8   ;;  %s41_s9 = smov 16   ;;  %vm14_vm1 = vcmask 261312   ;;  %vm20_vm2 = vcmask 195712   ;;  %vm26_vm3 = vcmask 130112   ;;  %s58_s0 = inlined_call_operand.vmem [shape: f32[4,8], index: 0, kind: input, shape index: {}]   ;;  %s59_s1 = inlined_call_operand.vmem [shape: f32[1,32], index: 1, kind: output, shape index: {}]  }
   0x1   :  { %v5_v0 = vld [vmem:[%s58_s0] sm:$0xf]  ;;  %s39_s0 = smov 24  }
   0x2   :  { %6 = vst [vmem:[#allocation1] sm:$0xf] %v5_v0 }
   0x9   :  { %v11_v1 = vld [vmem:[#allocation1 + $0x3] sm:$0x1]   ;;  %v23_v2 = vld [vmem:[#allocation1 + $0x1] sm:$0x1]   ;;  %v7_v3 = vld [vmem:[#allocation1] sm:$0x1]  }
   0xa   :  { %12 = vrot.lane.b32.xlu0 %v11_v1, %s39_s0  ;;  %24 = vrot.lane.b32.xlu1 %v23_v2, %s40_s8  ;;  %v17_v4 = vld [vmem:[#allocation1 + $0x2] sm:$0x1]   ;;  %9 = vst.msk [vmem:[#allocation0] sm:$0x1] %vm8_vm0, %v7_v3  }
   0xe   :  { %18 = vrot.lane.b32.xlu0 %v17_v4, %s41_s9 }
  0x7c   :  { %v13_v5 = vpop.permute.xlu0 %12   ;;  %v25_v6 = vpop.permute.xlu1 %24  }
  0x7d   :  { %15 = vst.msk [vmem:[#allocation0] sm:$0x1] %vm14_vm1, %v13_v5  }
  0x80   :  { %v19_v7 = vpop.permute.xlu0 %18  }
  0x81   :  { %21 = vst.msk [vmem:[#allocation0] sm:$0x1] %vm20_vm2, %v19_v7  }
  0x82   :  { %27 = vst.msk [vmem:[#allocation0] sm:$0x1] %vm26_vm3, %v25_v6  }
  0x89   :  { %v32_v8 = vld [vmem:[#allocation0] sm:$0x1] }
  0x8a   :  { %35 = vst [vmem:[%s59_s1] sm:$0x1] %v32_v8 }

// kernel: tile.18
= control target key start
LH: loop header
LB: loop body
LE: loop exit
PB: predicated region body
PF: predicated region fallthrough
CT: control target
= control target key end

     0   :  { %2 = vsyncpa [#allocation1], 0  ;;  %s42_s6 = smov [#allocation0]   ;;  %s59_s0 = inlined_call_operand.hbm [shape: f32[8], index: 0, kind: input, shape index: {}]   ;;  %s60_s1 = inlined_call_operand.vmem [shape: f32[4,8], index: 1, kind: output, shape index: {}]  }
   0x1   :  { %s9_s7 = sshll.u32 %s42_s6, 4  ;;  %s10_s7 = int_to_ptr.vmem [resolvable:$true] %s9_s7 }
   0x2   :  { %s28_s8 = scalar_lea.vmem %s10_s7, 16  ;;  %s32_s9 = scalar_lea.vmem %s10_s7, 32 }
   0x3   :  { %p29_p0 = scmp.ne.s32.totalorder %s10_s7, %s28_s8  ;;  %p33_p1 = scmp.lt.s32.totalorder %s10_s7, %s10_s7 }
   0x4   :  { %p34_p2 = scmp.lt.s32.totalorder %s32_s9, %s28_s8 }
   0x6   :  { %p35_p3 = por %p34_p2, %p33_p1 }
   0x8   :  { %p36_p4 = pnand %p35_p3, %p29_p0 }
   0xa   :  { %39 = shalt.err (!%p36_p4)
}
   0xb   :  { %12 = dma.hbm_to_vmem [thread:$0]  %s59_s0, 16, %s10_s7, [#allocation1]  }
   0xc   :  { %40 = dma.done.wait [#allocation1], 16  }
   0xd   :  { %41 = vsyncadd [#allocation1], 4294967280  ;;  %v16_v0 = vld [vmem:[#allocation0] ss:$0 sm:$0xff] }
   0xe   :  { %17 = vst [vmem:[%s60_s1] sm:$0xf] %v16_v0 }
   0xf   :  { %18 = vsyncpa [#allocation1], 1 }

// kernel: define_g_forward.36
= control target key start
LH: loop header
LB: loop body
LE: loop exit
PB: predicated region body
PF: predicated region fallthrough
CT: control target
= control target key end

     0   :  { %s636_s6 = smov 0   ;;  %s638_s7 = smov 0   ;;  %s1196_s0 = inlined_call_operand.vmem [shape: f32[512,8], index: 0, kind: input, shape index: {}]   ;;  %s1197_s1 = inlined_call_operand.vmem [shape: f32[512,8], index: 1, kind: output, shape index: {}]  }
   0x1   :  { %s640_s8 = smov 0  }
   0x2 LB: > { %s23_s9 = sadd.s32 1, %s620_s7  ;;  %p569_p0 = scmp.ge.s32.totalorder %s624_s8, 1  ;;  %s624_s8 = sphi %s640_s8, %s11_s8   ;;  %s620_s7 = sphi %s638_s7, %s1199_s7   ;;  %s616_s6 = sphi %s636_s6, %s1198_s6  }
   0x3   : > { %p25_p1 = scmp.ge.s32.totalorder %s23_s9, 2  ;;  %p107_p2 = scmp.lt.s32.totalorder %s624_s8, 3 }
   0x5   : > { %s1201_s9 = smov (%p25_p1, %s23_s9), 0  ;;  %p108_p3 = pnand %p569_p0, %p107_p2 }
   0x6   : > { %s570_s10 = sshll.u32 (!%p108_p3), %s616_s6, 5 }
   0x7   : > { %111 = sbr.rel (%p108_p3) target bundleno = 211 (0xd3), region = 24  ;;  %p134_p4 = scmp.lt.s32.totalorder (!%p108_p3), %s570_s10, 63 }
   0xc   : > { %s1203_s10 = smov (!%p134_p4, %s570_s10), 63  ;;  %vm183_vm0 = vcmask 64512  }
   0xd   : > { %s571_s11 = sshll.u32 %s1203_s10, 3 }
   0xe   : > { %s662_s14 = scalar_lea.vmem %s1196_s0, %s571_s11  ;;  %s1065_s17 = scalar_lea.vmem %s1197_s1, %s571_s11 }
   0xf   : > { %v665_v0 = vld [vmem:[%s662_s14] sm:$0xff]  ;;  %v668_v1 = vld [vmem:[%s662_s14 + $0x8] sm:$0xff]  ;;  %v671_v2 = vld [vmem:[%s662_s14 + $0x10] sm:$0xff] }
  0x10   : > { %v674_v3 = vld [vmem:[%s662_s14 + $0x18] sm:$0xff]  ;;  %v184_v4 = vsel %vm183_vm0, %v665_v0, 0.0  ;;  %v185_v5 = vsel %vm183_vm0, %v668_v1, 0.0  ;;  %v187_v6 = vsel %vm183_vm0, %v671_v2, 0.0  ;;  %v683_v7 = vld [vmem:[%s662_s14 + $0x20] sm:$0xff]  ;;  %v688_v10 = vld [vmem:[%s662_s14 + $0x28] sm:$0xff] }
  0x11   : > { %v186_v8 = vadd.f32 %v185_v5, %v184_v4  ;;  %v189_v9 = vsel %vm183_vm0, %v674_v3, 0.0  ;;  %v191_v12 = vsel %vm183_vm0, %v683_v7, 0.0  ;;  %v693_v13 = vld [vmem:[%s662_s14 + $0x30] sm:$0xff]  ;;  %v193_v15 = vsel %vm183_vm0, %v688_v10, 0.0  ;;  %v698_v16 = vld [vmem:[%s662_s14 + $0x38] sm:$0xff]  ;;  %v703_v19 = vld [vmem:[%s662_s14 + $0x40] sm:$0xff] }
  0x12   : > { %v195_v18 = vsel %vm183_vm0, %v693_v13, 0.0  ;;  %v197_v21 = vsel %vm183_vm0, %v698_v16, 0.0  ;;  %v708_v22 = vld [vmem:[%s662_s14 + $0x48] sm:$0xff]  ;;  %v199_v24 = vsel %vm183_vm0, %v703_v19, 0.0  ;;  %v713_v25 = vld [vmem:[%s662_s14 + $0x50] sm:$0xff]  ;;  %v718_v28 = vld [vmem:[%s662_s14 + $0x58] sm:$0xff] }
  0x13   : > { %v188_v11 = vadd.f32 %v187_v6, %v186_v8  ;;  %v201_v27 = vsel %vm183_vm0, %v708_v22, 0.0  ;;  %v203_v30 = vsel %vm183_vm0, %v713_v25, 0.0  ;;  %v723_v31 = vld [vmem:[%s662_s14 + $0x60] sm:$0xff]  ;;  %v205_v33 = vsel %vm183_vm0, %v718_v28, 0.0  ;;  %v728_v34 = vld [vmem:[%s662_s14 + $0x68] sm:$0xff]  ;;  %v733_v37 = vld [vmem:[%s662_s14 + $0x70] sm:$0xff] }
  0x14   : > { %v207_v36 = vsel %vm183_vm0, %v723_v31, 0.0  ;;  %v209_v39 = vsel %vm183_vm0, %v728_v34, 0.0  ;;  %v738_v40 = vld [vmem:[%s662_s14 + $0x78] sm:$0xff]  ;;  %v211_v42 = vsel %vm183_vm0, %v733_v37, 0.0  ;;  %v743_v43 = vld [vmem:[%s662_s14 + $0x80] sm:$0xff]  ;;  %v748_v46 = vld [vmem:[%s662_s14 + $0x88] sm:$0xff] }
  0x15   : > { %v190_v14 = vadd.f32 %v189_v9, %v188_v11  ;;  %v213_v45 = vsel %vm183_vm0, %v738_v40, 0.0  ;;  %v215_v48 = vsel %vm183_vm0, %v743_v43, 0.0  ;;  %v753_v49 = vld [vmem:[%s662_s14 + $0x90] sm:$0xff]  ;;  %v217_v51 = vsel %vm183_vm0, %v748_v46, 0.0  ;;  %v758_v52 = vld [vmem:[%s662_s14 + $0x98] sm:$0xff]  ;;  %v763_v55 = vld [vmem:[%s662_s14 + $0xa0] sm:$0xff] }
  0x16   : > { %v219_v54 = vsel %vm183_vm0, %v753_v49, 0.0  ;;  %v221_v57 = vsel %vm183_vm0, %v758_v52, 0.0  ;;  %v768_v58 = vld [vmem:[%s662_s14 + $0xa8] sm:$0xff]  ;;  %v223_v60 = vsel %vm183_vm0, %v763_v55, 0.0  ;;  %v773_v61 = vld [vmem:[%s662_s14 + $0xb0] sm:$0xff]  ;;  %v778_v4 = vld [vmem:[%s662_s14 + $0xb8] sm:$0xff] }
  0x17   : > { %v192_v17 = vadd.f32 %v191_v12, %v190_v14  ;;  %v225_v63 = vsel %vm183_vm0, %v768_v58, 0.0  ;;  %v227_v6 = vsel %vm183_vm0, %v773_v61, 0.0  ;;  %v783_v8 = vld [vmem:[%s662_s14 + $0xc0] sm:$0xff]  ;;  %v229_v11 = vsel %vm183_vm0, %v778_v4, 0.0  ;;  %v788_v12 = vld [vmem:[%s662_s14 + $0xc8] sm:$0xff] }
  0x19   : > { %v194_v20 = vadd.f32 %v193_v15, %v192_v17  ;;  %v231_v15 = vsel %vm183_vm0, %v783_v8, 0.0  ;;  %v793_v17 = vld [vmem:[%s662_s14 + $0xd0] sm:$0xff] }
  0x1b   : > { %v196_v23 = vadd.f32 %v195_v18, %v194_v20  ;;  %v233_v20 = vsel %vm183_vm0, %v788_v12, 0.0 }
  0x1d   : > { %v198_v26 = vadd.f32 %v197_v21, %v196_v23  ;;  %v798_v21 = vld [vmem:[%s662_s14 + $0xd8] sm:$0xff] }
  0x1f   : > { %v200_v29 = vadd.f32 %v199_v24, %v198_v26  ;;  %v235_v24 = vsel %vm183_vm0, %v793_v17, 0.0  ;;  %v803_v26 = vld [vmem:[%s662_s14 + $0xe0] sm:$0xff] }
  0x21   : > { %v202_v32 = vadd.f32 %v201_v27, %v200_v29  ;;  %v237_v29 = vsel %vm183_vm0, %v798_v21, 0.0 }
  0x23   : > { %v204_v35 = vadd.f32 %v203_v30, %v202_v32  ;;  %v808_v30 = vld [vmem:[%s662_s14 + $0xe8] sm:$0xff] }
  0x25   : > { %v206_v38 = vadd.f32 %v205_v33, %v204_v35  ;;  %v239_v33 = vsel %vm183_vm0, %v803_v26, 0.0  ;;  %v813_v35 = vld [vmem:[%s662_s14 + $0xf0] sm:$0xff] }
  0x27   : > { %v208_v41 = vadd.f32 %v207_v36, %v206_v38  ;;  %v241_v38 = vsel %vm183_vm0, %v808_v30, 0.0 }
  0x29   : > { %v210_v44 = vadd.f32 %v209_v39, %v208_v41  ;;  %v818_v39 = vld [vmem:[%s662_s14 + $0xf8] sm:$0xff] }
  0x2b   : > { %v212_v47 = vadd.f32 %v211_v42, %v210_v44  ;;  %v243_v42 = vsel %vm183_vm0, %v813_v35, 0.0 }
  0x2d   : > { %v214_v50 = vadd.f32 %v213_v45, %v212_v47  ;;  %v245_v45 = vsel %vm183_vm0, %v818_v39, 0.0 }
  0x2f   : > { %v216_v53 = vadd.f32 %v215_v48, %v214_v50 }
  0x31   : > { %v218_v56 = vadd.f32 %v217_v51, %v216_v53 }
  0x33   : > { %v220_v59 = vadd.f32 %v219_v54, %v218_v56 }
  0x35   : > { %v222_v62 = vadd.f32 %v221_v57, %v220_v59 }
  0x37   : > { %v224_v5 = vadd.f32 %v223_v60, %v222_v62 }
  0x39   : > { %v226_v9 = vadd.f32 %v225_v63, %v224_v5 }
  0x3b   : > { %v228_v14 = vadd.f32 %v227_v6, %v226_v9 }
  0x3d   : > { %v230_v18 = vadd.f32 %v229_v11, %v228_v14 }
  0x3f   : > { %v232_v23 = vadd.f32 %v231_v15, %v230_v18 }
  0x41   : > { %v234_v27 = vadd.f32 %v233_v20, %v232_v23 }
  0x43   : > { %v236_v32 = vadd.f32 %v235_v24, %v234_v27 }
  0x45   : > { %v238_v36 = vadd.f32 %v237_v29, %v236_v32 }
  0x47   : > { %v240_v41 = vadd.f32 %v239_v33, %v238_v36 }
  0x49   : > { %v242_v44 = vadd.f32 %v241_v38, %v240_v41 }
  0x4b   : > { %v244_v47 = vadd.f32 %v243_v42, %v242_v44 }
  0x4d   : > { %v246_v48 = vadd.f32 %v245_v45, %v244_v47 }
  0x4f   : > { %v247_v50 = vrot.slane %v246_v48, 4 }
  0x51   : > { %v248_v51 = vadd.f32 %v247_v50, %v246_v48 }
  0x53   : > { %v249_v53 = vrot.slane %v248_v51, 2 }
  0x55   : > { %v250_v54 = vadd.f32 %v249_v53, %v248_v51 }
  0x57   : > { %v251_v56 = vrot.slane %v250_v54, 1 }
  0x59   : > { %v252_v57 = vadd.f32 %v251_v56, %v250_v54 }
  0x5b   : > { %v824_v59 = vmul.f32 0.00390625, %v252_v57 }
  0x5d   : > { %v828_v60 = vsub.f32 %v665_v0, %v824_v59  ;;  %v832_v62 = vsub.f32 %v668_v1, %v824_v59  ;;  %v836_v63 = vsub.f32 %v671_v2, %v824_v59  ;;  %v840_v5 = vsub.f32 %v674_v3, %v824_v59 }
  0x5e   : > { %v844_v6 = vsub.f32 %v683_v7, %v824_v59  ;;  %v854_v2 = vsub.f32 %v688_v10, %v824_v59  ;;  %v860_v7 = vsub.f32 %v693_v13, %v824_v59  ;;  %v869_v10 = vsub.f32 %v698_v16, %v824_v59 }
  0x5f   : > { %v287_v0 = vmul.f32 %v828_v60, %v828_v60  ;;  %v288_v9 = vmul.f32 %v832_v62, %v832_v62  ;;  %v289_v1 = vmul.f32 %v836_v63, %v836_v63  ;;  %v290_v3 = vmul.f32 %v840_v5, %v840_v5 }
  0x60   : > { %v291_v11 = vmul.f32 %v844_v6, %v844_v6  ;;  %v292_v23 = vmul.f32 %v854_v2, %v854_v2  ;;  %v876_v27 = vsub.f32 %v703_v19, %v824_v59  ;;  %v293_v29 = vmul.f32 %v860_v7, %v860_v7 }
  0x61   : > { %v319_v14 = vsel %vm183_vm0, %v287_v0, 0.0  ;;  %v320_v15 = vsel %vm183_vm0, %v288_v9, 0.0  ;;  %v322_v18 = vsel %vm183_vm0, %v289_v1, 0.0  ;;  %v324_v13 = vsel %vm183_vm0, %v290_v3, 0.0 }
  0x62   : > { %v321_v20 = vadd.f32 %v320_v15, %v319_v14  ;;  %v326_v32 = vsel %vm183_vm0, %v291_v11, 0.0  ;;  %v883_v16 = vsub.f32 %v708_v22, %v824_v59  ;;  %v294_v36 = vmul.f32 %v869_v10, %v869_v10 }
  0x63   : > { %v328_v38 = vsel %vm183_vm0, %v292_v23, 0.0  ;;  %v890_v19 = vsub.f32 %v713_v25, %v824_v59  ;;  %v295_v42 = vmul.f32 %v876_v27, %v876_v27  ;;  %v330_v44 = vsel %vm183_vm0, %v293_v29, 0.0 }
  0x64   : > { %v323_v24 = vadd.f32 %v322_v18, %v321_v20  ;;  %v897_v22 = vsub.f32 %v718_v28, %v824_v59  ;;  %v296_v47 = vmul.f32 %v883_v16, %v883_v16  ;;  %v332_v48 = vsel %vm183_vm0, %v294_v36, 0.0 }
  0x65   : > { %v904_v25 = vsub.f32 %v723_v31, %v824_v59  ;;  %v297_v51 = vmul.f32 %v890_v19, %v890_v19  ;;  %v334_v53 = vsel %vm183_vm0, %v295_v42, 0.0  ;;  %v911_v28 = vsub.f32 %v728_v34, %v824_v59 }
  0x66   : > { %v325_v33 = vadd.f32 %v324_v13, %v323_v24  ;;  %v298_v56 = vmul.f32 %v897_v22, %v897_v22  ;;  %v336_v57 = vsel %vm183_vm0, %v296_v47, 0.0  ;;  %v918_v31 = vsub.f32 %v733_v37, %v824_v59 }
  0x67   : > { %v299_v9 = vmul.f32 %v904_v25, %v904_v25  ;;  %v338_v1 = vsel %vm183_vm0, %v297_v51, 0.0  ;;  %v925_v34 = vsub.f32 %v738_v40, %v824_v59  ;;  %v300_v11 = vmul.f32 %v911_v28, %v911_v28 }
  0x68   : > { %v327_v41 = vadd.f32 %v326_v32, %v325_v33  ;;  %v340_v14 = vsel %vm183_vm0, %v298_v56, 0.0  ;;  %v932_v37 = vsub.f32 %v743_v43, %v824_v59  ;;  %v301_v18 = vmul.f32 %v918_v31, %v918_v31 }
  0x69   : > { %v342_v20 = vsel %vm183_vm0, %v299_v9, 0.0  ;;  %v939_v40 = vsub.f32 %v748_v46, %v824_v59  ;;  %v302_v13 = vmul.f32 %v925_v34, %v925_v34  ;;  %v344_v24 = vsel %vm183_vm0, %v300_v11, 0.0 }
  0x6a   : > { %v329_v45 = vadd.f32 %v328_v38, %v327_v41  ;;  %v946_v43 = vsub.f32 %v753_v49, %v824_v59  ;;  %v303_v32 = vmul.f32 %v932_v37, %v932_v37  ;;  %v346_v33 = vsel %vm183_vm0, %v301_v18, 0.0 }
  0x6b   : > { %v953_v46 = vsub.f32 %v758_v52, %v824_v59  ;;  %v304_v38 = vmul.f32 %v939_v40, %v939_v40  ;;  %v348_v41 = vsel %vm183_vm0, %v302_v13, 0.0  ;;  %v960_v49 = vsub.f32 %v763_v55, %v824_v59 }
  0x6c   : > { %v331_v50 = vadd.f32 %v330_v44, %v329_v45  ;;  %v305_v44 = vmul.f32 %v946_v43, %v946_v43  ;;  %v350_v45 = vsel %vm183_vm0, %v303_v32, 0.0  ;;  %v967_v52 = vsub.f32 %v768_v58, %v824_v59 }
  0x6d   : > { %v974_v55 = vsub.f32 %v773_v61, %v824_v59  ;;  %v981_v58 = vsub.f32 %v778_v4, %v824_v59  ;;  %v988_v61 = vsub.f32 %v783_v8, %v824_v59  ;;  %v995_v4 = vsub.f32 %v788_v12, %v824_v59 }
  0x6e   : > { %v333_v54 = vadd.f32 %v332_v48, %v331_v50  ;;  %v306_v48 = vmul.f32 %v953_v46, %v953_v46  ;;  %v352_v50 = vsel %vm183_vm0, %v304_v38, 0.0  ;;  %v1002_v8 = vsub.f32 %v793_v17, %v824_v59 }
  0x6f   : > { %v1009_v12 = vsub.f32 %v798_v21, %v824_v59  ;;  %v1016_v17 = vsub.f32 %v803_v26, %v824_v59  ;;  %v1023_v21 = vsub.f32 %v808_v30, %v824_v59  ;;  %v1030_v26 = vsub.f32 %v813_v35, %v824_v59 }
  0x70   : > { %v335_v0 = vadd.f32 %v334_v53, %v333_v54  ;;  %v307_v53 = vmul.f32 %v960_v49, %v960_v49  ;;  %v354_v54 = vsel %vm183_vm0, %v305_v44, 0.0  ;;  %v1037_v30 = vsub.f32 %v818_v39, %v824_v59 }
  0x71   : > { %v317_v35 = vmul.f32 %v1030_v26, %v1030_v26 }
  0x72   : > { %v337_v3 = vadd.f32 %v336_v57, %v335_v0  ;;  %v308_v57 = vmul.f32 %v967_v52, %v967_v52  ;;  %v356_v0 = vsel %vm183_vm0, %v306_v48, 0.0 }
  0x73   : > { %v378_v39 = vsel %vm183_vm0, %v317_v35, 0.0 }
  0x74   : > { %v339_v15 = vadd.f32 %v338_v1, %v337_v3  ;;  %v309_v1 = vmul.f32 %v974_v55, %v974_v55  ;;  %v358_v3 = vsel %vm183_vm0, %v307_v53, 0.0 }
  0x76   : > { %v341_v23 = vadd.f32 %v340_v14, %v339_v15  ;;  %v310_v14 = vmul.f32 %v981_v58, %v981_v58  ;;  %v360_v15 = vsel %vm183_vm0, %v308_v57, 0.0  ;;  %v318_v57 = vmul.f32 %v1037_v30, %v1037_v30 }
  0x78   : > { %v343_v29 = vadd.f32 %v342_v20, %v341_v23  ;;  %v311_v20 = vmul.f32 %v988_v61, %v988_v61  ;;  %v362_v23 = vsel %vm183_vm0, %v309_v1, 0.0  ;;  %v380_v1 = vsel %vm183_vm0, %v318_v57, 0.0 }
  0x7a   : > { %v345_v36 = vadd.f32 %v344_v24, %v343_v29  ;;  %v312_v24 = vmul.f32 %v995_v4, %v995_v4  ;;  %v364_v29 = vsel %vm183_vm0, %v310_v14, 0.0 }
  0x7c   : > { %v347_v42 = vadd.f32 %v346_v33, %v345_v36  ;;  %v313_v33 = vmul.f32 %v1002_v8, %v1002_v8  ;;  %v366_v36 = vsel %vm183_vm0, %v311_v20, 0.0 }
  0x7e   : > { %v349_v47 = vadd.f32 %v348_v41, %v347_v42  ;;  %v314_v41 = vmul.f32 %v1009_v12, %v1009_v12  ;;  %v368_v42 = vsel %vm183_vm0, %v312_v24, 0.0 }
  0x80   : > { %v351_v51 = vadd.f32 %v350_v45, %v349_v47  ;;  %v315_v45 = vmul.f32 %v1016_v17, %v1016_v17  ;;  %v370_v47 = vsel %vm183_vm0, %v313_v33, 0.0 }
  0x82   : > { %v353_v56 = vadd.f32 %v352_v50, %v351_v51  ;;  %v316_v50 = vmul.f32 %v1023_v21, %v1023_v21  ;;  %v372_v51 = vsel %vm183_vm0, %v314_v41, 0.0 }
  0x84   : > { %v355_v9 = vadd.f32 %v354_v54, %v353_v56  ;;  %v374_v54 = vsel %vm183_vm0, %v315_v45, 0.0 }
  0x86   : > { %v357_v11 = vadd.f32 %v356_v0, %v355_v9  ;;  %v376_v0 = vsel %vm183_vm0, %v316_v50, 0.0 }
  0x88   : > { %v359_v18 = vadd.f32 %v358_v3, %v357_v11 }
  0x8a   : > { %v361_v13 = vadd.f32 %v360_v15, %v359_v18 }
  0x8c   : > { %v363_v32 = vadd.f32 %v362_v23, %v361_v13 }
  0x8e   : > { %v365_v38 = vadd.f32 %v364_v29, %v363_v32 }
  0x90   : > { %v367_v44 = vadd.f32 %v366_v36, %v365_v38 }
  0x92   : > { %v369_v48 = vadd.f32 %v368_v42, %v367_v44 }
  0x94   : > { %v371_v53 = vadd.f32 %v370_v47, %v369_v48 }
  0x96   : > { %v373_v56 = vadd.f32 %v372_v51, %v371_v53 }
  0x98   : > { %v375_v9 = vadd.f32 %v374_v54, %v373_v56 }
  0x9a   : > { %v377_v59 = vadd.f32 %v376_v0, %v375_v9 }
  0x9c   : > { %v379_v3 = vadd.f32 %v378_v39, %v377_v59 }
  0x9e   : > { %v381_v11 = vadd.f32 %v380_v1, %v379_v3 }
  0xa0   : > { %v382_v14 = vrot.slane %v381_v11, 4 }
  0xa2   : > { %v383_v15 = vadd.f32 %v382_v14, %v381_v11 }
  0xa4   : > { %v384_v18 = vrot.slane %v383_v15, 2 }
  0xa6   : > { %v385_v20 = vadd.f32 %v384_v18, %v383_v15 }
  0xa8   : > { %v386_v23 = vrot.slane %v385_v20, 1 }
  0xaa   : > { %v387_v13 = vadd.f32 %v386_v23, %v385_v20 }
  0xac   : > { %v388_v24 = vmul.f32 0.00390625, %v387_v13 }
  0xae   : > { %v389_v29 = vadd.f32 1e-05, %v388_v24 }
  0xb0   : > { %600 = vrsqrt.f32 %v389_v29 }
  0xbd   : > { %v1050_v32 = vpop.eup %600 }
  0xbe   : > { %v391_v33 = vmul.f32 %v1050_v32, %v828_v60  ;;  %v392_v36 = vmul.f32 %v1050_v32, %v832_v62  ;;  %v393_v38 = vmul.f32 %v1050_v32, %v836_v63  ;;  %v394_v41 = vmul.f32 %v1050_v32, %v840_v5 }
  0xbf   : > { %v395_v60 = vmul.f32 %v1050_v32, %v844_v6  ;;  %v396_v62 = vmul.f32 %v1050_v32, %v854_v2  ;;  %v397_v63 = vmul.f32 %v1050_v32, %v860_v7  ;;  %v398_v5 = vmul.f32 %v1050_v32, %v869_v10 }
  0xc0   : > { %v423_v42 = vmax.f32 %v391_v33, 0.0  ;;  %v424_v44 = vmax.f32 %v392_v36, 0.0  ;;  %v425_v45 = vmax.f32 %v393_v38, 0.0  ;;  %v426_v47 = vmax.f32 %v394_v41, 0.0 }
  0xc1   : > { %v427_v48 = vmax.f32 %v395_v60, 0.0  ;;  %v428_v50 = vmax.f32 %v396_v62, 0.0  ;;  %v429_v6 = vmax.f32 %v397_v63, 0.0  ;;  %v430_v51 = vmax.f32 %v398_v5, 0.0 }
  0xc2   : > { %455 = vst.msk [vmem:[%s1065_s17] sm:$0xff] %vm183_vm0, %v423_v42  ;;  %456 = vst.msk [vmem:[%s1065_s17 + $0x8] sm:$0xff] %vm183_vm0, %v424_v44  ;;  %v399_v2 = vmul.f32 %v1050_v32, %v876_v27  ;;  %v400_v7 = vmul.f32 %v1050_v32, %v883_v16  ;;  %v401_v10 = vmul.f32 %v1050_v32, %v890_v19 }
  0xc3   : > { %457 = vst.msk [vmem:[%s1065_s17 + $0x10] sm:$0xff] %vm183_vm0, %v425_v45  ;;  %458 = vst.msk [vmem:[%s1065_s17 + $0x18] sm:$0xff] %vm183_vm0, %v426_v47  ;;  %v402_v53 = vmul.f32 %v1050_v32, %v897_v22  ;;  %v403_v27 = vmul.f32 %v1050_v32, %v904_v25  ;;  %v404_v16 = vmul.f32 %v1050_v32, %v911_v28 }
  0xc4   : > { %459 = vst.msk [vmem:[%s1065_s17 + $0x20] sm:$0xff] %vm183_vm0, %v427_v48  ;;  %460 = vst.msk [vmem:[%s1065_s17 + $0x28] sm:$0xff] %vm183_vm0, %v428_v50  ;;  %v405_v19 = vmul.f32 %v1050_v32, %v918_v31  ;;  %v406_v22 = vmul.f32 %v1050_v32, %v925_v34  ;;  %v431_v35 = vmax.f32 %v399_v2, 0.0  ;;  %v432_v54 = vmax.f32 %v400_v7, 0.0 }
  0xc5   : > { %461 = vst.msk [vmem:[%s1065_s17 + $0x30] sm:$0xff] %vm183_vm0, %v429_v6  ;;  %462 = vst.msk [vmem:[%s1065_s17 + $0x38] sm:$0xff] %vm183_vm0, %v430_v51  ;;  %v433_v56 = vmax.f32 %v401_v10, 0.0  ;;  %v434_v57 = vmax.f32 %v402_v53, 0.0  ;;  %v435_v0 = vmax.f32 %v403_v27, 0.0  ;;  %v436_v9 = vmax.f32 %v404_v16, 0.0 }
  0xc6   : > { %v437_v25 = vmax.f32 %v405_v19, 0.0  ;;  %v438_v39 = vmax.f32 %v406_v22, 0.0  ;;  %463 = vst.msk [vmem:[%s1065_s17 + $0x40] sm:$0xff] %vm183_vm0, %v431_v35  ;;  %464 = vst.msk [vmem:[%s1065_s17 + $0x48] sm:$0xff] %vm183_vm0, %v432_v54  ;;  %v407_v28 = vmul.f32 %v1050_v32, %v932_v37  ;;  %v408_v31 = vmul.f32 %v1050_v32, %v939_v40 }
  0xc7   : > { %465 = vst.msk [vmem:[%s1065_s17 + $0x50] sm:$0xff] %vm183_vm0, %v433_v56  ;;  %466 = vst.msk [vmem:[%s1065_s17 + $0x58] sm:$0xff] %vm183_vm0, %v434_v57  ;;  %v409_v34 = vmul.f32 %v1050_v32, %v946_v43  ;;  %v410_v59 = vmul.f32 %v1050_v32, %v953_v46  ;;  %v411_v37 = vmul.f32 %v1050_v32, %v960_v49 }
  0xc8   : > { %467 = vst.msk [vmem:[%s1065_s17 + $0x60] sm:$0xff] %vm183_vm0, %v435_v0  ;;  %468 = vst.msk [vmem:[%s1065_s17 + $0x68] sm:$0xff] %vm183_vm0, %v436_v9  ;;  %v412_v40 = vmul.f32 %v1050_v32, %v967_v52  ;;  %v413_v43 = vmul.f32 %v1050_v32, %v974_v55  ;;  %v414_v46 = vmul.f32 %v1050_v32, %v981_v58  ;;  %v439_v1 = vmax.f32 %v407_v28, 0.0 }
  0xc9   : > { %469 = vst.msk [vmem:[%s1065_s17 + $0x70] sm:$0xff] %vm183_vm0, %v437_v25  ;;  %470 = vst.msk [vmem:[%s1065_s17 + $0x78] sm:$0xff] %vm183_vm0, %v438_v39  ;;  %v440_v3 = vmax.f32 %v408_v31, 0.0  ;;  %v441_v11 = vmax.f32 %v409_v34, 0.0  ;;  %v442_v14 = vmax.f32 %v410_v59, 0.0  ;;  %v443_v15 = vmax.f32 %v411_v37, 0.0 }
  0xca   : > { %v444_v18 = vmax.f32 %v412_v40, 0.0  ;;  %v445_v49 = vmax.f32 %v413_v43, 0.0  ;;  %v446_v20 = vmax.f32 %v414_v46, 0.0  ;;  %471 = vst.msk [vmem:[%s1065_s17 + $0x80] sm:$0xff] %vm183_vm0, %v439_v1  ;;  %v415_v52 = vmul.f32 %v1050_v32, %v988_v61 }
  0xcb   : > { %472 = vst.msk [vmem:[%s1065_s17 + $0x88] sm:$0xff] %vm183_vm0, %v440_v3  ;;  %473 = vst.msk [vmem:[%s1065_s17 + $0x90] sm:$0xff] %vm183_vm0, %v441_v11  ;;  %v416_v55 = vmul.f32 %v1050_v32, %v995_v4  ;;  %v417_v58 = vmul.f32 %v1050_v32, %v1002_v8  ;;  %v418_v23 = vmul.f32 %v1050_v32, %v1009_v12 }
  0xcc   : > { %474 = vst.msk [vmem:[%s1065_s17 + $0x98] sm:$0xff] %vm183_vm0, %v442_v14  ;;  %475 = vst.msk [vmem:[%s1065_s17 + $0xa0] sm:$0xff] %vm183_vm0, %v443_v15  ;;  %v419_v61 = vmul.f32 %v1050_v32, %v1016_v17  ;;  %v420_v4 = vmul.f32 %v1050_v32, %v1023_v21  ;;  %v421_v8 = vmul.f32 %v1050_v32, %v1030_v26  ;;  %v447_v13 = vmax.f32 %v415_v52, 0.0 }
  0xcd   : > { %476 = vst.msk [vmem:[%s1065_s17 + $0xa8] sm:$0xff] %vm183_vm0, %v444_v18  ;;  %477 = vst.msk [vmem:[%s1065_s17 + $0xb0] sm:$0xff] %vm183_vm0, %v445_v49  ;;  %v422_v12 = vmul.f32 %v1050_v32, %v1037_v30  ;;  %v448_v24 = vmax.f32 %v416_v55, 0.0  ;;  %v449_v29 = vmax.f32 %v417_v58, 0.0  ;;  %v450_v33 = vmax.f32 %v418_v23, 0.0 }
  0xce   : > { %478 = vst.msk [vmem:[%s1065_s17 + $0xb8] sm:$0xff] %vm183_vm0, %v446_v20  ;;  %v451_v36 = vmax.f32 %v419_v61, 0.0  ;;  %v452_v38 = vmax.f32 %v420_v4, 0.0  ;;  %v453_v17 = vmax.f32 %v421_v8, 0.0  ;;  %479 = vst.msk [vmem:[%s1065_s17 + $0xc0] sm:$0xff] %vm183_vm0, %v447_v13 }
  0xcf   : > { %v454_v41 = vmax.f32 %v422_v12, 0.0  ;;  %480 = vst.msk [vmem:[%s1065_s17 + $0xc8] sm:$0xff] %vm183_vm0, %v448_v24  ;;  %481 = vst.msk [vmem:[%s1065_s17 + $0xd0] sm:$0xff] %vm183_vm0, %v449_v29 }
  0xd0   : > { %482 = vst.msk [vmem:[%s1065_s17 + $0xd8] sm:$0xff] %vm183_vm0, %v450_v33  ;;  %483 = vst.msk [vmem:[%s1065_s17 + $0xe0] sm:$0xff] %vm183_vm0, %v451_v36 }
  0xd1   : > { %484 = vst.msk [vmem:[%s1065_s17 + $0xe8] sm:$0xff] %vm183_vm0, %v452_v38  ;;  %485 = vst.msk [vmem:[%s1065_s17 + $0xf0] sm:$0xff] %vm183_vm0, %v453_v17 }
  0xd2   : > { %486 = vst.msk [vmem:[%s1065_s17 + $0xf8] sm:$0xff] %vm183_vm0, %v454_v41 }
  0xd3 PF: > { %s11_s8 = sadd.s32 1, %s624_s8   ;;  %s1198_s6 = smov %s620_s7 }
  0xd4   : > { %p8_p5 = scmp.ge.s32.totalorder %s11_s8, 4   ;;  %s1199_s7 = smov %s1201_s9 }
  0xd6   :  { %10 = sbr.rel (!%p8_p5) target bundleno = 2 (0x2), region = 54 }

// kernel: define_g_forward.35
= control target key start
LH: loop header
LB: loop body
LE: loop exit
PB: predicated region body
PF: predicated region fallthrough
CT: control target
= control target key end

     0   :  { %s1425_s12 = smov 0   ;;  %s1427_s13 = smov 0   ;;  %s1618_s0 = inlined_call_operand.vmem [shape: bf16[512,256], index: 0, kind: input, shape index: {}]   ;;  %s1619_s1 = inlined_call_operand.vmem [shape: bf16[256,128], index: 1, kind: input, shape index: {}]   ;;  %s1620_s2 = inlined_call_operand.vmem [shape: f32[1,128], index: 2, kind: input, shape index: {}]   ;;  %s1621_s3 = inlined_call_operand.vmem [shape: f32[512,128], index: 3, kind: output, shape index: {}]  }
   0x1   :  { %s1429_s14 = smov 0  }
   0x2 LB: > { %s32_s15 = sadd.s32 1, %s1399_s13  ;;  %p1107_p0 = scmp.ge.s32.totalorder %s1403_s14, 1  ;;  %s1403_s14 = sphi %s1429_s14, %s13_s14   ;;  %s1399_s13 = sphi %s1427_s13, %s1623_s13   ;;  %s1395_s12 = sphi %s1425_s12, %s1622_s12  }
   0x3   : > { %p34_p1 = scmp.ge.s32.totalorder %s32_s15, 2  ;;  %p191_p2 = scmp.lt.s32.totalorder %s1403_s14, 3 }
   0x5   : > { %s1625_s15 = smov (%p34_p1, %s32_s15), 0  ;;  %p192_p3 = pnand %p1107_p0, %p191_p2 }
   0x6   : > { %s1108_s18 = sshll.u32 (!%p192_p3), %s1395_s12, 5 }
   0x7   : > { %195 = sbr.rel (%p192_p3) target bundleno = 305 (0x131), region = 32  ;;  %p236_p4 = scmp.lt.s32.totalorder (!%p192_p3), %s1108_s18, 63 }
   0xc   : > { %v1317_v0 = vld [vmem:[%s1619_s1 + $0x78] sm:$0xff]   ;;  %v1319_v2 = vld [vmem:[%s1619_s1 + $0x70] sm:$0xff]   ;;  %v1321_v4 = vld [vmem:[%s1619_s1 + $0x68] sm:$0xff]   ;;  %s1627_s18 = smov (!%p236_p4, %s1108_s18), 63 }
   0xd   : > { %v1318_v1 = vld [vmem:[%s1619_s1 + $0x38] sm:$0xff]   ;;  %1165 = vmatprep.subr.bf16.mxu0 %v1317_v0  ;;  %1277 = vmatprep.subr.bf16.mxu1 %v1317_v0  ;;  %v1320_v3 = vld [vmem:[%s1619_s1 + $0x30] sm:$0xff]   ;;  %v1322_v5 = vld [vmem:[%s1619_s1 + $0x28] sm:$0xff]   ;;  %s1164_s6 = sshll.u32 %s1627_s18, 3 }
   0xe   : > { %1166 = vmatpush3.bf16.msra.mxu0 %v1318_v1  ;;  %1285 = vmatpush3.bf16.msra.mxu1 %v1318_v1  ;;  %v1323_v6 = vld [vmem:[%s1619_s1 + $0x60] sm:$0xff]   ;;  %v1325_v8 = vld [vmem:[%s1619_s1 + $0x58] sm:$0xff]   ;;  %s1478_s11 = scalar_lea.vmem %s1618_s0, %s1164_s6  ;;  %v1327_v10 = vld [vmem:[%s1619_s1 + $0x50] sm:$0xff]   ;;  %s1543_s8 = scalar_lea.vmem %s1621_s3, %s1164_s6 }
   0xf   : > { %1167 = vmatprep.subr.bf16.mxu0 %v1319_v2  ;;  %1278 = vmatprep.subr.bf16.mxu1 %v1319_v2  ;;  %v1324_v7 = vld [vmem:[%s1619_s1 + $0x20] sm:$0xff]   ;;  %v1326_v9 = vld [vmem:[%s1619_s1 + $0x18] sm:$0xff]   ;;  %v1328_v13 = vld [vmem:[%s1619_s1 + $0x10] sm:$0xff]  }
  0x10   : > { %v1335_v11 = vld [vmem:[%s1478_s11 + $0x4] ss:$8 sps:$4 sm:$0xff]   ;;  %v1333_v18 = vld [vmem:[%s1478_s11] ss:$8 sps:$4 sm:$0xff]   ;;  %v1339_v20 = vld [vmem:[%s1478_s11 + $0x14] ss:$8 sps:$4 sm:$0xff]  }
  0x11   : > { %v1338_v12 = vld [vmem:[%s1478_s11 + $0x84] ss:$8 sps:$4 sm:$0xff]   ;;  %688 = vmatprep.mubr.bf16.mxu0 %v1335_v11  ;;  %v1336_v19 = vld [vmem:[%s1478_s11 + $0x80] ss:$8 sps:$4 sm:$0xff]   ;;  %v1341_v21 = vld [vmem:[%s1478_s11 + $0x94] ss:$8 sps:$4 sm:$0xff]  }
  0x12   : > { %1168 = vmatpush3.bf16.msra.mxu0 %v1320_v3  ;;  %1286 = vmatpush3.bf16.msra.mxu1 %v1320_v3  ;;  %v1329_v14 = vld [vmem:[%s1619_s1 + $0x48] sm:$0xff]   ;;  %v1331_v16 = vld [vmem:[%s1619_s1 + $0x40] sm:$0xff]   ;;  %v1343_v22 = vld [vmem:[%s1478_s11 + $0x10] ss:$8 sps:$4 sm:$0xff]  }
  0x13   : > { %1169 = vmatprep.subr.bf16.mxu0 %v1321_v4  ;;  %1279 = vmatprep.subr.bf16.mxu1 %v1321_v4  ;;  %v1330_v15 = vld [vmem:[%s1619_s1 + $0x8] sm:$0xff]   ;;  %v1332_v17 = vld [vmem:[%s1619_s1] sm:$0xff]   ;;  %v1344_v23 = vld [vmem:[%s1478_s11 + $0x90] ss:$8 sps:$4 sm:$0xff]  }
  0x14   : > { %752 = vmatprep.mubr.bf16.mxu1 %v1338_v12  ;;  %v1345_v24 = vld [vmem:[%s1478_s11 + $0x24] ss:$8 sps:$4 sm:$0xff]   ;;  %v1349_v26 = vld [vmem:[%s1478_s11 + $0x20] ss:$8 sps:$4 sm:$0xff]   ;;  %v1351_v28 = vld [vmem:[%s1478_s11 + $0x34] ss:$8 sps:$4 sm:$0xff]  }
  0x15   : > { %v1347_v25 = vld [vmem:[%s1478_s11 + $0xa4] ss:$8 sps:$4 sm:$0xff]   ;;  %v1350_v27 = vld [vmem:[%s1478_s11 + $0xa0] ss:$8 sps:$4 sm:$0xff]   ;;  %v1353_v29 = vld [vmem:[%s1478_s11 + $0xb4] ss:$8 sps:$4 sm:$0xff]  }
  0x16   : > { %1170 = vmatpush3.bf16.msra.mxu0 %v1322_v5  ;;  %1287 = vmatpush3.bf16.msra.mxu1 %v1322_v5  ;;  %v1355_v30 = vld [vmem:[%s1478_s11 + $0x30] ss:$8 sps:$4 sm:$0xff]   ;;  %v1357_v32 = vld [vmem:[%s1478_s11 + $0x44] ss:$8 sps:$4 sm:$0xff]   ;;  %v1361_v34 = vld [vmem:[%s1478_s11 + $0x40] ss:$8 sps:$4 sm:$0xff]  }
  0x17   : > { %1171 = vmatprep.subr.bf16.mxu0 %v1323_v6  ;;  %1280 = vmatprep.subr.bf16.mxu1 %v1323_v6  ;;  %v1356_v31 = vld [vmem:[%s1478_s11 + $0xb0] ss:$8 sps:$4 sm:$0xff]   ;;  %v1359_v33 = vld [vmem:[%s1478_s11 + $0xc4] ss:$8 sps:$4 sm:$0xff]   ;;  %v1362_v35 = vld [vmem:[%s1478_s11 + $0xc0] ss:$8 sps:$4 sm:$0xff]  }
  0x18   : > { %v1363_v36 = vld [vmem:[%s1478_s11 + $0x54] ss:$8 sps:$4 sm:$0xff]   ;;  %v1367_v38 = vld [vmem:[%s1478_s11 + $0x50] ss:$8 sps:$4 sm:$0xff]   ;;  %v1369_v40 = vld [vmem:[%s1478_s11 + $0x64] ss:$8 sps:$4 sm:$0xff]  }
  0x19   : > { %v1365_v37 = vld [vmem:[%s1478_s11 + $0xd4] ss:$8 sps:$4 sm:$0xff]   ;;  %v1368_v39 = vld [vmem:[%s1478_s11 + $0xd0] ss:$8 sps:$4 sm:$0xff]   ;;  %v1371_v41 = vld [vmem:[%s1478_s11 + $0xe4] ss:$8 sps:$4 sm:$0xff]  }
  0x1a   : > { %1172 = vmatpush3.bf16.msra.mxu0 %v1324_v7  ;;  %1288 = vmatpush3.bf16.msra.mxu1 %v1324_v7  ;;  %v1373_v42 = vld [vmem:[%s1478_s11 + $0x60] ss:$8 sps:$4 sm:$0xff]   ;;  %v1375_v44 = vld [vmem:[%s1478_s11 + $0x74] ss:$8 sps:$4 sm:$0xff]   ;;  %v1379_v46 = vld [vmem:[%s1478_s11 + $0x70] ss:$8 sps:$4 sm:$0xff]  }
  0x1b   : > { %1173 = vmatprep.subr.bf16.mxu0 %v1325_v8  ;;  %1281 = vmatprep.subr.bf16.mxu1 %v1325_v8  ;;  %v1374_v43 = vld [vmem:[%s1478_s11 + $0xe0] ss:$8 sps:$4 sm:$0xff]   ;;  %v1377_v45 = vld [vmem:[%s1478_s11 + $0xf4] ss:$8 sps:$4 sm:$0xff]   ;;  %v1380_v47 = vld [vmem:[%s1478_s11 + $0xf0] ss:$8 sps:$4 sm:$0xff]  }
  0x1c   : > { %v1536_v51 = vld [vmem:[%s1620_s2] ss:$0 sm:$0xff] }
  0x1e   : > { %1174 = vmatpush3.bf16.msra.mxu0 %v1326_v9  ;;  %1289 = vmatpush3.bf16.msra.mxu1 %v1326_v9 }
  0x1f   : > { %1175 = vmatprep.subr.bf16.mxu0 %v1327_v10  ;;  %1282 = vmatprep.subr.bf16.mxu1 %v1327_v10 }
  0x22   : > { %1176 = vmatpush3.bf16.msra.mxu0 %v1328_v13  ;;  %1290 = vmatpush3.bf16.msra.mxu1 %v1328_v13 }
  0x23   : > { %1177 = vmatprep.subr.bf16.mxu0 %v1329_v14  ;;  %1283 = vmatprep.subr.bf16.mxu1 %v1329_v14 }
  0x26   : > { %1178 = vmatpush3.bf16.msra.mxu0 %v1330_v15  ;;  %1291 = vmatpush3.bf16.msra.mxu1 %v1330_v15 }
  0x27   : > { %1179 = vmatprep.subr.bf16.mxu0 %v1331_v16  ;;  %1284 = vmatprep.subr.bf16.mxu1 %v1331_v16 }
  0x2a   : > { %1180 = vmatpush3.bf16.msra.mxu0 %v1332_v17  ;;  %1292 = vmatpush3.bf16.msra.mxu1 %v1332_v17 }
  0x2d   : > { %689 = vmatmul.mubr.bf16.vlgmr.msra.gmra.mxu0 %v1333_v18  ;;  %753 = vmatmul.mubr.bf16.vlgmr.msra.gmra.mxu1 %v1336_v19 }
  0x2e   : > { %696 = vmatprep.mubr.bf16.mxu0 %v1339_v20  ;;  %760 = vmatprep.mubr.bf16.mxu1 %v1341_v21 }
  0x35   : > { %697 = vmatmul.mubr.bf16.gmra.mxu0 %v1343_v22  ;;  %761 = vmatmul.mubr.bf16.gmra.mxu1 %v1344_v23 }
  0x36   : > { %704 = vmatprep.mubr.bf16.mxu0 %v1345_v24  ;;  %768 = vmatprep.mubr.bf16.mxu1 %v1347_v25 }
  0x3d   : > { %705 = vmatmul.mubr.bf16.gmra.mxu0 %v1349_v26  ;;  %769 = vmatmul.mubr.bf16.gmra.mxu1 %v1350_v27 }
  0x3e   : > { %712 = vmatprep.mubr.bf16.mxu0 %v1351_v28  ;;  %776 = vmatprep.mubr.bf16.mxu1 %v1353_v29 }
  0x45   : > { %713 = vmatmul.mubr.bf16.gmra.mxu0 %v1355_v30  ;;  %777 = vmatmul.mubr.bf16.gmra.mxu1 %v1356_v31 }
  0x46   : > { %720 = vmatprep.mubr.bf16.mxu0 %v1357_v32  ;;  %784 = vmatprep.mubr.bf16.mxu1 %v1359_v33 }
  0x4d   : > { %721 = vmatmul.mubr.bf16.gmra.mxu0 %v1361_v34  ;;  %785 = vmatmul.mubr.bf16.gmra.mxu1 %v1362_v35 }
  0x4e   : > { %728 = vmatprep.mubr.bf16.mxu0 %v1363_v36  ;;  %792 = vmatprep.mubr.bf16.mxu1 %v1365_v37 }
  0x55   : > { %729 = vmatmul.mubr.bf16.gmra.mxu0 %v1367_v38  ;;  %793 = vmatmul.mubr.bf16.gmra.mxu1 %v1368_v39 }
  0x56   : > { %736 = vmatprep.mubr.bf16.mxu0 %v1369_v40  ;;  %800 = vmatprep.mubr.bf16.mxu1 %v1371_v41 }
  0x5d   : > { %737 = vmatmul.mubr.bf16.gmra.mxu0 %v1373_v42  ;;  %801 = vmatmul.mubr.bf16.gmra.mxu1 %v1374_v43 }
  0x5e   : > { %744 = vmatprep.mubr.bf16.mxu0 %v1375_v44  ;;  %808 = vmatprep.mubr.bf16.mxu1 %v1377_v45 }
  0x65   : > { %745 = vmatmul.mubr.bf16.gmra.mxu0 %v1379_v46  ;;  %809 = vmatmul.mubr.bf16.gmra.mxu1 %v1380_v47 }
  0xed   : > { %v1181_v48 = vpop.f32.mrf.mxu0  ;;  %v1229_v49 = vpop.f32.mrf.mxu1 }
  0xef   : > { %v1182_v50 = vpop.f32.mrf.mxu0  ;;  %v1230_v52 = vpop.f32.mrf.mxu1 }
  0xf0   : > { %v1183_v53 = vadd.f32 %v1182_v50, %v1181_v48  ;;  %v1231_v54 = vadd.f32 %v1230_v52, %v1229_v49 }
  0xf1   : > { %v1184_v55 = vpop.f32.mrf.mxu0  ;;  %v1232_v56 = vpop.f32.mrf.mxu1 }
  0xf2   : > { %v923_v57 = vadd.f32 %v1183_v53, %v1536_v51  ;;  %v939_v58 = vadd.f32 %v1231_v54, %v1536_v51 }
  0xf3   : > { %v1185_v59 = vpop.f32.mrf.mxu0  ;;  %v1233_v60 = vpop.f32.mrf.mxu1 }
  0xf4   : > { %955 = vst [vmem:[%s1543_s8] sm:$0xff] %v923_v57  ;;  %971 = vst [vmem:[%s1543_s8 + $0x80] sm:$0xff] %v939_v58  ;;  %v1186_v61 = vadd.f32 %v1185_v59, %v1184_v55  ;;  %v1234_v62 = vadd.f32 %v1233_v60, %v1232_v56 }
  0xf5   : > { %v1187_v63 = vpop.f32.mrf.mxu0  ;;  %v1235_v0 = vpop.f32.mrf.mxu1 }
  0xf6   : > { %v924_v1 = vadd.f32 %v1186_v61, %v1536_v51  ;;  %v940_v2 = vadd.f32 %v1234_v62, %v1536_v51 }
  0xf7   : > { %v1188_v3 = vpop.f32.mrf.mxu0  ;;  %v1236_v4 = vpop.f32.mrf.mxu1 }
  0xf8   : > { %956 = vst [vmem:[%s1543_s8 + $0x8] sm:$0xff] %v924_v1  ;;  %972 = vst [vmem:[%s1543_s8 + $0x88] sm:$0xff] %v940_v2  ;;  %v1189_v5 = vadd.f32 %v1188_v3, %v1187_v63  ;;  %v1237_v6 = vadd.f32 %v1236_v4, %v1235_v0 }
  0xf9   : > { %v1190_v7 = vpop.f32.mrf.mxu0  ;;  %v1238_v8 = vpop.f32.mrf.mxu1 }
  0xfa   : > { %v925_v9 = vadd.f32 %v1189_v5, %v1536_v51  ;;  %v941_v10 = vadd.f32 %v1237_v6, %v1536_v51 }
  0xfb   : > { %v1191_v11 = vpop.f32.mrf.mxu0  ;;  %v1239_v12 = vpop.f32.mrf.mxu1 }
  0xfc   : > { %957 = vst [vmem:[%s1543_s8 + $0x10] sm:$0xff] %v925_v9  ;;  %973 = vst [vmem:[%s1543_s8 + $0x90] sm:$0xff] %v941_v10  ;;  %v1192_v13 = vadd.f32 %v1191_v11, %v1190_v7  ;;  %v1240_v14 = vadd.f32 %v1239_v12, %v1238_v8 }
  0xfd   : > { %v1193_v15 = vpop.f32.mrf.mxu0  ;;  %v1241_v16 = vpop.f32.mrf.mxu1 }
  0xfe   : > { %v926_v17 = vadd.f32 %v1192_v13, %v1536_v51  ;;  %v942_v18 = vadd.f32 %v1240_v14, %v1536_v51 }
  0xff   : > { %v1194_v19 = vpop.f32.mrf.mxu0  ;;  %v1242_v20 = vpop.f32.mrf.mxu1 }
 0x100   : > { %958 = vst [vmem:[%s1543_s8 + $0x18] sm:$0xff] %v926_v17  ;;  %974 = vst [vmem:[%s1543_s8 + $0x98] sm:$0xff] %v942_v18  ;;  %v1195_v21 = vadd.f32 %v1194_v19, %v1193_v15  ;;  %v1243_v22 = vadd.f32 %v1242_v20, %v1241_v16 }
 0x101   : > { %v1196_v23 = vpop.f32.mrf.mxu0  ;;  %v1244_v24 = vpop.f32.mrf.mxu1 }
 0x102   : > { %v927_v25 = vadd.f32 %v1195_v21, %v1536_v51  ;;  %v943_v26 = vadd.f32 %v1243_v22, %v1536_v51 }
 0x103   : > { %v1197_v27 = vpop.f32.mrf.mxu0  ;;  %v1245_v28 = vpop.f32.mrf.mxu1 }
 0x104   : > { %959 = vst [vmem:[%s1543_s8 + $0x20] sm:$0xff] %v927_v25  ;;  %975 = vst [vmem:[%s1543_s8 + $0xa0] sm:$0xff] %v943_v26  ;;  %v1198_v29 = vadd.f32 %v1197_v27, %v1196_v23  ;;  %v1246_v30 = vadd.f32 %v1245_v28, %v1244_v24 }
 0x105   : > { %v1199_v31 = vpop.f32.mrf.mxu0  ;;  %v1247_v32 = vpop.f32.mrf.mxu1 }
 0x106   : > { %v928_v33 = vadd.f32 %v1198_v29, %v1536_v51  ;;  %v944_v34 = vadd.f32 %v1246_v30, %v1536_v51 }
 0x107   : > { %v1200_v35 = vpop.f32.mrf.mxu0  ;;  %v1248_v36 = vpop.f32.mrf.mxu1 }
 0x108   : > { %960 = vst [vmem:[%s1543_s8 + $0x28] sm:$0xff] %v928_v33  ;;  %976 = vst [vmem:[%s1543_s8 + $0xa8] sm:$0xff] %v944_v34  ;;  %v1201_v37 = vadd.f32 %v1200_v35, %v1199_v31  ;;  %v1249_v38 = vadd.f32 %v1248_v36, %v1247_v32 }
 0x109   : > { %v1202_v39 = vpop.f32.mrf.mxu0  ;;  %v1250_v40 = vpop.f32.mrf.mxu1 }
 0x10a   : > { %v929_v41 = vadd.f32 %v1201_v37, %v1536_v51  ;;  %v945_v42 = vadd.f32 %v1249_v38, %v1536_v51 }
 0x10b   : > { %v1203_v43 = vpop.f32.mrf.mxu0  ;;  %v1251_v44 = vpop.f32.mrf.mxu1 }
 0x10c   : > { %961 = vst [vmem:[%s1543_s8 + $0x30] sm:$0xff] %v929_v41  ;;  %977 = vst [vmem:[%s1543_s8 + $0xb0] sm:$0xff] %v945_v42  ;;  %v1204_v45 = vadd.f32 %v1203_v43, %v1202_v39  ;;  %v1252_v46 = vadd.f32 %v1251_v44, %v1250_v40 }
 0x10d   : > { %v1205_v47 = vpop.f32.mrf.mxu0  ;;  %v1253_v48 = vpop.f32.mrf.mxu1 }
 0x10e   : > { %v930_v49 = vadd.f32 %v1204_v45, %v1536_v51  ;;  %v946_v50 = vadd.f32 %v1252_v46, %v1536_v51 }
 0x10f   : > { %v1206_v52 = vpop.f32.mrf.mxu0  ;;  %v1254_v53 = vpop.f32.mrf.mxu1 }
 0x110   : > { %962 = vst [vmem:[%s1543_s8 + $0x38] sm:$0xff] %v930_v49  ;;  %978 = vst [vmem:[%s1543_s8 + $0xb8] sm:$0xff] %v946_v50  ;;  %v1207_v54 = vadd.f32 %v1206_v52, %v1205_v47  ;;  %v1255_v55 = vadd.f32 %v1254_v53, %v1253_v48 }
 0x111   : > { %v1208_v56 = vpop.f32.mrf.mxu0  ;;  %v1256_v57 = vpop.f32.mrf.mxu1 }
 0x112   : > { %v931_v58 = vadd.f32 %v1207_v54, %v1536_v51  ;;  %v947_v59 = vadd.f32 %v1255_v55, %v1536_v51 }
 0x113   : > { %v1209_v60 = vpop.f32.mrf.mxu0  ;;  %v1257_v61 = vpop.f32.mrf.mxu1 }
 0x114   : > { %963 = vst [vmem:[%s1543_s8 + $0x40] sm:$0xff] %v931_v58  ;;  %979 = vst [vmem:[%s1543_s8 + $0xc0] sm:$0xff] %v947_v59  ;;  %v1210_v62 = vadd.f32 %v1209_v60, %v1208_v56  ;;  %v1258_v63 = vadd.f32 %v1257_v61, %v1256_v57 }
 0x115   : > { %v1211_v0 = vpop.f32.mrf.mxu0  ;;  %v1259_v1 = vpop.f32.mrf.mxu1 }
 0x116   : > { %v932_v2 = vadd.f32 %v1210_v62, %v1536_v51  ;;  %v948_v3 = vadd.f32 %v1258_v63, %v1536_v51 }
 0x117   : > { %v1212_v4 = vpop.f32.mrf.mxu0  ;;  %v1260_v5 = vpop.f32.mrf.mxu1 }
 0x118   : > { %964 = vst [vmem:[%s1543_s8 + $0x48] sm:$0xff] %v932_v2  ;;  %980 = vst [vmem:[%s1543_s8 + $0xc8] sm:$0xff] %v948_v3  ;;  %v1213_v6 = vadd.f32 %v1212_v4, %v1211_v0  ;;  %v1261_v7 = vadd.f32 %v1260_v5, %v1259_v1 }
 0x119   : > { %v1214_v8 = vpop.f32.mrf.mxu0  ;;  %v1262_v9 = vpop.f32.mrf.mxu1 }
 0x11a   : > { %v933_v10 = vadd.f32 %v1213_v6, %v1536_v51  ;;  %v949_v11 = vadd.f32 %v1261_v7, %v1536_v51 }
 0x11b   : > { %v1215_v12 = vpop.f32.mrf.mxu0  ;;  %v1263_v13 = vpop.f32.mrf.mxu1 }
 0x11c   : > { %965 = vst [vmem:[%s1543_s8 + $0x50] sm:$0xff] %v933_v10  ;;  %981 = vst [vmem:[%s1543_s8 + $0xd0] sm:$0xff] %v949_v11  ;;  %v1216_v14 = vadd.f32 %v1215_v12, %v1214_v8  ;;  %v1264_v15 = vadd.f32 %v1263_v13, %v1262_v9 }
 0x11d   : > { %v1217_v16 = vpop.f32.mrf.mxu0  ;;  %v1265_v17 = vpop.f32.mrf.mxu1 }
 0x11e   : > { %v934_v18 = vadd.f32 %v1216_v14, %v1536_v51  ;;  %v950_v19 = vadd.f32 %v1264_v15, %v1536_v51 }
 0x11f   : > { %v1218_v20 = vpop.f32.mrf.mxu0  ;;  %v1266_v21 = vpop.f32.mrf.mxu1 }
 0x120   : > { %966 = vst [vmem:[%s1543_s8 + $0x58] sm:$0xff] %v934_v18  ;;  %982 = vst [vmem:[%s1543_s8 + $0xd8] sm:$0xff] %v950_v19  ;;  %v1219_v22 = vadd.f32 %v1218_v20, %v1217_v16  ;;  %v1267_v23 = vadd.f32 %v1266_v21, %v1265_v17 }
 0x121   : > { %v1220_v24 = vpop.f32.mrf.mxu0  ;;  %v1268_v25 = vpop.f32.mrf.mxu1 }
 0x122   : > { %v935_v26 = vadd.f32 %v1219_v22, %v1536_v51  ;;  %v951_v27 = vadd.f32 %v1267_v23, %v1536_v51 }
 0x123   : > { %v1221_v28 = vpop.f32.mrf.mxu0  ;;  %v1269_v29 = vpop.f32.mrf.mxu1 }
 0x124   : > { %967 = vst [vmem:[%s1543_s8 + $0x60] sm:$0xff] %v935_v26  ;;  %983 = vst [vmem:[%s1543_s8 + $0xe0] sm:$0xff] %v951_v27  ;;  %v1222_v30 = vadd.f32 %v1221_v28, %v1220_v24  ;;  %v1270_v31 = vadd.f32 %v1269_v29, %v1268_v25 }
 0x125   : > { %v1223_v32 = vpop.f32.mrf.mxu0  ;;  %v1271_v33 = vpop.f32.mrf.mxu1 }
 0x126   : > { %v936_v34 = vadd.f32 %v1222_v30, %v1536_v51  ;;  %v952_v35 = vadd.f32 %v1270_v31, %v1536_v51 }
 0x127   : > { %v1224_v36 = vpop.f32.mrf.mxu0  ;;  %v1272_v37 = vpop.f32.mrf.mxu1 }
 0x128   : > { %968 = vst [vmem:[%s1543_s8 + $0x68] sm:$0xff] %v936_v34  ;;  %984 = vst [vmem:[%s1543_s8 + $0xe8] sm:$0xff] %v952_v35  ;;  %v1225_v38 = vadd.f32 %v1224_v36, %v1223_v32  ;;  %v1273_v39 = vadd.f32 %v1272_v37, %v1271_v33 }
 0x129   : > { %v1226_v40 = vpop.f32.mrf.mxu0  ;;  %v1274_v41 = vpop.f32.mrf.mxu1 }
 0x12a   : > { %v937_v42 = vadd.f32 %v1225_v38, %v1536_v51  ;;  %v953_v43 = vadd.f32 %v1273_v39, %v1536_v51 }
 0x12b   : > { %v1227_v44 = vpop.f32.mrf.mxu0  ;;  %v1275_v45 = vpop.f32.mrf.mxu1 }
 0x12c   : > { %969 = vst [vmem:[%s1543_s8 + $0x70] sm:$0xff] %v937_v42  ;;  %985 = vst [vmem:[%s1543_s8 + $0xf0] sm:$0xff] %v953_v43  ;;  %v1228_v46 = vadd.f32 %v1227_v44, %v1226_v40  ;;  %v1276_v47 = vadd.f32 %v1275_v45, %v1274_v41 }
 0x12e   : > { %v938_v48 = vadd.f32 %v1228_v46, %v1536_v51  ;;  %v954_v49 = vadd.f32 %v1276_v47, %v1536_v51 }
 0x130   : > { %970 = vst [vmem:[%s1543_s8 + $0x78] sm:$0xff] %v938_v48  ;;  %986 = vst [vmem:[%s1543_s8 + $0xf8] sm:$0xff] %v954_v49 }
 0x131 PF: > { %s13_s14 = sadd.s32 1, %s1403_s14   ;;  %s1622_s12 = smov %s1399_s13 }
 0x132   : > { %p10_p5 = scmp.ge.s32.totalorder %s13_s14, 4   ;;  %s1623_s13 = smov %s1625_s15 }
 0x134   :  { %12 = sbr.rel (!%p10_p5) target bundleno = 2 (0x2), region = 76 }

// kernel: define_g_forward.37
= control target key start
LH: loop header
LB: loop body
LE: loop exit
PB: predicated region body
PF: predicated region fallthrough
CT: control target
= control target key end

     0   :  { %s586_s1 = inlined_call_operand.vmem [shape: bf16[128,128], index: 1, kind: input, shape index: {}]   ;;  %s587_s0 = inlined_call_operand.vmem [shape: bf16[128,128], index: 0, kind: input, shape index: {}]   ;;  %s588_s2 = inlined_call_operand.vmem [shape: f32[1,128], index: 2, kind: input, shape index: {}]   ;;  %s589_s3 = inlined_call_operand.vmem [shape: f32[128,128], index: 3, kind: output, shape index: {}]  }
   0x1   :  { %v451_v0 = vld [vmem:[%s586_s1 + $0x38] sm:$0xff]   ;;  %v452_v1 = vld [vmem:[%s586_s1 + $0x30] sm:$0xff]   ;;  %v453_v2 = vld [vmem:[%s586_s1 + $0x28] sm:$0xff]  }
   0x2   :  { %403 = vmatprep.subr.bf16.mxu0 %v451_v0  ;;  %435 = vmatprep.subr.bf16.mxu1 %v451_v0  ;;  %v454_v3 = vld [vmem:[%s586_s1 + $0x20] sm:$0xff]   ;;  %v455_v6 = vld [vmem:[%s586_s1 + $0x18] sm:$0xff]   ;;  %v456_v7 = vld [vmem:[%s586_s1 + $0x10] sm:$0xff]  }
   0x3   :  { %404 = vmatpush3.bf16.msra.mxu0 %v451_v0  ;;  %443 = vmatpush3.bf16.msra.mxu1 %v451_v0  ;;  %v459_v4 = vld [vmem:[%s587_s0] sm:$0xff]   ;;  %v457_v8 = vld [vmem:[%s586_s1 + $0x8] sm:$0xff]   ;;  %v463_v12 = vld [vmem:[%s587_s0 + $0x10] sm:$0xff]  }
   0x4   :  { %405 = vmatprep.subr.bf16.mxu0 %v452_v1  ;;  %436 = vmatprep.subr.bf16.mxu1 %v452_v1  ;;  %v460_v5 = vld [vmem:[%s587_s0 + $0x20] sm:$0xff]   ;;  %v461_v10 = vld [vmem:[%s587_s0 + $0x8] sm:$0xff]   ;;  %v464_v13 = vld [vmem:[%s587_s0 + $0x30] sm:$0xff]  }
   0x5   :  { %419 = vmatprep.mubr.bf16.mxu0 %v459_v4  ;;  %427 = vmatprep.mubr.bf16.mxu1 %v460_v5  ;;  %v458_v9 = vld [vmem:[%s586_s1] sm:$0xff]   ;;  %v462_v11 = vld [vmem:[%s587_s0 + $0x28] sm:$0xff]   ;;  %v465_v14 = vld [vmem:[%s587_s0 + $0x18] sm:$0xff]  }
   0x6   :  { %v466_v15 = vld [vmem:[%s587_s0 + $0x38] sm:$0xff]   ;;  %v386_v16 = vld [vmem:[%s588_s2] ss:$0 sm:$0xff] }
   0x7   :  { %406 = vmatpush3.bf16.msra.mxu0 %v452_v1  ;;  %444 = vmatpush3.bf16.msra.mxu1 %v452_v1 }
   0x8   :  { %407 = vmatprep.subr.bf16.mxu0 %v453_v2  ;;  %437 = vmatprep.subr.bf16.mxu1 %v453_v2 }
   0xb   :  { %408 = vmatpush3.bf16.msra.mxu0 %v453_v2  ;;  %445 = vmatpush3.bf16.msra.mxu1 %v453_v2 }
   0xc   :  { %409 = vmatprep.subr.bf16.mxu0 %v454_v3  ;;  %438 = vmatprep.subr.bf16.mxu1 %v454_v3 }
   0xf   :  { %410 = vmatpush3.bf16.msra.mxu0 %v454_v3  ;;  %446 = vmatpush3.bf16.msra.mxu1 %v454_v3 }
  0x10   :  { %411 = vmatprep.subr.bf16.mxu0 %v455_v6  ;;  %439 = vmatprep.subr.bf16.mxu1 %v455_v6 }
  0x13   :  { %412 = vmatpush3.bf16.msra.mxu0 %v455_v6  ;;  %447 = vmatpush3.bf16.msra.mxu1 %v455_v6 }
  0x14   :  { %413 = vmatprep.subr.bf16.mxu0 %v456_v7  ;;  %440 = vmatprep.subr.bf16.mxu1 %v456_v7 }
  0x17   :  { %414 = vmatpush3.bf16.msra.mxu0 %v456_v7  ;;  %448 = vmatpush3.bf16.msra.mxu1 %v456_v7 }
  0x18   :  { %415 = vmatprep.subr.bf16.mxu0 %v457_v8  ;;  %441 = vmatprep.subr.bf16.mxu1 %v457_v8 }
  0x1b   :  { %416 = vmatpush3.bf16.msra.mxu0 %v457_v8  ;;  %449 = vmatpush3.bf16.msra.mxu1 %v457_v8 }
  0x1c   :  { %417 = vmatprep.subr.bf16.mxu0 %v458_v9  ;;  %442 = vmatprep.subr.bf16.mxu1 %v458_v9 }
  0x1f   :  { %418 = vmatpush3.bf16.msra.mxu0 %v458_v9  ;;  %450 = vmatpush3.bf16.msra.mxu1 %v458_v9 }
  0x22   :  { %420 = vmatmul.mubr.bf16.vlgmr.msra.gmra.mxu0 %v461_v10  ;;  %428 = vmatmul.mubr.bf16.vlgmr.msra.gmra.mxu1 %v462_v11 }
  0x23   :  { %423 = vmatprep.mubr.bf16.mxu0 %v463_v12  ;;  %431 = vmatprep.mubr.bf16.mxu1 %v464_v13 }
  0x2a   :  { %424 = vmatmul.mubr.bf16.gmra.mxu0 %v465_v14  ;;  %432 = vmatmul.mubr.bf16.gmra.mxu1 %v466_v15 }
  0xe2   :  { %v421_v17 = vpop.f32.mrf.mxu0  ;;  %v429_v18 = vpop.f32.mrf.mxu1 }
  0xe3   :  { %v336_v19 = vadd.f32 %v421_v17, %v386_v16  ;;  %v344_v20 = vadd.f32 %v429_v18, %v386_v16 }
  0xe4   :  { %v213_v21 = vpop.f32.mrf.mxu0  ;;  %v245_v22 = vpop.f32.mrf.mxu1 }
  0xe5   :  { %352 = vst [vmem:[%s589_s3 + $0x10] sm:$0xff] %v336_v19  ;;  %360 = vst [vmem:[%s589_s3 + $0x50] sm:$0xff] %v344_v20  ;;  %v334_v23 = vadd.f32 %v386_v16, %v213_v21  ;;  %v342_v24 = vadd.f32 %v386_v16, %v245_v22 }
  0xe6   :  { %v422_v25 = vpop.f32.mrf.mxu0  ;;  %v430_v26 = vpop.f32.mrf.mxu1 }
  0xe7   :  { %350 = vst [vmem:[%s589_s3] sm:$0xff] %v334_v23  ;;  %358 = vst [vmem:[%s589_s3 + $0x40] sm:$0xff] %v342_v24  ;;  %v337_v27 = vadd.f32 %v422_v25, %v386_v16  ;;  %v345_v28 = vadd.f32 %v430_v26, %v386_v16 }
  0xe8   :  { %v216_v29 = vpop.f32.mrf.mxu0  ;;  %v248_v30 = vpop.f32.mrf.mxu1 }
  0xe9   :  { %353 = vst [vmem:[%s589_s3 + $0x18] sm:$0xff] %v337_v27  ;;  %361 = vst [vmem:[%s589_s3 + $0x58] sm:$0xff] %v345_v28  ;;  %v335_v31 = vadd.f32 %v386_v16, %v216_v29  ;;  %v343_v32 = vadd.f32 %v386_v16, %v248_v30 }
  0xea   :  { %v425_v33 = vpop.f32.mrf.mxu0  ;;  %v433_v34 = vpop.f32.mrf.mxu1 }
  0xeb   :  { %351 = vst [vmem:[%s589_s3 + $0x8] sm:$0xff] %v335_v31  ;;  %359 = vst [vmem:[%s589_s3 + $0x48] sm:$0xff] %v343_v32  ;;  %v340_v35 = vadd.f32 %v425_v33, %v386_v16  ;;  %v348_v36 = vadd.f32 %v433_v34, %v386_v16 }
  0xec   :  { %v229_v37 = vpop.f32.mrf.mxu0  ;;  %v261_v38 = vpop.f32.mrf.mxu1 }
  0xed   :  { %356 = vst [vmem:[%s589_s3 + $0x30] sm:$0xff] %v340_v35  ;;  %364 = vst [vmem:[%s589_s3 + $0x70] sm:$0xff] %v348_v36  ;;  %v338_v39 = vadd.f32 %v386_v16, %v229_v37  ;;  %v346_v40 = vadd.f32 %v386_v16, %v261_v38 }
  0xee   :  { %v426_v41 = vpop.f32.mrf.mxu0  ;;  %v434_v42 = vpop.f32.mrf.mxu1 }
  0xef   :  { %354 = vst [vmem:[%s589_s3 + $0x20] sm:$0xff] %v338_v39  ;;  %362 = vst [vmem:[%s589_s3 + $0x60] sm:$0xff] %v346_v40  ;;  %v341_v43 = vadd.f32 %v426_v41, %v386_v16  ;;  %v349_v44 = vadd.f32 %v434_v42, %v386_v16 }
  0xf0   :  { %v232_v45 = vpop.f32.mrf.mxu0  ;;  %v264_v46 = vpop.f32.mrf.mxu1 }
  0xf1   :  { %357 = vst [vmem:[%s589_s3 + $0x38] sm:$0xff] %v341_v43  ;;  %365 = vst [vmem:[%s589_s3 + $0x78] sm:$0xff] %v349_v44  ;;  %v339_v47 = vadd.f32 %v386_v16, %v232_v45  ;;  %v347_v48 = vadd.f32 %v386_v16, %v264_v46 }
  0xf3   :  { %355 = vst [vmem:[%s589_s3 + $0x28] sm:$0xff] %v339_v47  ;;  %363 = vst [vmem:[%s589_s3 + $0x68] sm:$0xff] %v347_v48 }

// kernel: define_g_forward.38
= control target key start
LH: loop header
LB: loop body
LE: loop exit
PB: predicated region body
PF: predicated region fallthrough
CT: control target
= control target key end

     0   :  { %s396_s6 = smov 0   ;;  %s398_s7 = smov 0   ;;  %s460_s0 = inlined_call_operand.vmem [shape: f32[128,16], index: 0, kind: input, shape index: {}]   ;;  %s461_s1 = inlined_call_operand.vmem [shape: f32[128,16], index: 1, kind: output, shape index: {}]  }
   0x1   :  { %s400_s8 = smov 0  }
   0x2 LB: > { %s23_s9 = sadd.s32 1, %s380_s7  ;;  %p329_p0 = scmp.ge.s32.totalorder %s384_s8, 1  ;;  %s384_s8 = sphi %s400_s8, %s11_s8   ;;  %s380_s7 = sphi %s398_s7, %s463_s7   ;;  %s376_s6 = sphi %s396_s6, %s462_s6  }
   0x3   : > { %p25_p1 = scmp.ge.s32.totalorder %s23_s9, 2  ;;  %p107_p2 = scmp.lt.s32.totalorder %s384_s8, 3 }
   0x5   : > { %s465_s9 = smov (%p25_p1, %s23_s9), 0  ;;  %p108_p3 = pnand %p329_p0, %p107_p2 }
   0x6   : > { %s330_s10 = sshll.u32 (!%p108_p3), %s376_s6, 3 }
   0x7   : > { %111 = sbr.rel (%p108_p3) target bundleno = 102 (0x66), region = 24  ;;  %p134_p4 = scmp.lt.s32.totalorder (!%p108_p3), %s330_s10, 15 }
   0xc   : > { %s467_s10 = smov (!%p134_p4, %s330_s10), 15  ;;  %vm159_vm0 = vcmask 130048  }
   0xd   : > { %s331_s11 = sshll.u32 %s467_s10, 3 }
   0xe   : > { %s140_s14 = scalar_lea.vmem %s460_s0, %s331_s11  ;;  %s149_s17 = scalar_lea.vmem %s461_s1, %s331_s11 }
   0xf   : > { %v151_v0 = vld [vmem:[%s140_s14] sm:$0xff]  ;;  %v152_v1 = vld [vmem:[%s140_s14 + $0x8] sm:$0xff]  ;;  %v153_v2 = vld [vmem:[%s140_s14 + $0x10] sm:$0xff] }
  0x10   : > { %v154_v3 = vld [vmem:[%s140_s14 + $0x18] sm:$0xff]  ;;  %v160_v4 = vsel %vm159_vm0, %v151_v0, 0.0  ;;  %v161_v5 = vsel %vm159_vm0, %v152_v1, 0.0  ;;  %v163_v6 = vsel %vm159_vm0, %v153_v2, 0.0  ;;  %v155_v7 = vld [vmem:[%s140_s14 + $0x20] sm:$0xff]  ;;  %v156_v10 = vld [vmem:[%s140_s14 + $0x28] sm:$0xff] }
  0x11   : > { %v162_v8 = vadd.f32 %v161_v5, %v160_v4  ;;  %v165_v9 = vsel %vm159_vm0, %v154_v3, 0.0  ;;  %v167_v12 = vsel %vm159_vm0, %v155_v7, 0.0  ;;  %v157_v13 = vld [vmem:[%s140_s14 + $0x30] sm:$0xff]  ;;  %v169_v15 = vsel %vm159_vm0, %v156_v10, 0.0  ;;  %v158_v16 = vld [vmem:[%s140_s14 + $0x38] sm:$0xff] }
  0x12   : > { %v171_v18 = vsel %vm159_vm0, %v157_v13, 0.0  ;;  %v173_v20 = vsel %vm159_vm0, %v158_v16, 0.0 }
  0x13   : > { %v164_v11 = vadd.f32 %v163_v6, %v162_v8 }
  0x15   : > { %v166_v14 = vadd.f32 %v165_v9, %v164_v11 }
  0x17   : > { %v168_v17 = vadd.f32 %v167_v12, %v166_v14 }
  0x19   : > { %v170_v19 = vadd.f32 %v169_v15, %v168_v17 }
  0x1b   : > { %v172_v21 = vadd.f32 %v171_v18, %v170_v19 }
  0x1d   : > { %v174_v22 = vadd.f32 %v173_v20, %v172_v21 }
  0x1f   : > { %v175_v23 = vrot.slane %v174_v22, 4 }
  0x21   : > { %v176_v24 = vadd.f32 %v175_v23, %v174_v22 }
  0x23   : > { %v177_v25 = vrot.slane %v176_v24, 2 }
  0x25   : > { %v178_v26 = vadd.f32 %v177_v25, %v176_v24 }
  0x27   : > { %v179_v27 = vrot.slane %v178_v26, 1 }
  0x29   : > { %v180_v28 = vadd.f32 %v179_v27, %v178_v26 }
  0x2b   : > { %v182_v29 = vmul.f32 0.015625, %v180_v28 }
  0x2d   : > { %v183_v30 = vsub.f32 %v151_v0, %v182_v29  ;;  %v184_v31 = vsub.f32 %v152_v1, %v182_v29  ;;  %v185_v32 = vsub.f32 %v153_v2, %v182_v29  ;;  %v186_v33 = vsub.f32 %v154_v3, %v182_v29 }
  0x2e   : > { %v187_v34 = vsub.f32 %v155_v7, %v182_v29  ;;  %v188_v35 = vsub.f32 %v156_v10, %v182_v29  ;;  %v189_v40 = vsub.f32 %v157_v13, %v182_v29  ;;  %v190_v46 = vsub.f32 %v158_v16, %v182_v29 }
  0x2f   : > { %v191_v36 = vmul.f32 %v183_v30, %v183_v30  ;;  %v192_v37 = vmul.f32 %v184_v31, %v184_v31  ;;  %v193_v38 = vmul.f32 %v185_v32, %v185_v32  ;;  %v194_v39 = vmul.f32 %v186_v33, %v186_v33 }
  0x30   : > { %v195_v41 = vmul.f32 %v187_v34, %v187_v34  ;;  %v196_v47 = vmul.f32 %v188_v35, %v188_v35  ;;  %v197_v50 = vmul.f32 %v189_v40, %v189_v40  ;;  %v198_v53 = vmul.f32 %v190_v46, %v190_v46 }
  0x31   : > { %v199_v42 = vsel %vm159_vm0, %v191_v36, 0.0  ;;  %v200_v43 = vsel %vm159_vm0, %v192_v37, 0.0  ;;  %v202_v44 = vsel %vm159_vm0, %v193_v38, 0.0  ;;  %v204_v48 = vsel %vm159_vm0, %v194_v39, 0.0 }
  0x32   : > { %v201_v45 = vadd.f32 %v200_v43, %v199_v42  ;;  %v206_v51 = vsel %vm159_vm0, %v195_v41, 0.0  ;;  %v208_v54 = vsel %vm159_vm0, %v196_v47, 0.0  ;;  %v210_v56 = vsel %vm159_vm0, %v197_v50, 0.0 }
  0x33   : > { %v212_v58 = vsel %vm159_vm0, %v198_v53, 0.0 }
  0x34   : > { %v203_v49 = vadd.f32 %v202_v44, %v201_v45 }
  0x36   : > { %v205_v52 = vadd.f32 %v204_v48, %v203_v49 }
  0x38   : > { %v207_v55 = vadd.f32 %v206_v51, %v205_v52 }
  0x3a   : > { %v209_v57 = vadd.f32 %v208_v54, %v207_v55 }
  0x3c   : > { %v211_v59 = vadd.f32 %v210_v56, %v209_v57 }
  0x3e   : > { %v213_v60 = vadd.f32 %v212_v58, %v211_v59 }
  0x40   : > { %v214_v61 = vrot.slane %v213_v60, 4 }
  0x42   : > { %v215_v62 = vadd.f32 %v214_v61, %v213_v60 }
  0x44   : > { %v216_v63 = vrot.slane %v215_v62, 2 }
  0x46   : > { %v217_v0 = vadd.f32 %v216_v63, %v215_v62 }
  0x48   : > { %v218_v1 = vrot.slane %v217_v0, 1 }
  0x4a   : > { %v219_v2 = vadd.f32 %v218_v1, %v217_v0 }
  0x4c   : > { %v220_v3 = vmul.f32 0.015625, %v219_v2 }
  0x4e   : > { %v221_v4 = vadd.f32 1e-05, %v220_v3 }
  0x50   : > { %360 = vrsqrt.f32 %v221_v4 }
  0x5d   : > { %v361_v5 = vpop.eup %360 }
  0x5e   : > { %v223_v6 = vmul.f32 %v361_v5, %v183_v30  ;;  %v224_v7 = vmul.f32 %v361_v5, %v184_v31  ;;  %v225_v8 = vmul.f32 %v361_v5, %v185_v32  ;;  %v226_v9 = vmul.f32 %v361_v5, %v186_v33 }
  0x5f   : > { %v227_v10 = vmul.f32 %v361_v5, %v187_v34  ;;  %v228_v11 = vmul.f32 %v361_v5, %v188_v35  ;;  %v229_v12 = vmul.f32 %v361_v5, %v189_v40  ;;  %v230_v13 = vmul.f32 %v361_v5, %v190_v46 }
  0x60   : > { %v231_v14 = vmax.f32 %v223_v6, 0.0  ;;  %v232_v15 = vmax.f32 %v224_v7, 0.0  ;;  %v233_v16 = vmax.f32 %v225_v8, 0.0  ;;  %v234_v17 = vmax.f32 %v226_v9, 0.0 }
  0x61   : > { %v235_v18 = vmax.f32 %v227_v10, 0.0  ;;  %v236_v19 = vmax.f32 %v228_v11, 0.0  ;;  %v237_v20 = vmax.f32 %v229_v12, 0.0  ;;  %v238_v21 = vmax.f32 %v230_v13, 0.0 }
  0x62   : > { %239 = vst.msk [vmem:[%s149_s17] sm:$0xff] %vm159_vm0, %v231_v14  ;;  %240 = vst.msk [vmem:[%s149_s17 + $0x8] sm:$0xff] %vm159_vm0, %v232_v15 }
  0x63   : > { %241 = vst.msk [vmem:[%s149_s17 + $0x10] sm:$0xff] %vm159_vm0, %v233_v16  ;;  %242 = vst.msk [vmem:[%s149_s17 + $0x18] sm:$0xff] %vm159_vm0, %v234_v17 }
  0x64   : > { %243 = vst.msk [vmem:[%s149_s17 + $0x20] sm:$0xff] %vm159_vm0, %v235_v18  ;;  %244 = vst.msk [vmem:[%s149_s17 + $0x28] sm:$0xff] %vm159_vm0, %v236_v19 }
  0x65   : > { %245 = vst.msk [vmem:[%s149_s17 + $0x30] sm:$0xff] %vm159_vm0, %v237_v20  ;;  %246 = vst.msk [vmem:[%s149_s17 + $0x38] sm:$0xff] %vm159_vm0, %v238_v21 }
  0x66 PF: > { %s11_s8 = sadd.s32 1, %s384_s8   ;;  %s462_s6 = smov %s380_s7 }
  0x67   : > { %p8_p5 = scmp.ge.s32.totalorder %s11_s8, 4   ;;  %s463_s7 = smov %s465_s9 }
  0x69   :  { %10 = sbr.rel (!%p8_p5) target bundleno = 2 (0x2), region = 54 }

// kernel: define_g_forward.40
= control target key start
LH: loop header
LB: loop body
LE: loop exit
PB: predicated region body
PF: predicated region fallthrough
CT: control target
= control target key end

     0   :  { %s336_s6 = smov 0   ;;  %s338_s7 = smov 0   ;;  %s382_s0 = inlined_call_operand.vmem [shape: f32[32,32], index: 0, kind: input, shape index: {}]   ;;  %s383_s1 = inlined_call_operand.vmem [shape: f32[32,32], index: 1, kind: output, shape index: {}]  }
   0x1   :  { %s340_s8 = smov 0  }
   0x2 LB: > { %s23_s9 = sadd.s32 1, %s320_s7  ;;  %p269_p0 = scmp.ge.s32.totalorder %s324_s8, 1  ;;  %s324_s8 = sphi %s340_s8, %s11_s8   ;;  %s320_s7 = sphi %s338_s7, %s385_s7   ;;  %s316_s6 = sphi %s336_s6, %s384_s6  }
   0x3   : > { %p25_p1 = scmp.ge.s32.totalorder %s23_s9, 2  ;;  %p107_p2 = scmp.lt.s32.totalorder %s324_s8, 3 }
   0x5   : > { %s387_s9 = smov (%p25_p1, %s23_s9), 0  ;;  %p108_p3 = pnand %p269_p0, %p107_p2 }
   0x6   : > { %s270_s10 = sshll.u32 (!%p108_p3), %s316_s6, 1 }
   0x7   : > { %111 = sbr.rel (%p108_p3) target bundleno = 75 (0x4b), region = 24  ;;  %p134_p4 = scmp.lt.s32.totalorder (!%p108_p3), %s270_s10, 3 }
   0xc   : > { %s389_s10 = smov (!%p134_p4, %s270_s10), 3  ;;  %vm153_vm0 = vcmask 261120  }
   0xd   : > { %s271_s11 = sshll.u32 %s389_s10, 3 }
   0xe   : > { %s140_s14 = scalar_lea.vmem %s382_s0, %s271_s11  ;;  %s149_s17 = scalar_lea.vmem %s383_s1, %s271_s11 }
   0xf   : > { %v151_v0 = vld [vmem:[%s140_s14] sm:$0xff]  ;;  %v152_v1 = vld [vmem:[%s140_s14 + $0x8] sm:$0xff] }
  0x10   : > { %v154_v2 = vsel %vm153_vm0, %v151_v0, 0.0  ;;  %v155_v3 = vsel %vm153_vm0, %v152_v1, 0.0 }
  0x11   : > { %v156_v4 = vadd.f32 %v155_v3, %v154_v2 }
  0x13   : > { %v157_v5 = vrot.slane %v156_v4, 4 }
  0x15   : > { %v158_v6 = vadd.f32 %v157_v5, %v156_v4 }
  0x17   : > { %v159_v7 = vrot.slane %v158_v6, 2 }
  0x19   : > { %v160_v8 = vadd.f32 %v159_v7, %v158_v6 }
  0x1b   : > { %v161_v9 = vrot.slane %v160_v8, 1 }
  0x1d   : > { %v162_v10 = vadd.f32 %v161_v9, %v160_v8 }
  0x1f   : > { %v164_v11 = vmul.f32 0.0625, %v162_v10 }
  0x21   : > { %v165_v12 = vsub.f32 %v151_v0, %v164_v11  ;;  %v166_v13 = vsub.f32 %v152_v1, %v164_v11 }
  0x23   : > { %v167_v14 = vmul.f32 %v165_v12, %v165_v12  ;;  %v168_v15 = vmul.f32 %v166_v13, %v166_v13 }
  0x25   : > { %v169_v16 = vsel %vm153_vm0, %v167_v14, 0.0  ;;  %v170_v17 = vsel %vm153_vm0, %v168_v15, 0.0 }
  0x26   : > { %v171_v18 = vadd.f32 %v170_v17, %v169_v16 }
  0x28   : > { %v172_v19 = vrot.slane %v171_v18, 4 }
  0x2a   : > { %v173_v20 = vadd.f32 %v172_v19, %v171_v18 }
  0x2c   : > { %v174_v21 = vrot.slane %v173_v20, 2 }
  0x2e   : > { %v175_v22 = vadd.f32 %v174_v21, %v173_v20 }
  0x30   : > { %v176_v23 = vrot.slane %v175_v22, 1 }
  0x32   : > { %v177_v24 = vadd.f32 %v176_v23, %v175_v22 }
  0x34   : > { %v178_v25 = vmul.f32 0.0625, %v177_v24 }
  0x36   : > { %v179_v26 = vadd.f32 1e-05, %v178_v25 }
  0x38   : > { %300 = vrsqrt.f32 %v179_v26 }
  0x45   : > { %v301_v27 = vpop.eup %300 }
  0x46   : > { %v181_v28 = vmul.f32 %v301_v27, %v165_v12  ;;  %v182_v29 = vmul.f32 %v301_v27, %v166_v13 }
  0x48   : > { %v183_v30 = vmax.f32 %v181_v28, 0.0  ;;  %v184_v31 = vmax.f32 %v182_v29, 0.0 }
  0x4a   : > { %185 = vst.msk [vmem:[%s149_s17] sm:$0xff] %vm153_vm0, %v183_v30  ;;  %186 = vst.msk [vmem:[%s149_s17 + $0x8] sm:$0xff] %vm153_vm0, %v184_v31 }
  0x4b PF: > { %s11_s8 = sadd.s32 1, %s324_s8   ;;  %s384_s6 = smov %s320_s7 }
  0x4c   : > { %p8_p5 = scmp.ge.s32.totalorder %s11_s8, 4   ;;  %s385_s7 = smov %s387_s9 }
  0x4e   :  { %10 = sbr.rel (!%p8_p5) target bundleno = 2 (0x2), region = 54 }

// kernel: define_g_forward.39
= control target key start
LH: loop header
LB: loop body
LE: loop exit
PB: predicated region body
PF: predicated region fallthrough
CT: control target
= control target key end

     0   :  { %s444_s1 = inlined_call_operand.vmem [shape: bf16[256,128], index: 1, kind: input, shape index: {}]   ;;  %s445_s0 = inlined_call_operand.vmem [shape: bf16[32,256], index: 0, kind: input, shape index: {}]   ;;  %s446_s2 = inlined_call_operand.vmem [shape: f32[1,128], index: 2, kind: input, shape index: {}]   ;;  %s447_s3 = inlined_call_operand.vmem [shape: f32[32,128], index: 3, kind: output, shape index: {}]  }
   0x1   :  { %v327_v0 = vld [vmem:[%s444_s1 + $0x78] sm:$0xff]   ;;  %v329_v2 = vld [vmem:[%s444_s1 + $0x70] sm:$0xff]   ;;  %v331_v4 = vld [vmem:[%s444_s1 + $0x68] sm:$0xff]  }
   0x2   :  { %v328_v1 = vld [vmem:[%s444_s1 + $0x38] sm:$0xff]   ;;  %283 = vmatprep.subr.bf16.mxu0 %v327_v0  ;;  %311 = vmatprep.subr.bf16.mxu1 %v327_v0  ;;  %v330_v3 = vld [vmem:[%s444_s1 + $0x30] sm:$0xff]   ;;  %v332_v5 = vld [vmem:[%s444_s1 + $0x28] sm:$0xff]  }
   0x3   :  { %284 = vmatpush3.bf16.msra.mxu0 %v328_v1  ;;  %319 = vmatpush3.bf16.msra.mxu1 %v328_v1  ;;  %v333_v6 = vld [vmem:[%s444_s1 + $0x60] sm:$0xff]   ;;  %v335_v8 = vld [vmem:[%s444_s1 + $0x58] sm:$0xff]   ;;  %v337_v10 = vld [vmem:[%s444_s1 + $0x50] sm:$0xff]  }
   0x4   :  { %285 = vmatprep.subr.bf16.mxu0 %v329_v2  ;;  %312 = vmatprep.subr.bf16.mxu1 %v329_v2  ;;  %v334_v7 = vld [vmem:[%s444_s1 + $0x20] sm:$0xff]   ;;  %v336_v9 = vld [vmem:[%s444_s1 + $0x18] sm:$0xff]   ;;  %v338_v13 = vld [vmem:[%s444_s1 + $0x10] sm:$0xff]  }
   0x5   :  { %v345_v11 = vld [vmem:[%s445_s0 + $0x4] ss:$8 sps:$4 sm:$0xff]   ;;  %v348_v12 = vld [vmem:[%s445_s0 + $0x14] ss:$8 sps:$4 sm:$0xff]   ;;  %v343_v18 = vld [vmem:[%s445_s0] ss:$8 sps:$4 sm:$0xff]  }
   0x6   :  { %v339_v14 = vld [vmem:[%s444_s1 + $0x48] sm:$0xff]   ;;  %211 = vmatprep.mubr.bf16.mxu0 %v345_v11  ;;  %219 = vmatprep.mubr.bf16.mxu1 %v348_v12  ;;  %v341_v16 = vld [vmem:[%s444_s1 + $0x40] sm:$0xff]   ;;  %v346_v19 = vld [vmem:[%s445_s0 + $0x10] ss:$8 sps:$4 sm:$0xff]  }
   0x7   :  { %286 = vmatpush3.bf16.msra.mxu0 %v330_v3  ;;  %320 = vmatpush3.bf16.msra.mxu1 %v330_v3  ;;  %v340_v15 = vld [vmem:[%s444_s1 + $0x8] sm:$0xff]   ;;  %v342_v17 = vld [vmem:[%s444_s1] sm:$0xff]  }
   0x8   :  { %287 = vmatprep.subr.bf16.mxu0 %v331_v4  ;;  %313 = vmatprep.subr.bf16.mxu1 %v331_v4  ;;  %v282_v23 = vld [vmem:[%s446_s2] ss:$0 sm:$0xff] }
   0xb   :  { %288 = vmatpush3.bf16.msra.mxu0 %v332_v5  ;;  %321 = vmatpush3.bf16.msra.mxu1 %v332_v5 }
   0xc   :  { %289 = vmatprep.subr.bf16.mxu0 %v333_v6  ;;  %314 = vmatprep.subr.bf16.mxu1 %v333_v6 }
   0xf   :  { %290 = vmatpush3.bf16.msra.mxu0 %v334_v7  ;;  %322 = vmatpush3.bf16.msra.mxu1 %v334_v7 }
  0x10   :  { %291 = vmatprep.subr.bf16.mxu0 %v335_v8  ;;  %315 = vmatprep.subr.bf16.mxu1 %v335_v8 }
  0x13   :  { %292 = vmatpush3.bf16.msra.mxu0 %v336_v9  ;;  %323 = vmatpush3.bf16.msra.mxu1 %v336_v9 }
  0x14   :  { %293 = vmatprep.subr.bf16.mxu0 %v337_v10  ;;  %316 = vmatprep.subr.bf16.mxu1 %v337_v10 }
  0x17   :  { %294 = vmatpush3.bf16.msra.mxu0 %v338_v13  ;;  %324 = vmatpush3.bf16.msra.mxu1 %v338_v13 }
  0x18   :  { %295 = vmatprep.subr.bf16.mxu0 %v339_v14  ;;  %317 = vmatprep.subr.bf16.mxu1 %v339_v14 }
  0x1b   :  { %296 = vmatpush3.bf16.msra.mxu0 %v340_v15  ;;  %325 = vmatpush3.bf16.msra.mxu1 %v340_v15 }
  0x1c   :  { %297 = vmatprep.subr.bf16.mxu0 %v341_v16  ;;  %318 = vmatprep.subr.bf16.mxu1 %v341_v16 }
  0x1f   :  { %298 = vmatpush3.bf16.msra.mxu0 %v342_v17  ;;  %326 = vmatpush3.bf16.msra.mxu1 %v342_v17 }
  0x22   :  { %212 = vmatmul.mubr.bf16.vlgmr.msra.gmra.mxu0 %v343_v18  ;;  %220 = vmatmul.mubr.bf16.vlgmr.msra.gmra.mxu1 %v346_v19 }
  0xe2   :  { %v299_v20 = vpop.f32.mrf.mxu0  ;;  %v305_v21 = vpop.f32.mrf.mxu1 }
  0xe4   :  { %v300_v22 = vpop.f32.mrf.mxu0  ;;  %v306_v24 = vpop.f32.mrf.mxu1 }
  0xe5   :  { %v301_v25 = vadd.f32 %v300_v22, %v299_v20  ;;  %v307_v26 = vadd.f32 %v306_v24, %v305_v21 }
  0xe6   :  { %v302_v27 = vpop.f32.mrf.mxu0  ;;  %v308_v28 = vpop.f32.mrf.mxu1 }
  0xe7   :  { %v250_v29 = vadd.f32 %v301_v25, %v282_v23  ;;  %v252_v30 = vadd.f32 %v307_v26, %v282_v23 }
  0xe8   :  { %v303_v31 = vpop.f32.mrf.mxu0  ;;  %v309_v32 = vpop.f32.mrf.mxu1 }
  0xe9   :  { %254 = vst [vmem:[%s447_s3] sm:$0xff] %v250_v29  ;;  %256 = vst [vmem:[%s447_s3 + $0x10] sm:$0xff] %v252_v30  ;;  %v304_v33 = vadd.f32 %v303_v31, %v302_v27  ;;  %v310_v34 = vadd.f32 %v309_v32, %v308_v28 }
  0xeb   :  { %v251_v35 = vadd.f32 %v304_v33, %v282_v23  ;;  %v253_v36 = vadd.f32 %v310_v34, %v282_v23 }
  0xed   :  { %255 = vst [vmem:[%s447_s3 + $0x8] sm:$0xff] %v251_v35  ;;  %257 = vst [vmem:[%s447_s3 + $0x18] sm:$0xff] %v253_v36 }

// kernel: define_g_forward.44
= control target key start
LH: loop header
LB: loop body
LE: loop exit
PB: predicated region body
PF: predicated region fallthrough
CT: control target
= control target key end

     0   :  { %s420_s9 = smov 0   ;;  %s422_s10 = smov 0   ;;  %s467_s0 = inlined_call_operand.vmem [shape: f32[32,32], index: 0, kind: input, shape index: {}]   ;;  %s468_s1 = inlined_call_operand.vmem [shape: f32[32,32], index: 1, kind: input, shape index: {}]   ;;  %s469_s2 = inlined_call_operand.vmem [shape: f32[32,32], index: 2, kind: output, shape index: {}]  }
   0x1   :  { %s424_s11 = smov 0  }
   0x2 LB: > { %s24_s12 = sadd.s32 1, %s399_s10  ;;  %p346_p0 = scmp.ge.s32.totalorder %s403_s11, 1  ;;  %s403_s11 = sphi %s424_s11, %s12_s11   ;;  %s399_s10 = sphi %s422_s10, %s471_s10   ;;  %s395_s9 = sphi %s420_s9, %s470_s9  }
   0x3   : > { %p26_p1 = scmp.ge.s32.totalorder %s24_s12, 2  ;;  %p148_p2 = scmp.lt.s32.totalorder %s403_s11, 3 }
   0x5   : > { %s473_s12 = smov (%p26_p1, %s24_s12), 0  ;;  %p149_p3 = pnand %p346_p0, %p148_p2 }
   0x6   : > { %s347_s13 = sshll.u32 (!%p149_p3), %s395_s9, 1 }
   0x7   : > { %152 = sbr.rel (%p149_p3) target bundleno = 75 (0x4b), region = 28  ;;  %p185_p4 = scmp.lt.s32.totalorder (!%p149_p3), %s347_s13, 3 }
   0xc   : > { %s475_s13 = smov (!%p185_p4, %s347_s13), 3  ;;  %vm213_vm0 = vcmask 261120  }
   0xd   : > { %s438_s14 = sshll.u32 %s475_s13, 3 }
   0xe   : > { %s191_s17 = scalar_lea.vmem %s467_s0, %s438_s14  ;;  %s200_s20 = scalar_lea.vmem %s468_s1, %s438_s14 }
   0xf   : > { %v211_v0 = vld [vmem:[%s191_s17] sm:$0xff]  ;;  %v212_v1 = vld [vmem:[%s191_s17 + $0x8] sm:$0xff]  ;;  %s209_s23 = scalar_lea.vmem %s469_s2, %s438_s14 }
  0x10   : > { %v214_v2 = vsel %vm213_vm0, %v211_v0, 0.0  ;;  %v215_v3 = vsel %vm213_vm0, %v212_v1, 0.0  ;;  %v243_v28 = vld [vmem:[%s200_s20] sm:$0xff]  ;;  %v244_v29 = vld [vmem:[%s200_s20 + $0x8] sm:$0xff] }
  0x11   : > { %v216_v4 = vadd.f32 %v215_v3, %v214_v2 }
  0x13   : > { %v217_v5 = vrot.slane %v216_v4, 4 }
  0x15   : > { %v218_v6 = vadd.f32 %v217_v5, %v216_v4 }
  0x17   : > { %v219_v7 = vrot.slane %v218_v6, 2 }
  0x19   : > { %v220_v8 = vadd.f32 %v219_v7, %v218_v6 }
  0x1b   : > { %v221_v9 = vrot.slane %v220_v8, 1 }
  0x1d   : > { %v222_v10 = vadd.f32 %v221_v9, %v220_v8 }
  0x1f   : > { %v224_v11 = vmul.f32 0.0625, %v222_v10 }
  0x21   : > { %v225_v12 = vsub.f32 %v211_v0, %v224_v11  ;;  %v226_v13 = vsub.f32 %v212_v1, %v224_v11 }
  0x23   : > { %v227_v14 = vmul.f32 %v225_v12, %v225_v12  ;;  %v228_v15 = vmul.f32 %v226_v13, %v226_v13 }
  0x25   : > { %v229_v16 = vsel %vm213_vm0, %v227_v14, 0.0  ;;  %v230_v17 = vsel %vm213_vm0, %v228_v15, 0.0 }
  0x26   : > { %v231_v18 = vadd.f32 %v230_v17, %v229_v16 }
  0x28   : > { %v232_v19 = vrot.slane %v231_v18, 4 }
  0x2a   : > { %v233_v20 = vadd.f32 %v232_v19, %v231_v18 }
  0x2c   : > { %v234_v21 = vrot.slane %v233_v20, 2 }
  0x2e   : > { %v235_v22 = vadd.f32 %v234_v21, %v233_v20 }
  0x30   : > { %v236_v23 = vrot.slane %v235_v22, 1 }
  0x32   : > { %v237_v24 = vadd.f32 %v236_v23, %v235_v22 }
  0x34   : > { %v238_v25 = vmul.f32 0.0625, %v237_v24 }
  0x36   : > { %v239_v26 = vadd.f32 1e-05, %v238_v25 }
  0x38   : > { %379 = vrsqrt.f32 %v239_v26 }
  0x45   : > { %v380_v27 = vpop.eup %379 }
  0x46   : > { %v241_v30 = vmul.f32 %v380_v27, %v225_v12  ;;  %v242_v31 = vmul.f32 %v380_v27, %v226_v13 }
  0x48   : > { %v245_v32 = vadd.f32 %v243_v28, %v241_v30  ;;  %v246_v33 = vadd.f32 %v244_v29, %v242_v31 }
  0x4a   : > { %247 = vst.msk [vmem:[%s209_s23] sm:$0xff] %vm213_vm0, %v245_v32  ;;  %248 = vst.msk [vmem:[%s209_s23 + $0x8] sm:$0xff] %vm213_vm0, %v246_v33 }
  0x4b PF: > { %s12_s11 = sadd.s32 1, %s403_s11   ;;  %s470_s9 = smov %s399_s10 }
  0x4c   : > { %p9_p5 = scmp.ge.s32.totalorder %s12_s11, 4   ;;  %s471_s10 = smov %s473_s12 }
  0x4e   :  { %11 = sbr.rel (!%p9_p5) target bundleno = 2 (0x2), region = 61 }

// kernel: define_g_forward.41
= control target key start
LH: loop header
LB: loop body
LE: loop exit
PB: predicated region body
PF: predicated region fallthrough
CT: control target
= control target key end

     0   :  { %s637_s1 = inlined_call_operand.vmem [shape: bf16[384,128], index: 1, kind: input, shape index: {}]   ;;  %s638_s0 = inlined_call_operand.vmem [shape: bf16[32,384], index: 0, kind: input, shape index: {}]   ;;  %s639_s2 = inlined_call_operand.vmem [shape: f32[1,128], index: 2, kind: input, shape index: {}]   ;;  %s640_s3 = inlined_call_operand.vmem [shape: f32[32,128], index: 3, kind: output, shape index: {}]  }
   0x1   :  { %v480_v0 = vld [vmem:[%s637_s1 + $0x78] sm:$0xff]   ;;  %v483_v3 = vld [vmem:[%s637_s1 + $0x70] sm:$0xff]   ;;  %v486_v6 = vld [vmem:[%s637_s1 + $0x68] sm:$0xff]  }
   0x2   :  { %v481_v1 = vld [vmem:[%s637_s1 + $0x38] sm:$0xff]   ;;  %422 = vmatprep.subr.bf16.mxu0 %v480_v0  ;;  %v484_v4 = vld [vmem:[%s637_s1 + $0x30] sm:$0xff]   ;;  %v487_v7 = vld [vmem:[%s637_s1 + $0x28] sm:$0xff]  }
   0x3   :  { %v482_v2 = vld [vmem:[%s637_s1 + $0xb8] sm:$0xff]   ;;  %423 = vmatpush3.bf16.msra.mxu0 %v481_v1  ;;  %v485_v5 = vld [vmem:[%s637_s1 + $0xb0] sm:$0xff]   ;;  %v488_v8 = vld [vmem:[%s637_s1 + $0xa8] sm:$0xff]  }
   0x4   :  { %460 = vmatprep.subr.bf16.mxu1 %v482_v2  ;;  %424 = vmatprep.subr.bf16.mxu0 %v483_v3  ;;  %v489_v9 = vld [vmem:[%s637_s1 + $0x60] sm:$0xff]   ;;  %v492_v12 = vld [vmem:[%s637_s1 + $0x58] sm:$0xff]   ;;  %v495_v15 = vld [vmem:[%s637_s1 + $0x50] sm:$0xff]  }
   0x5   :  { %461 = vmatpush3.bf16.msra.mxu1 %v482_v2  ;;  %v490_v10 = vld [vmem:[%s637_s1 + $0x20] sm:$0xff]   ;;  %v494_v13 = vld [vmem:[%s637_s1 + $0x98] sm:$0xff]   ;;  %v497_v16 = vld [vmem:[%s637_s1 + $0x90] sm:$0xff]  }
   0x6   :  { %462 = vmatprep.subr.bf16.mxu1 %v485_v5  ;;  %v491_v11 = vld [vmem:[%s637_s1 + $0xa0] sm:$0xff]   ;;  %v493_v14 = vld [vmem:[%s637_s1 + $0x18] sm:$0xff]   ;;  %v496_v17 = vld [vmem:[%s637_s1 + $0x10] sm:$0xff]  }
   0x7   :  { %425 = vmatpush3.bf16.msra.mxu0 %v484_v4  ;;  %v498_v18 = vld [vmem:[%s637_s1 + $0x48] sm:$0xff]   ;;  %v501_v21 = vld [vmem:[%s637_s1 + $0x40] sm:$0xff]  }
   0x8   :  { %426 = vmatprep.subr.bf16.mxu0 %v486_v6  ;;  %v499_v19 = vld [vmem:[%s637_s1 + $0x8] sm:$0xff]   ;;  %v503_v22 = vld [vmem:[%s637_s1 + $0x80] sm:$0xff]  }
   0x9   :  { %463 = vmatpush3.bf16.msra.mxu1 %v485_v5  ;;  %v500_v20 = vld [vmem:[%s637_s1 + $0x88] sm:$0xff]   ;;  %v506_v23 = vld [vmem:[%s638_s0 + $0x4] ss:$12 sps:$4 sm:$0xff]   ;;  %v421_v36 = vld [vmem:[%s639_s2] ss:$0 sm:$0xff] }
   0xa   :  { %464 = vmatprep.subr.bf16.mxu1 %v488_v8  ;;  %v507_v24 = vld [vmem:[%s638_s0 + $0x8] ss:$12 sps:$4 sm:$0xff]   ;;  %v502_v25 = vld [vmem:[%s637_s1] sm:$0xff]   ;;  %291 = vmatprep.mubr.bf16.mxu0 %v506_v23 }
   0xb   :  { %427 = vmatpush3.bf16.msra.mxu0 %v487_v7  ;;  %476 = vmatprep.mubr.bf16.mxu1 %v507_v24  ;;  %v504_v26 = vld [vmem:[%s638_s0] ss:$12 sps:$4 sm:$0xff]   ;;  %v509_v27 = vld [vmem:[%s638_s0 + $0x1c] ss:$12 sps:$4 sm:$0xff]   ;;  %v511_v29 = vld [vmem:[%s638_s0 + $0x18] ss:$12 sps:$4 sm:$0xff]  }
   0xc   :  { %428 = vmatprep.subr.bf16.mxu0 %v489_v9  ;;  %v508_v28 = vld [vmem:[%s638_s0 + $0x20] ss:$12 sps:$4 sm:$0xff]  }
   0xd   :  { %465 = vmatpush3.bf16.msra.mxu1 %v488_v8 }
   0xe   :  { %466 = vmatprep.subr.bf16.mxu1 %v491_v11 }
   0xf   :  { %429 = vmatpush3.bf16.msra.mxu0 %v490_v10 }
  0x10   :  { %430 = vmatprep.subr.bf16.mxu0 %v492_v12 }
  0x11   :  { %467 = vmatpush3.bf16.msra.mxu1 %v491_v11 }
  0x12   :  { %468 = vmatprep.subr.bf16.mxu1 %v494_v13 }
  0x13   :  { %431 = vmatpush3.bf16.msra.mxu0 %v493_v14 }
  0x14   :  { %432 = vmatprep.subr.bf16.mxu0 %v495_v15 }
  0x15   :  { %469 = vmatpush3.bf16.msra.mxu1 %v494_v13 }
  0x16   :  { %470 = vmatprep.subr.bf16.mxu1 %v497_v16 }
  0x17   :  { %433 = vmatpush3.bf16.msra.mxu0 %v496_v17 }
  0x18   :  { %434 = vmatprep.subr.bf16.mxu0 %v498_v18 }
  0x19   :  { %471 = vmatpush3.bf16.msra.mxu1 %v497_v16 }
  0x1a   :  { %472 = vmatprep.subr.bf16.mxu1 %v500_v20 }
  0x1b   :  { %435 = vmatpush3.bf16.msra.mxu0 %v499_v19 }
  0x1c   :  { %436 = vmatprep.subr.bf16.mxu0 %v501_v21 }
  0x1d   :  { %473 = vmatpush3.bf16.msra.mxu1 %v500_v20 }
  0x1e   :  { %474 = vmatprep.subr.bf16.mxu1 %v503_v22 }
  0x1f   :  { %437 = vmatpush3.bf16.msra.mxu0 %v502_v25 }
  0x21   :  { %475 = vmatpush3.bf16.msra.mxu1 %v503_v22 }
  0x22   :  { %292 = vmatmul.mubr.bf16.vlgmr.msra.gmra.mxu0 %v504_v26 }
  0x23   :  { %299 = vmatprep.mubr.bf16.mxu0 %v509_v27 }
  0x24   :  { %477 = vmatmul.mubr.bf16.vlgmr.msra.gmra.mxu1 %v508_v28 }
  0x2a   :  { %300 = vmatmul.mubr.bf16.gmra.mxu0 %v511_v29 }
  0xe2   :  { %v438_v30 = vpop.f32.mrf.mxu0 }
  0xe4   :  { %v439_v31 = vpop.f32.mrf.mxu0  ;;  %v478_v32 = vpop.f32.mrf.mxu1 }
  0xe5   :  { %v440_v33 = vadd.f32 %v439_v31, %v438_v30 }
  0xe6   :  { %v441_v34 = vpop.f32.mrf.mxu0  ;;  %v342_v35 = vpop.f32.mrf.mxu1 }
  0xe7   :  { %v343_v37 = vadd.f32 %v440_v33, %v342_v35 }
  0xe8   :  { %v442_v38 = vpop.f32.mrf.mxu0  ;;  %v479_v39 = vpop.f32.mrf.mxu1 }
  0xe9   :  { %v379_v40 = vadd.f32 %v421_v36, %v343_v37  ;;  %v443_v41 = vadd.f32 %v442_v38, %v441_v34 }
  0xea   :  { %v444_v42 = vpop.f32.mrf.mxu0  ;;  %v345_v43 = vpop.f32.mrf.mxu1 }
  0xeb   :  { %383 = vst [vmem:[%s640_s3] sm:$0xff] %v379_v40  ;;  %v346_v44 = vadd.f32 %v443_v41, %v345_v43 }
  0xec   :  { %v445_v45 = vpop.f32.mrf.mxu0 }
  0xed   :  { %v380_v46 = vadd.f32 %v421_v36, %v346_v44  ;;  %v446_v47 = vadd.f32 %v445_v45, %v444_v42 }
  0xee   :  { %v447_v48 = vpop.f32.mrf.mxu0 }
  0xef   :  { %384 = vst [vmem:[%s640_s3 + $0x8] sm:$0xff] %v380_v46  ;;  %v351_v49 = vadd.f32 %v478_v32, %v446_v47 }
  0xf0   :  { %v448_v50 = vpop.f32.mrf.mxu0 }
  0xf1   :  { %v381_v51 = vadd.f32 %v421_v36, %v351_v49  ;;  %v449_v52 = vadd.f32 %v448_v50, %v447_v48 }
  0xf3   :  { %385 = vst [vmem:[%s640_s3 + $0x10] sm:$0xff] %v381_v51  ;;  %v354_v53 = vadd.f32 %v479_v39, %v449_v52 }
  0xf5   :  { %v382_v54 = vadd.f32 %v421_v36, %v354_v53 }
  0xf7   :  { %386 = vst [vmem:[%s640_s3 + $0x18] sm:$0xff] %v382_v54 }

// kernel: define_g_forward.65
= control target key start
LH: loop header
LB: loop body
LE: loop exit
PB: predicated region body
PF: predicated region fallthrough
CT: control target
= control target key end

     0   :  { %s306_s1 = inlined_call_operand.vmem [shape: bf16[128,128], index: 1, kind: input, shape index: {}]   ;;  %s307_s0 = inlined_call_operand.vmem [shape: bf16[32,128], index: 0, kind: input, shape index: {}]   ;;  %s308_s2 = inlined_call_operand.vmem [shape: f32[1,128], index: 2, kind: input, shape index: {}]   ;;  %s309_s3 = inlined_call_operand.vmem [shape: f32[32,128], index: 3, kind: output, shape index: {}]  }
   0x1   :  { %v231_v0 = vld [vmem:[%s306_s1 + $0x38] sm:$0xff]   ;;  %v232_v1 = vld [vmem:[%s306_s1 + $0x30] sm:$0xff]   ;;  %v233_v2 = vld [vmem:[%s306_s1 + $0x28] sm:$0xff]  }
   0x2   :  { %211 = vmatprep.subr.bf16.mxu0 %v231_v0  ;;  %v234_v3 = vld [vmem:[%s306_s1 + $0x20] sm:$0xff]   ;;  %v235_v5 = vld [vmem:[%s306_s1 + $0x18] sm:$0xff]   ;;  %v236_v6 = vld [vmem:[%s306_s1 + $0x10] sm:$0xff]  }
   0x3   :  { %212 = vmatpush3.bf16.msra.mxu0 %v231_v0  ;;  %v239_v4 = vld [vmem:[%s307_s0] sm:$0xff]   ;;  %v237_v7 = vld [vmem:[%s306_s1 + $0x8] sm:$0xff]  }
   0x4   :  { %213 = vmatprep.subr.bf16.mxu0 %v232_v1  ;;  %227 = vmatprep.mubr.bf16.mxu0 %v239_v4  ;;  %v238_v8 = vld [vmem:[%s306_s1] sm:$0xff]   ;;  %v240_v9 = vld [vmem:[%s307_s0 + $0x8] sm:$0xff]  }
   0x5   :  { %v200_v10 = vld [vmem:[%s308_s2] ss:$0 sm:$0xff] }
   0x7   :  { %214 = vmatpush3.bf16.msra.mxu0 %v232_v1 }
   0x8   :  { %215 = vmatprep.subr.bf16.mxu0 %v233_v2 }
   0xb   :  { %216 = vmatpush3.bf16.msra.mxu0 %v233_v2 }
   0xc   :  { %217 = vmatprep.subr.bf16.mxu0 %v234_v3 }
   0xf   :  { %218 = vmatpush3.bf16.msra.mxu0 %v234_v3 }
  0x10   :  { %219 = vmatprep.subr.bf16.mxu0 %v235_v5 }
  0x13   :  { %220 = vmatpush3.bf16.msra.mxu0 %v235_v5 }
  0x14   :  { %221 = vmatprep.subr.bf16.mxu0 %v236_v6 }
  0x17   :  { %222 = vmatpush3.bf16.msra.mxu0 %v236_v6 }
  0x18   :  { %223 = vmatprep.subr.bf16.mxu0 %v237_v7 }
  0x1b   :  { %224 = vmatpush3.bf16.msra.mxu0 %v237_v7 }
  0x1c   :  { %225 = vmatprep.subr.bf16.mxu0 %v238_v8 }
  0x1f   :  { %226 = vmatpush3.bf16.msra.mxu0 %v238_v8 }
  0x22   :  { %228 = vmatmul.mubr.bf16.vlgmr.msra.gmra.mxu0 %v240_v9 }
  0xe2   :  { %v229_v11 = vpop.f32.mrf.mxu0 }
  0xe3   :  { %v180_v12 = vadd.f32 %v229_v11, %v200_v10 }
  0xe4   :  { %v141_v13 = vpop.f32.mrf.mxu0 }
  0xe5   :  { %184 = vst [vmem:[%s309_s3 + $0x10] sm:$0xff] %v180_v12  ;;  %v178_v14 = vadd.f32 %v200_v10, %v141_v13 }
  0xe6   :  { %v230_v15 = vpop.f32.mrf.mxu0 }
  0xe7   :  { %182 = vst [vmem:[%s309_s3] sm:$0xff] %v178_v14  ;;  %v181_v16 = vadd.f32 %v230_v15, %v200_v10 }
  0xe8   :  { %v144_v17 = vpop.f32.mrf.mxu0 }
  0xe9   :  { %185 = vst [vmem:[%s309_s3 + $0x18] sm:$0xff] %v181_v16  ;;  %v179_v18 = vadd.f32 %v200_v10, %v144_v17 }
  0xeb   :  { %183 = vst [vmem:[%s309_s3 + $0x8] sm:$0xff] %v179_v18 }

// kernel: define_g_forward.69
= control target key start
LH: loop header
LB: loop body
LE: loop exit
PB: predicated region body
PF: predicated region fallthrough
CT: control target
= control target key end

     0   :  { %s2210_s12 = smov 0   ;;  %s2212_s13 = smov 0   ;;  %s2483_s0 = inlined_call_operand.vmem [shape: bf16[512,512], index: 0, kind: input, shape index: {}]   ;;  %s2484_s1 = inlined_call_operand.vmem [shape: bf16[512,128], index: 1, kind: input, shape index: {}]   ;;  %s2485_s2 = inlined_call_operand.vmem [shape: f32[1,128], index: 2, kind: input, shape index: {}]   ;;  %s2486_s3 = inlined_call_operand.vmem [shape: f32[512,128], index: 3, kind: output, shape index: {}]  }
   0x1   :  { %s2214_s14 = smov 0  }
   0x2 LB: > { %s32_s15 = sadd.s32 1, %s2184_s13  ;;  %p1620_p0 = scmp.ge.s32.totalorder %s2188_s14, 1  ;;  %s2188_s14 = sphi %s2214_s14, %s13_s14   ;;  %s2184_s13 = sphi %s2212_s13, %s2488_s13   ;;  %s2180_s12 = sphi %s2210_s12, %s2487_s12  }
   0x3   : > { %p34_p1 = scmp.ge.s32.totalorder %s32_s15, 2  ;;  %p191_p2 = scmp.lt.s32.totalorder %s2188_s14, 3 }
   0x5   : > { %s2490_s15 = smov (%p34_p1, %s32_s15), 0  ;;  %p192_p3 = pnand %p1620_p0, %p191_p2 }
   0x6   : > { %s1621_s25 = sshll.u32 (!%p192_p3), %s2180_s12, 5 }
   0x7   : > { %195 = sbr.rel (%p192_p3) target bundleno = 387 (0x183), region = 32  ;;  %p236_p4 = scmp.lt.s32.totalorder (!%p192_p3), %s1621_s25, 63 }
   0xc   : > { %v1974_v0 = vld [vmem:[%s2484_s1 + $0x78] sm:$0xff]   ;;  %v1978_v4 = vld [vmem:[%s2484_s1 + $0x70] sm:$0xff]   ;;  %v1982_v8 = vld [vmem:[%s2484_s1 + $0x68] sm:$0xff]   ;;  %s2492_s25 = smov (!%p236_p4, %s1621_s25), 63 }
   0xd   : > { %v1975_v1 = vld [vmem:[%s2484_s1 + $0xf8] sm:$0xff]   ;;  %1726 = vmatprep.subr.bf16.mxu0 %v1974_v0  ;;  %v1979_v5 = vld [vmem:[%s2484_s1 + $0xf0] sm:$0xff]   ;;  %v1983_v9 = vld [vmem:[%s2484_s1 + $0xe8] sm:$0xff]   ;;  %s1725_s24 = sshll.u32 %s2492_s25, 4  ;;  %s1625_s17 = sshll.u32 %s2492_s25, 3 }
   0xe   : > { %v1976_v2 = vld [vmem:[%s2484_s1 + $0x38] sm:$0xff]   ;;  %1838 = vmatprep.subr.bf16.mxu1 %v1975_v1  ;;  %v1980_v6 = vld [vmem:[%s2484_s1 + $0x30] sm:$0xff]   ;;  %v1984_v10 = vld [vmem:[%s2484_s1 + $0x28] sm:$0xff]   ;;  %s2327_s12 = scalar_lea.vmem %s2483_s0, %s1725_s24  ;;  %s2412_s20 = scalar_lea.vmem %s2486_s3, %s1625_s17 }
   0xf   : > { %v1977_v3 = vld [vmem:[%s2484_s1 + $0xb8] sm:$0xff]   ;;  %1727 = vmatpush3.bf16.msra.mxu0 %v1976_v2  ;;  %v1981_v7 = vld [vmem:[%s2484_s1 + $0xb0] sm:$0xff]   ;;  %v1985_v11 = vld [vmem:[%s2484_s1 + $0xa8] sm:$0xff]  }
  0x10   : > { %1839 = vmatpush3.bf16.msra.mxu1 %v1977_v3  ;;  %1728 = vmatprep.subr.bf16.mxu0 %v1978_v4  ;;  %v1986_v12 = vld [vmem:[%s2484_s1 + $0x60] sm:$0xff]   ;;  %v1990_v16 = vld [vmem:[%s2484_s1 + $0x58] sm:$0xff]   ;;  %v1994_v20 = vld [vmem:[%s2484_s1 + $0x50] sm:$0xff]  }
  0x11   : > { %1840 = vmatprep.subr.bf16.mxu1 %v1979_v5  ;;  %v1987_v13 = vld [vmem:[%s2484_s1 + $0xe0] sm:$0xff]   ;;  %v1991_v17 = vld [vmem:[%s2484_s1 + $0xd8] sm:$0xff]   ;;  %v1995_v21 = vld [vmem:[%s2484_s1 + $0xd0] sm:$0xff]  }
  0x12   : > { %v1988_v14 = vld [vmem:[%s2484_s1 + $0x20] sm:$0xff]   ;;  %v1992_v18 = vld [vmem:[%s2484_s1 + $0x18] sm:$0xff]   ;;  %v1996_v22 = vld [vmem:[%s2484_s1 + $0x10] sm:$0xff]  }
  0x13   : > { %1729 = vmatpush3.bf16.msra.mxu0 %v1980_v6  ;;  %v1989_v15 = vld [vmem:[%s2484_s1 + $0xa0] sm:$0xff]   ;;  %v1993_v19 = vld [vmem:[%s2484_s1 + $0x98] sm:$0xff]   ;;  %v1997_v23 = vld [vmem:[%s2484_s1 + $0x90] sm:$0xff]  }
  0x14   : > { %1841 = vmatpush3.bf16.msra.mxu1 %v1981_v7  ;;  %1730 = vmatprep.subr.bf16.mxu0 %v1982_v8  ;;  %v1998_v24 = vld [vmem:[%s2484_s1 + $0x48] sm:$0xff]   ;;  %v2002_v28 = vld [vmem:[%s2484_s1 + $0x40] sm:$0xff]  }
  0x15   : > { %1842 = vmatprep.subr.bf16.mxu1 %v1983_v9  ;;  %v1999_v25 = vld [vmem:[%s2484_s1 + $0xc8] sm:$0xff]   ;;  %v2003_v29 = vld [vmem:[%s2484_s1 + $0xc0] sm:$0xff]  }
  0x16   : > { %v2000_v26 = vld [vmem:[%s2484_s1 + $0x8] sm:$0xff]   ;;  %v2004_v30 = vld [vmem:[%s2484_s1] sm:$0xff]  }
  0x17   : > { %1731 = vmatpush3.bf16.msra.mxu0 %v1984_v10  ;;  %v2001_v27 = vld [vmem:[%s2484_s1 + $0x88] sm:$0xff]   ;;  %v2005_v31 = vld [vmem:[%s2484_s1 + $0x80] sm:$0xff]  }
  0x18   : > { %1843 = vmatpush3.bf16.msra.mxu1 %v1985_v11  ;;  %1732 = vmatprep.subr.bf16.mxu0 %v1986_v12  ;;  %v2006_v32 = vld [vmem:[%s2327_s12] ss:$16 sps:$4 sm:$0xff]   ;;  %v2008_v33 = vld [vmem:[%s2327_s12 + $0x4] ss:$16 sps:$4 sm:$0xff]   ;;  %v2009_v34 = vld [vmem:[%s2327_s12 + $0x8] ss:$16 sps:$4 sm:$0xff]  }
  0x19   : > { %1844 = vmatprep.subr.bf16.mxu1 %v1987_v13  ;;  %v2011_v35 = vld [vmem:[%s2327_s12 + $0xc] ss:$16 sps:$4 sm:$0xff]   ;;  %1008 = vmatprep.mubr.bf16.mxu0 %v2008_v33  ;;  %v2012_v36 = vld [vmem:[%s2327_s12 + $0x24] ss:$16 sps:$4 sm:$0xff]   ;;  %v2016_v38 = vld [vmem:[%s2327_s12 + $0x20] ss:$16 sps:$4 sm:$0xff]  }
  0x1a   : > { %1169 = vmatprep.mubr.bf16.mxu1 %v2011_v35  ;;  %v2014_v37 = vld [vmem:[%s2327_s12 + $0x2c] ss:$16 sps:$4 sm:$0xff]   ;;  %v2017_v39 = vld [vmem:[%s2327_s12 + $0x28] ss:$16 sps:$4 sm:$0xff]   ;;  %v2018_v40 = vld [vmem:[%s2327_s12 + $0x44] ss:$16 sps:$4 sm:$0xff]  }
  0x1b   : > { %1733 = vmatpush3.bf16.msra.mxu0 %v1988_v14  ;;  %v2020_v41 = vld [vmem:[%s2327_s12 + $0x4c] ss:$16 sps:$4 sm:$0xff]   ;;  %v2022_v42 = vld [vmem:[%s2327_s12 + $0x40] ss:$16 sps:$4 sm:$0xff]   ;;  %v2023_v43 = vld [vmem:[%s2327_s12 + $0x48] ss:$16 sps:$4 sm:$0xff]  }
  0x1c   : > { %1845 = vmatpush3.bf16.msra.mxu1 %v1989_v15  ;;  %1734 = vmatprep.subr.bf16.mxu0 %v1990_v16  ;;  %v2024_v44 = vld [vmem:[%s2327_s12 + $0x64] ss:$16 sps:$4 sm:$0xff]   ;;  %v2026_v45 = vld [vmem:[%s2327_s12 + $0x6c] ss:$16 sps:$4 sm:$0xff]   ;;  %v2028_v46 = vld [vmem:[%s2327_s12 + $0x60] ss:$16 sps:$4 sm:$0xff]  }
  0x1d   : > { %1846 = vmatprep.subr.bf16.mxu1 %v1991_v17  ;;  %v2029_v47 = vld [vmem:[%s2327_s12 + $0x68] ss:$16 sps:$4 sm:$0xff]   ;;  %v2030_v48 = vld [vmem:[%s2327_s12 + $0x84] ss:$16 sps:$4 sm:$0xff]   ;;  %v2032_v49 = vld [vmem:[%s2327_s12 + $0x8c] ss:$16 sps:$4 sm:$0xff]  }
  0x1e   : > { %v2034_v50 = vld [vmem:[%s2327_s12 + $0x80] ss:$16 sps:$4 sm:$0xff]   ;;  %v2035_v51 = vld [vmem:[%s2327_s12 + $0x88] ss:$16 sps:$4 sm:$0xff]   ;;  %v2036_v52 = vld [vmem:[%s2327_s12 + $0xa4] ss:$16 sps:$4 sm:$0xff]  }
  0x1f   : > { %1735 = vmatpush3.bf16.msra.mxu0 %v1992_v18  ;;  %v2038_v53 = vld [vmem:[%s2327_s12 + $0xac] ss:$16 sps:$4 sm:$0xff]   ;;  %v2040_v54 = vld [vmem:[%s2327_s12 + $0xa0] ss:$16 sps:$4 sm:$0xff]   ;;  %v2041_v55 = vld [vmem:[%s2327_s12 + $0xa8] ss:$16 sps:$4 sm:$0xff]  }
  0x20   : > { %1847 = vmatpush3.bf16.msra.mxu1 %v1993_v19  ;;  %1736 = vmatprep.subr.bf16.mxu0 %v1994_v20  ;;  %v2042_v56 = vld [vmem:[%s2327_s12 + $0xc4] ss:$16 sps:$4 sm:$0xff]   ;;  %v2044_v57 = vld [vmem:[%s2327_s12 + $0xcc] ss:$16 sps:$4 sm:$0xff]   ;;  %v2046_v58 = vld [vmem:[%s2327_s12 + $0xc0] ss:$16 sps:$4 sm:$0xff]  }
  0x21   : > { %1848 = vmatprep.subr.bf16.mxu1 %v1995_v21  ;;  %v2047_v59 = vld [vmem:[%s2327_s12 + $0xc8] ss:$16 sps:$4 sm:$0xff]   ;;  %v2048_v60 = vld [vmem:[%s2327_s12 + $0xe4] ss:$16 sps:$4 sm:$0xff]   ;;  %v2050_v61 = vld [vmem:[%s2327_s12 + $0xec] ss:$16 sps:$4 sm:$0xff]  }
  0x22   : > { %v2052_v62 = vld [vmem:[%s2327_s12 + $0xe0] ss:$16 sps:$4 sm:$0xff]   ;;  %v2053_v63 = vld [vmem:[%s2327_s12 + $0xe8] ss:$16 sps:$4 sm:$0xff]   ;;  %v2054_v0 = vld [vmem:[%s2327_s12 + $0x104] ss:$16 sps:$4 sm:$0xff]  }
  0x23   : > { %1737 = vmatpush3.bf16.msra.mxu0 %v1996_v22  ;;  %v2056_v1 = vld [vmem:[%s2327_s12 + $0x10c] ss:$16 sps:$4 sm:$0xff]   ;;  %v2058_v2 = vld [vmem:[%s2327_s12 + $0x100] ss:$16 sps:$4 sm:$0xff]   ;;  %v2059_v3 = vld [vmem:[%s2327_s12 + $0x108] ss:$16 sps:$4 sm:$0xff]  }
  0x24   : > { %1849 = vmatpush3.bf16.msra.mxu1 %v1997_v23  ;;  %1738 = vmatprep.subr.bf16.mxu0 %v1998_v24  ;;  %v2060_v4 = vld [vmem:[%s2327_s12 + $0x124] ss:$16 sps:$4 sm:$0xff]   ;;  %v2062_v5 = vld [vmem:[%s2327_s12 + $0x12c] ss:$16 sps:$4 sm:$0xff]   ;;  %v2064_v6 = vld [vmem:[%s2327_s12 + $0x120] ss:$16 sps:$4 sm:$0xff]  }
  0x25   : > { %1850 = vmatprep.subr.bf16.mxu1 %v1999_v25  ;;  %v2065_v7 = vld [vmem:[%s2327_s12 + $0x128] ss:$16 sps:$4 sm:$0xff]   ;;  %v2066_v8 = vld [vmem:[%s2327_s12 + $0x144] ss:$16 sps:$4 sm:$0xff]   ;;  %v2068_v9 = vld [vmem:[%s2327_s12 + $0x14c] ss:$16 sps:$4 sm:$0xff]  }
  0x26   : > { %v2070_v10 = vld [vmem:[%s2327_s12 + $0x140] ss:$16 sps:$4 sm:$0xff]   ;;  %v2071_v11 = vld [vmem:[%s2327_s12 + $0x148] ss:$16 sps:$4 sm:$0xff]   ;;  %v2072_v12 = vld [vmem:[%s2327_s12 + $0x164] ss:$16 sps:$4 sm:$0xff]  }
  0x27   : > { %1739 = vmatpush3.bf16.msra.mxu0 %v2000_v26  ;;  %v2074_v13 = vld [vmem:[%s2327_s12 + $0x16c] ss:$16 sps:$4 sm:$0xff]   ;;  %v2076_v14 = vld [vmem:[%s2327_s12 + $0x160] ss:$16 sps:$4 sm:$0xff]   ;;  %v2077_v15 = vld [vmem:[%s2327_s12 + $0x168] ss:$16 sps:$4 sm:$0xff]  }
  0x28   : > { %1851 = vmatpush3.bf16.msra.mxu1 %v2001_v27  ;;  %1740 = vmatprep.subr.bf16.mxu0 %v2002_v28  ;;  %v2078_v16 = vld [vmem:[%s2327_s12 + $0x184] ss:$16 sps:$4 sm:$0xff]   ;;  %v2080_v17 = vld [vmem:[%s2327_s12 + $0x18c] ss:$16 sps:$4 sm:$0xff]   ;;  %v2082_v18 = vld [vmem:[%s2327_s12 + $0x180] ss:$16 sps:$4 sm:$0xff]  }
  0x29   : > { %1852 = vmatprep.subr.bf16.mxu1 %v2003_v29  ;;  %v2083_v19 = vld [vmem:[%s2327_s12 + $0x188] ss:$16 sps:$4 sm:$0xff]   ;;  %v2084_v20 = vld [vmem:[%s2327_s12 + $0x1a4] ss:$16 sps:$4 sm:$0xff]   ;;  %v2086_v21 = vld [vmem:[%s2327_s12 + $0x1ac] ss:$16 sps:$4 sm:$0xff]  }
  0x2a   : > { %v2088_v22 = vld [vmem:[%s2327_s12 + $0x1a0] ss:$16 sps:$4 sm:$0xff]   ;;  %v2089_v23 = vld [vmem:[%s2327_s12 + $0x1a8] ss:$16 sps:$4 sm:$0xff]   ;;  %v2090_v24 = vld [vmem:[%s2327_s12 + $0x1c4] ss:$16 sps:$4 sm:$0xff]  }
  0x2b   : > { %1741 = vmatpush3.bf16.msra.mxu0 %v2004_v30  ;;  %v2092_v25 = vld [vmem:[%s2327_s12 + $0x1cc] ss:$16 sps:$4 sm:$0xff]   ;;  %v2094_v26 = vld [vmem:[%s2327_s12 + $0x1c0] ss:$16 sps:$4 sm:$0xff]   ;;  %v2095_v27 = vld [vmem:[%s2327_s12 + $0x1c8] ss:$16 sps:$4 sm:$0xff]  }
  0x2c   : > { %1853 = vmatpush3.bf16.msra.mxu1 %v2005_v31  ;;  %v2096_v28 = vld [vmem:[%s2327_s12 + $0x1e4] ss:$16 sps:$4 sm:$0xff]   ;;  %v2098_v29 = vld [vmem:[%s2327_s12 + $0x1ec] ss:$16 sps:$4 sm:$0xff]   ;;  %v2100_v30 = vld [vmem:[%s2327_s12 + $0x1e0] ss:$16 sps:$4 sm:$0xff]  }
  0x2d   : > { %v2101_v31 = vld [vmem:[%s2327_s12 + $0x1e8] ss:$16 sps:$4 sm:$0xff]  }
  0x2e   : > { %1009 = vmatmul.mubr.bf16.vlgmr.msra.gmra.mxu0 %v2006_v32 }
  0x2f   : > { %1170 = vmatmul.mubr.bf16.vlgmr.msra.gmra.mxu1 %v2009_v34  ;;  %1016 = vmatprep.mubr.bf16.mxu0 %v2012_v36 }
  0x30   : > { %1177 = vmatprep.mubr.bf16.mxu1 %v2014_v37 }
  0x36   : > { %1017 = vmatmul.mubr.bf16.gmra.mxu0 %v2016_v38 }
  0x37   : > { %1178 = vmatmul.mubr.bf16.gmra.mxu1 %v2017_v39  ;;  %1024 = vmatprep.mubr.bf16.mxu0 %v2018_v40  ;;  %v2402_v39 = vld [vmem:[%s2485_s2] ss:$0 sm:$0xff] }
  0x38   : > { %1185 = vmatprep.mubr.bf16.mxu1 %v2020_v41 }
  0x3e   : > { %1025 = vmatmul.mubr.bf16.gmra.mxu0 %v2022_v42 }
  0x3f   : > { %1186 = vmatmul.mubr.bf16.gmra.mxu1 %v2023_v43  ;;  %1032 = vmatprep.mubr.bf16.mxu0 %v2024_v44 }
  0x40   : > { %1193 = vmatprep.mubr.bf16.mxu1 %v2026_v45 }
  0x46   : > { %1033 = vmatmul.mubr.bf16.gmra.mxu0 %v2028_v46 }
  0x47   : > { %1194 = vmatmul.mubr.bf16.gmra.mxu1 %v2029_v47  ;;  %1040 = vmatprep.mubr.bf16.mxu0 %v2030_v48 }
  0x48   : > { %1201 = vmatprep.mubr.bf16.mxu1 %v2032_v49 }
  0x4e   : > { %1041 = vmatmul.mubr.bf16.gmra.mxu0 %v2034_v50 }
  0x4f   : > { %1202 = vmatmul.mubr.bf16.gmra.mxu1 %v2035_v51  ;;  %1048 = vmatprep.mubr.bf16.mxu0 %v2036_v52 }
  0x50   : > { %1209 = vmatprep.mubr.bf16.mxu1 %v2038_v53 }
  0x56   : > { %1049 = vmatmul.mubr.bf16.gmra.mxu0 %v2040_v54 }
  0x57   : > { %1210 = vmatmul.mubr.bf16.gmra.mxu1 %v2041_v55  ;;  %1056 = vmatprep.mubr.bf16.mxu0 %v2042_v56 }
  0x58   : > { %1217 = vmatprep.mubr.bf16.mxu1 %v2044_v57 }
  0x5e   : > { %1057 = vmatmul.mubr.bf16.gmra.mxu0 %v2046_v58 }
  0x5f   : > { %1218 = vmatmul.mubr.bf16.gmra.mxu1 %v2047_v59  ;;  %1064 = vmatprep.mubr.bf16.mxu0 %v2048_v60 }
  0x60   : > { %1225 = vmatprep.mubr.bf16.mxu1 %v2050_v61 }
  0x66   : > { %1065 = vmatmul.mubr.bf16.gmra.mxu0 %v2052_v62 }
  0x67   : > { %1226 = vmatmul.mubr.bf16.gmra.mxu1 %v2053_v63  ;;  %1072 = vmatprep.mubr.bf16.mxu0 %v2054_v0 }
  0x68   : > { %1233 = vmatprep.mubr.bf16.mxu1 %v2056_v1 }
  0x6e   : > { %1073 = vmatmul.mubr.bf16.gmra.mxu0 %v2058_v2 }
  0x6f   : > { %1234 = vmatmul.mubr.bf16.gmra.mxu1 %v2059_v3  ;;  %1080 = vmatprep.mubr.bf16.mxu0 %v2060_v4 }
  0x70   : > { %1241 = vmatprep.mubr.bf16.mxu1 %v2062_v5 }
  0x76   : > { %1081 = vmatmul.mubr.bf16.gmra.mxu0 %v2064_v6 }
  0x77   : > { %1242 = vmatmul.mubr.bf16.gmra.mxu1 %v2065_v7  ;;  %1088 = vmatprep.mubr.bf16.mxu0 %v2066_v8 }
  0x78   : > { %1249 = vmatprep.mubr.bf16.mxu1 %v2068_v9 }
  0x7e   : > { %1089 = vmatmul.mubr.bf16.gmra.mxu0 %v2070_v10 }
  0x7f   : > { %1250 = vmatmul.mubr.bf16.gmra.mxu1 %v2071_v11  ;;  %1096 = vmatprep.mubr.bf16.mxu0 %v2072_v12 }
  0x80   : > { %1257 = vmatprep.mubr.bf16.mxu1 %v2074_v13 }
  0x86   : > { %1097 = vmatmul.mubr.bf16.gmra.mxu0 %v2076_v14 }
  0x87   : > { %1258 = vmatmul.mubr.bf16.gmra.mxu1 %v2077_v15  ;;  %1104 = vmatprep.mubr.bf16.mxu0 %v2078_v16 }
  0x88   : > { %1265 = vmatprep.mubr.bf16.mxu1 %v2080_v17 }
  0x8e   : > { %1105 = vmatmul.mubr.bf16.gmra.mxu0 %v2082_v18 }
  0x8f   : > { %1266 = vmatmul.mubr.bf16.gmra.mxu1 %v2083_v19  ;;  %1112 = vmatprep.mubr.bf16.mxu0 %v2084_v20 }
  0x90   : > { %1273 = vmatprep.mubr.bf16.mxu1 %v2086_v21 }
  0x96   : > { %1113 = vmatmul.mubr.bf16.gmra.mxu0 %v2088_v22 }
  0x97   : > { %1274 = vmatmul.mubr.bf16.gmra.mxu1 %v2089_v23  ;;  %1120 = vmatprep.mubr.bf16.mxu0 %v2090_v24 }
  0x98   : > { %1281 = vmatprep.mubr.bf16.mxu1 %v2092_v25 }
  0x9e   : > { %1121 = vmatmul.mubr.bf16.gmra.mxu0 %v2094_v26 }
  0x9f   : > { %1282 = vmatmul.mubr.bf16.gmra.mxu1 %v2095_v27  ;;  %1128 = vmatprep.mubr.bf16.mxu0 %v2096_v28 }
  0xa0   : > { %1289 = vmatprep.mubr.bf16.mxu1 %v2098_v29 }
  0xa6   : > { %1129 = vmatmul.mubr.bf16.gmra.mxu0 %v2100_v30 }
  0xa7   : > { %1290 = vmatmul.mubr.bf16.gmra.mxu1 %v2101_v31 }
  0xee   : > { %v1742_v32 = vpop.f32.mrf.mxu0 }
  0xef   : > { %v1854_v33 = vpop.f32.mrf.mxu1 }
  0xf0   : > { %v1743_v34 = vpop.f32.mrf.mxu0 }
  0xf1   : > { %v1744_v35 = vadd.f32 %v1743_v34, %v1742_v32  ;;  %v1855_v36 = vpop.f32.mrf.mxu1 }
  0xf2   : > { %v1856_v37 = vadd.f32 %v1855_v36, %v1854_v33  ;;  %v1745_v38 = vpop.f32.mrf.mxu0 }
  0xf3   : > { %v1857_v40 = vpop.f32.mrf.mxu1 }
  0xf4   : > { %v1172_v41 = vadd.f32 %v1856_v37, %v1744_v35  ;;  %v1746_v42 = vpop.f32.mrf.mxu0 }
  0xf5   : > { %v1747_v43 = vadd.f32 %v1746_v42, %v1745_v38  ;;  %v1858_v44 = vpop.f32.mrf.mxu1 }
  0xf6   : > { %v1404_v45 = vadd.f32 %v2402_v39, %v1172_v41  ;;  %v1859_v46 = vadd.f32 %v1858_v44, %v1857_v40  ;;  %v1748_v47 = vpop.f32.mrf.mxu0 }
  0xf7   : > { %v1860_v48 = vpop.f32.mrf.mxu1 }
  0xf8   : > { %2102 = vtanh.f32 %v1404_v45  ;;  %v1175_v49 = vadd.f32 %v1859_v46, %v1747_v43  ;;  %v1749_v50 = vpop.f32.mrf.mxu0 }
  0xf9   : > { %v1750_v51 = vadd.f32 %v1749_v50, %v1748_v47  ;;  %v1861_v52 = vpop.f32.mrf.mxu1 }
  0xfa   : > { %v1405_v53 = vadd.f32 %v2402_v39, %v1175_v49  ;;  %v1862_v54 = vadd.f32 %v1861_v52, %v1860_v48  ;;  %v1751_v55 = vpop.f32.mrf.mxu0 }
  0xfb   : > { %v1863_v56 = vpop.f32.mrf.mxu1 }
  0xfc   : > { %2104 = vtanh.f32 %v1405_v53  ;;  %v1180_v57 = vadd.f32 %v1862_v54, %v1750_v51  ;;  %v1752_v58 = vpop.f32.mrf.mxu0 }
  0xfd   : > { %v1753_v59 = vadd.f32 %v1752_v58, %v1751_v55  ;;  %v1864_v60 = vpop.f32.mrf.mxu1 }
  0xfe   : > { %v1406_v61 = vadd.f32 %v2402_v39, %v1180_v57  ;;  %v1865_v62 = vadd.f32 %v1864_v60, %v1863_v56  ;;  %v1754_v63 = vpop.f32.mrf.mxu0 }
  0xff   : > { %v1866_v0 = vpop.f32.mrf.mxu1 }
 0x100   : > { %2106 = vtanh.f32 %v1406_v61  ;;  %v1183_v1 = vadd.f32 %v1865_v62, %v1753_v59  ;;  %v1755_v2 = vpop.f32.mrf.mxu0 }
 0x101   : > { %v1756_v3 = vadd.f32 %v1755_v2, %v1754_v63  ;;  %v1867_v4 = vpop.f32.mrf.mxu1 }
 0x102   : > { %v1407_v5 = vadd.f32 %v2402_v39, %v1183_v1  ;;  %v1868_v6 = vadd.f32 %v1867_v4, %v1866_v0  ;;  %v1757_v7 = vpop.f32.mrf.mxu0 }
 0x103   : > { %v1869_v8 = vpop.f32.mrf.mxu1 }
 0x104   : > { %2108 = vtanh.f32 %v1407_v5  ;;  %v1188_v9 = vadd.f32 %v1868_v6, %v1756_v3  ;;  %v1758_v10 = vpop.f32.mrf.mxu0 }
 0x105   : > { %v2103_v11 = vpop.eup %2102  ;;  %v1759_v12 = vadd.f32 %v1758_v10, %v1757_v7  ;;  %v1870_v13 = vpop.f32.mrf.mxu1 }
 0x106   : > { %1468 = vst [vmem:[%s2412_s20] sm:$0xff] %v2103_v11  ;;  %v1408_v14 = vadd.f32 %v2402_v39, %v1188_v9  ;;  %v1871_v15 = vadd.f32 %v1870_v13, %v1869_v8  ;;  %v1760_v16 = vpop.f32.mrf.mxu0 }
 0x107   : > { %v1872_v17 = vpop.f32.mrf.mxu1 }
 0x108   : > { %2110 = vtanh.f32 %v1408_v14  ;;  %v1191_v18 = vadd.f32 %v1871_v15, %v1759_v12  ;;  %v1761_v19 = vpop.f32.mrf.mxu0 }
 0x109   : > { %v2105_v20 = vpop.eup %2104  ;;  %v1762_v21 = vadd.f32 %v1761_v19, %v1760_v16  ;;  %v1873_v22 = vpop.f32.mrf.mxu1 }
 0x10a   : > { %1469 = vst [vmem:[%s2412_s20 + $0x8] sm:$0xff] %v2105_v20  ;;  %v1409_v23 = vadd.f32 %v2402_v39, %v1191_v18  ;;  %v1874_v24 = vadd.f32 %v1873_v22, %v1872_v17  ;;  %v1763_v25 = vpop.f32.mrf.mxu0 }
 0x10b   : > { %v1875_v26 = vpop.f32.mrf.mxu1 }
 0x10c   : > { %2112 = vtanh.f32 %v1409_v23  ;;  %v1196_v27 = vadd.f32 %v1874_v24, %v1762_v21  ;;  %v1764_v28 = vpop.f32.mrf.mxu0 }
 0x10d   : > { %v2107_v29 = vpop.eup %2106  ;;  %v1765_v30 = vadd.f32 %v1764_v28, %v1763_v25  ;;  %v1876_v31 = vpop.f32.mrf.mxu1 }
 0x10e   : > { %1470 = vst [vmem:[%s2412_s20 + $0x10] sm:$0xff] %v2107_v29  ;;  %v1410_v32 = vadd.f32 %v2402_v39, %v1196_v27  ;;  %v1877_v33 = vadd.f32 %v1876_v31, %v1875_v26  ;;  %v1766_v34 = vpop.f32.mrf.mxu0 }
 0x10f   : > { %v1878_v35 = vpop.f32.mrf.mxu1 }
 0x110   : > { %2114 = vtanh.f32 %v1410_v32  ;;  %v1199_v36 = vadd.f32 %v1877_v33, %v1765_v30  ;;  %v1767_v37 = vpop.f32.mrf.mxu0 }
 0x111   : > { %v2109_v38 = vpop.eup %2108  ;;  %v1768_v40 = vadd.f32 %v1767_v37, %v1766_v34  ;;  %v1879_v41 = vpop.f32.mrf.mxu1 }
 0x112   : > { %1471 = vst [vmem:[%s2412_s20 + $0x18] sm:$0xff] %v2109_v38  ;;  %v1411_v42 = vadd.f32 %v2402_v39, %v1199_v36  ;;  %v1880_v43 = vadd.f32 %v1879_v41, %v1878_v35  ;;  %v1769_v44 = vpop.f32.mrf.mxu0 }
 0x113   : > { %v1881_v45 = vpop.f32.mrf.mxu1 }
 0x114   : > { %2116 = vtanh.f32 %v1411_v42  ;;  %v1204_v46 = vadd.f32 %v1880_v43, %v1768_v40  ;;  %v1770_v47 = vpop.f32.mrf.mxu0 }
 0x115   : > { %v2111_v48 = vpop.eup %2110  ;;  %v1771_v49 = vadd.f32 %v1770_v47, %v1769_v44  ;;  %v1882_v50 = vpop.f32.mrf.mxu1 }
 0x116   : > { %1472 = vst [vmem:[%s2412_s20 + $0x20] sm:$0xff] %v2111_v48  ;;  %v1412_v51 = vadd.f32 %v2402_v39, %v1204_v46  ;;  %v1883_v52 = vadd.f32 %v1882_v50, %v1881_v45  ;;  %v1772_v53 = vpop.f32.mrf.mxu0 }
 0x117   : > { %v1884_v54 = vpop.f32.mrf.mxu1 }
 0x118   : > { %2118 = vtanh.f32 %v1412_v51  ;;  %v1207_v55 = vadd.f32 %v1883_v52, %v1771_v49  ;;  %v1773_v56 = vpop.f32.mrf.mxu0 }
 0x119   : > { %v2113_v57 = vpop.eup %2112  ;;  %v1774_v58 = vadd.f32 %v1773_v56, %v1772_v53  ;;  %v1885_v59 = vpop.f32.mrf.mxu1 }
 0x11a   : > { %1473 = vst [vmem:[%s2412_s20 + $0x28] sm:$0xff] %v2113_v57  ;;  %v1413_v60 = vadd.f32 %v2402_v39, %v1207_v55  ;;  %v1886_v61 = vadd.f32 %v1885_v59, %v1884_v54  ;;  %v1775_v62 = vpop.f32.mrf.mxu0 }
 0x11b   : > { %v1887_v63 = vpop.f32.mrf.mxu1 }
 0x11c   : > { %2120 = vtanh.f32 %v1413_v60  ;;  %v1212_v0 = vadd.f32 %v1886_v61, %v1774_v58  ;;  %v1776_v1 = vpop.f32.mrf.mxu0 }
 0x11d   : > { %v2115_v2 = vpop.eup %2114  ;;  %v1777_v3 = vadd.f32 %v1776_v1, %v1775_v62  ;;  %v1888_v4 = vpop.f32.mrf.mxu1 }
 0x11e   : > { %1474 = vst [vmem:[%s2412_s20 + $0x30] sm:$0xff] %v2115_v2  ;;  %v1414_v5 = vadd.f32 %v2402_v39, %v1212_v0  ;;  %v1889_v6 = vadd.f32 %v1888_v4, %v1887_v63  ;;  %v1778_v7 = vpop.f32.mrf.mxu0 }
 0x11f   : > { %v1890_v8 = vpop.f32.mrf.mxu1 }
 0x120   : > { %2122 = vtanh.f32 %v1414_v5  ;;  %v1215_v9 = vadd.f32 %v1889_v6, %v1777_v3  ;;  %v1779_v10 = vpop.f32.mrf.mxu0 }
 0x121   : > { %v2117_v11 = vpop.eup %2116  ;;  %v1780_v12 = vadd.f32 %v1779_v10, %v1778_v7  ;;  %v1891_v13 = vpop.f32.mrf.mxu1 }
 0x122   : > { %1475 = vst [vmem:[%s2412_s20 + $0x38] sm:$0xff] %v2117_v11  ;;  %v1415_v14 = vadd.f32 %v2402_v39, %v1215_v9  ;;  %v1892_v15 = vadd.f32 %v1891_v13, %v1890_v8  ;;  %v1781_v16 = vpop.f32.mrf.mxu0 }
 0x123   : > { %v1893_v17 = vpop.f32.mrf.mxu1 }
 0x124   : > { %2124 = vtanh.f32 %v1415_v14  ;;  %v1220_v18 = vadd.f32 %v1892_v15, %v1780_v12  ;;  %v1782_v19 = vpop.f32.mrf.mxu0 }
 0x125   : > { %v2119_v20 = vpop.eup %2118  ;;  %v1783_v21 = vadd.f32 %v1782_v19, %v1781_v16  ;;  %v1894_v22 = vpop.f32.mrf.mxu1 }
 0x126   : > { %1476 = vst [vmem:[%s2412_s20 + $0x40] sm:$0xff] %v2119_v20  ;;  %v1416_v23 = vadd.f32 %v2402_v39, %v1220_v18  ;;  %v1895_v24 = vadd.f32 %v1894_v22, %v1893_v17  ;;  %v1784_v25 = vpop.f32.mrf.mxu0 }
 0x127   : > { %v1896_v26 = vpop.f32.mrf.mxu1 }
 0x128   : > { %2126 = vtanh.f32 %v1416_v23  ;;  %v1223_v27 = vadd.f32 %v1895_v24, %v1783_v21  ;;  %v1785_v28 = vpop.f32.mrf.mxu0 }
 0x129   : > { %v2121_v29 = vpop.eup %2120  ;;  %v1786_v30 = vadd.f32 %v1785_v28, %v1784_v25  ;;  %v1897_v31 = vpop.f32.mrf.mxu1 }
 0x12a   : > { %1477 = vst [vmem:[%s2412_s20 + $0x48] sm:$0xff] %v2121_v29  ;;  %v1417_v32 = vadd.f32 %v2402_v39, %v1223_v27  ;;  %v1898_v33 = vadd.f32 %v1897_v31, %v1896_v26  ;;  %v1787_v34 = vpop.f32.mrf.mxu0 }
 0x12b   : > { %v1899_v35 = vpop.f32.mrf.mxu1 }
 0x12c   : > { %2128 = vtanh.f32 %v1417_v32  ;;  %v1228_v36 = vadd.f32 %v1898_v33, %v1786_v30  ;;  %v1788_v37 = vpop.f32.mrf.mxu0 }
 0x12d   : > { %v2123_v38 = vpop.eup %2122  ;;  %v1789_v40 = vadd.f32 %v1788_v37, %v1787_v34  ;;  %v1900_v41 = vpop.f32.mrf.mxu1 }
 0x12e   : > { %1478 = vst [vmem:[%s2412_s20 + $0x50] sm:$0xff] %v2123_v38  ;;  %v1418_v42 = vadd.f32 %v2402_v39, %v1228_v36  ;;  %v1901_v43 = vadd.f32 %v1900_v41, %v1899_v35  ;;  %v1790_v44 = vpop.f32.mrf.mxu0 }
 0x12f   : > { %v1902_v45 = vpop.f32.mrf.mxu1 }
 0x130   : > { %2130 = vtanh.f32 %v1418_v42  ;;  %v1231_v46 = vadd.f32 %v1901_v43, %v1789_v40  ;;  %v1791_v47 = vpop.f32.mrf.mxu0 }
 0x131   : > { %v2125_v48 = vpop.eup %2124  ;;  %v1792_v49 = vadd.f32 %v1791_v47, %v1790_v44  ;;  %v1903_v50 = vpop.f32.mrf.mxu1 }
 0x132   : > { %1479 = vst [vmem:[%s2412_s20 + $0x58] sm:$0xff] %v2125_v48  ;;  %v1419_v51 = vadd.f32 %v2402_v39, %v1231_v46  ;;  %v1904_v52 = vadd.f32 %v1903_v50, %v1902_v45  ;;  %v1793_v53 = vpop.f32.mrf.mxu0 }
 0x133   : > { %v1905_v54 = vpop.f32.mrf.mxu1 }
 0x134   : > { %2132 = vtanh.f32 %v1419_v51  ;;  %v1236_v55 = vadd.f32 %v1904_v52, %v1792_v49  ;;  %v1794_v56 = vpop.f32.mrf.mxu0 }
 0x135   : > { %v2127_v57 = vpop.eup %2126  ;;  %v1795_v58 = vadd.f32 %v1794_v56, %v1793_v53  ;;  %v1906_v59 = vpop.f32.mrf.mxu1 }
 0x136   : > { %1480 = vst [vmem:[%s2412_s20 + $0x60] sm:$0xff] %v2127_v57  ;;  %v1420_v60 = vadd.f32 %v2402_v39, %v1236_v55  ;;  %v1907_v61 = vadd.f32 %v1906_v59, %v1905_v54  ;;  %v1796_v62 = vpop.f32.mrf.mxu0 }
 0x137   : > { %v1908_v63 = vpop.f32.mrf.mxu1 }
 0x138   : > { %2134 = vtanh.f32 %v1420_v60  ;;  %v1239_v0 = vadd.f32 %v1907_v61, %v1795_v58  ;;  %v1797_v1 = vpop.f32.mrf.mxu0 }
 0x139   : > { %v2129_v2 = vpop.eup %2128  ;;  %v1798_v3 = vadd.f32 %v1797_v1, %v1796_v62  ;;  %v1909_v4 = vpop.f32.mrf.mxu1 }
 0x13a   : > { %1481 = vst [vmem:[%s2412_s20 + $0x68] sm:$0xff] %v2129_v2  ;;  %v1421_v5 = vadd.f32 %v2402_v39, %v1239_v0  ;;  %v1910_v6 = vadd.f32 %v1909_v4, %v1908_v63  ;;  %v1799_v7 = vpop.f32.mrf.mxu0 }
 0x13b   : > { %v1911_v8 = vpop.f32.mrf.mxu1 }
 0x13c   : > { %2136 = vtanh.f32 %v1421_v5  ;;  %v1244_v9 = vadd.f32 %v1910_v6, %v1798_v3  ;;  %v1800_v10 = vpop.f32.mrf.mxu0 }
 0x13d   : > { %v2131_v11 = vpop.eup %2130  ;;  %v1801_v12 = vadd.f32 %v1800_v10, %v1799_v7  ;;  %v1912_v13 = vpop.f32.mrf.mxu1 }
 0x13e   : > { %1482 = vst [vmem:[%s2412_s20 + $0x70] sm:$0xff] %v2131_v11  ;;  %v1422_v14 = vadd.f32 %v2402_v39, %v1244_v9  ;;  %v1913_v15 = vadd.f32 %v1912_v13, %v1911_v8  ;;  %v1802_v16 = vpop.f32.mrf.mxu0 }
 0x13f   : > { %v1914_v17 = vpop.f32.mrf.mxu1 }
 0x140   : > { %2138 = vtanh.f32 %v1422_v14  ;;  %v1247_v18 = vadd.f32 %v1913_v15, %v1801_v12  ;;  %v1803_v19 = vpop.f32.mrf.mxu0 }
 0x141   : > { %v2133_v20 = vpop.eup %2132  ;;  %v1804_v21 = vadd.f32 %v1803_v19, %v1802_v16  ;;  %v1915_v22 = vpop.f32.mrf.mxu1 }
 0x142   : > { %1483 = vst [vmem:[%s2412_s20 + $0x78] sm:$0xff] %v2133_v20  ;;  %v1423_v23 = vadd.f32 %v2402_v39, %v1247_v18  ;;  %v1916_v24 = vadd.f32 %v1915_v22, %v1914_v17  ;;  %v1805_v25 = vpop.f32.mrf.mxu0 }
 0x143   : > { %v1917_v26 = vpop.f32.mrf.mxu1 }
 0x144   : > { %2140 = vtanh.f32 %v1423_v23  ;;  %v1252_v27 = vadd.f32 %v1916_v24, %v1804_v21  ;;  %v1806_v28 = vpop.f32.mrf.mxu0 }
 0x145   : > { %v2135_v29 = vpop.eup %2134  ;;  %v1807_v30 = vadd.f32 %v1806_v28, %v1805_v25  ;;  %v1918_v31 = vpop.f32.mrf.mxu1 }
 0x146   : > { %1484 = vst [vmem:[%s2412_s20 + $0x80] sm:$0xff] %v2135_v29  ;;  %v1424_v32 = vadd.f32 %v2402_v39, %v1252_v27  ;;  %v1919_v33 = vadd.f32 %v1918_v31, %v1917_v26  ;;  %v1808_v34 = vpop.f32.mrf.mxu0 }
 0x147   : > { %v1920_v35 = vpop.f32.mrf.mxu1 }
 0x148   : > { %2142 = vtanh.f32 %v1424_v32  ;;  %v1255_v36 = vadd.f32 %v1919_v33, %v1807_v30  ;;  %v1809_v37 = vpop.f32.mrf.mxu0 }
 0x149   : > { %v2137_v38 = vpop.eup %2136  ;;  %v1810_v40 = vadd.f32 %v1809_v37, %v1808_v34  ;;  %v1921_v41 = vpop.f32.mrf.mxu1 }
 0x14a   : > { %1485 = vst [vmem:[%s2412_s20 + $0x88] sm:$0xff] %v2137_v38  ;;  %v1425_v42 = vadd.f32 %v2402_v39, %v1255_v36  ;;  %v1922_v43 = vadd.f32 %v1921_v41, %v1920_v35  ;;  %v1811_v44 = vpop.f32.mrf.mxu0 }
 0x14b   : > { %v1923_v45 = vpop.f32.mrf.mxu1 }
 0x14c   : > { %2144 = vtanh.f32 %v1425_v42  ;;  %v1260_v46 = vadd.f32 %v1922_v43, %v1810_v40  ;;  %v1812_v47 = vpop.f32.mrf.mxu0 }
 0x14d   : > { %v2139_v48 = vpop.eup %2138  ;;  %v1813_v49 = vadd.f32 %v1812_v47, %v1811_v44  ;;  %v1924_v50 = vpop.f32.mrf.mxu1 }
 0x14e   : > { %1486 = vst [vmem:[%s2412_s20 + $0x90] sm:$0xff] %v2139_v48  ;;  %v1426_v51 = vadd.f32 %v2402_v39, %v1260_v46  ;;  %v1925_v52 = vadd.f32 %v1924_v50, %v1923_v45  ;;  %v1814_v53 = vpop.f32.mrf.mxu0 }
 0x14f   : > { %v1926_v54 = vpop.f32.mrf.mxu1 }
 0x150   : > { %2146 = vtanh.f32 %v1426_v51  ;;  %v1263_v55 = vadd.f32 %v1925_v52, %v1813_v49  ;;  %v1815_v56 = vpop.f32.mrf.mxu0 }
 0x151   : > { %v2141_v57 = vpop.eup %2140  ;;  %v1816_v58 = vadd.f32 %v1815_v56, %v1814_v53  ;;  %v1927_v59 = vpop.f32.mrf.mxu1 }
 0x152   : > { %1487 = vst [vmem:[%s2412_s20 + $0x98] sm:$0xff] %v2141_v57  ;;  %v1427_v60 = vadd.f32 %v2402_v39, %v1263_v55  ;;  %v1928_v61 = vadd.f32 %v1927_v59, %v1926_v54  ;;  %v1817_v62 = vpop.f32.mrf.mxu0 }
 0x153   : > { %v1929_v63 = vpop.f32.mrf.mxu1 }
 0x154   : > { %2148 = vtanh.f32 %v1427_v60  ;;  %v1268_v0 = vadd.f32 %v1928_v61, %v1816_v58  ;;  %v1818_v1 = vpop.f32.mrf.mxu0 }
 0x155   : > { %v2143_v2 = vpop.eup %2142  ;;  %v1819_v3 = vadd.f32 %v1818_v1, %v1817_v62  ;;  %v1930_v4 = vpop.f32.mrf.mxu1 }
 0x156   : > { %1488 = vst [vmem:[%s2412_s20 + $0xa0] sm:$0xff] %v2143_v2  ;;  %v1428_v5 = vadd.f32 %v2402_v39, %v1268_v0  ;;  %v1931_v6 = vadd.f32 %v1930_v4, %v1929_v63  ;;  %v1820_v7 = vpop.f32.mrf.mxu0 }
 0x157   : > { %v1932_v8 = vpop.f32.mrf.mxu1 }
 0x158   : > { %2150 = vtanh.f32 %v1428_v5  ;;  %v1271_v9 = vadd.f32 %v1931_v6, %v1819_v3  ;;  %v1821_v10 = vpop.f32.mrf.mxu0 }
 0x159   : > { %v2145_v11 = vpop.eup %2144  ;;  %v1822_v12 = vadd.f32 %v1821_v10, %v1820_v7  ;;  %v1933_v13 = vpop.f32.mrf.mxu1 }
 0x15a   : > { %1489 = vst [vmem:[%s2412_s20 + $0xa8] sm:$0xff] %v2145_v11  ;;  %v1429_v14 = vadd.f32 %v2402_v39, %v1271_v9  ;;  %v1934_v15 = vadd.f32 %v1933_v13, %v1932_v8  ;;  %v1823_v16 = vpop.f32.mrf.mxu0 }
 0x15b   : > { %v1935_v17 = vpop.f32.mrf.mxu1 }
 0x15c   : > { %2152 = vtanh.f32 %v1429_v14  ;;  %v1276_v18 = vadd.f32 %v1934_v15, %v1822_v12  ;;  %v1824_v19 = vpop.f32.mrf.mxu0 }
 0x15d   : > { %v2147_v20 = vpop.eup %2146  ;;  %v1825_v21 = vadd.f32 %v1824_v19, %v1823_v16  ;;  %v1936_v22 = vpop.f32.mrf.mxu1 }
 0x15e   : > { %1490 = vst [vmem:[%s2412_s20 + $0xb0] sm:$0xff] %v2147_v20  ;;  %v1430_v23 = vadd.f32 %v2402_v39, %v1276_v18  ;;  %v1937_v24 = vadd.f32 %v1936_v22, %v1935_v17  ;;  %v1826_v25 = vpop.f32.mrf.mxu0 }
 0x15f   : > { %v1938_v26 = vpop.f32.mrf.mxu1 }
 0x160   : > { %2154 = vtanh.f32 %v1430_v23  ;;  %v1279_v27 = vadd.f32 %v1937_v24, %v1825_v21  ;;  %v1827_v28 = vpop.f32.mrf.mxu0 }
 0x161   : > { %v2149_v29 = vpop.eup %2148  ;;  %v1828_v30 = vadd.f32 %v1827_v28, %v1826_v25  ;;  %v1939_v31 = vpop.f32.mrf.mxu1 }
 0x162   : > { %1491 = vst [vmem:[%s2412_s20 + $0xb8] sm:$0xff] %v2149_v29  ;;  %v1431_v32 = vadd.f32 %v2402_v39, %v1279_v27  ;;  %v1940_v33 = vadd.f32 %v1939_v31, %v1938_v26  ;;  %v1829_v34 = vpop.f32.mrf.mxu0 }
 0x163   : > { %v1941_v35 = vpop.f32.mrf.mxu1 }
 0x164   : > { %2156 = vtanh.f32 %v1431_v32  ;;  %v1284_v36 = vadd.f32 %v1940_v33, %v1828_v30  ;;  %v1830_v37 = vpop.f32.mrf.mxu0 }
 0x165   : > { %v2151_v38 = vpop.eup %2150  ;;  %v1831_v40 = vadd.f32 %v1830_v37, %v1829_v34  ;;  %v1942_v41 = vpop.f32.mrf.mxu1 }
 0x166   : > { %1492 = vst [vmem:[%s2412_s20 + $0xc0] sm:$0xff] %v2151_v38  ;;  %v1432_v42 = vadd.f32 %v2402_v39, %v1284_v36  ;;  %v1943_v43 = vadd.f32 %v1942_v41, %v1941_v35  ;;  %v1832_v44 = vpop.f32.mrf.mxu0 }
 0x167   : > { %v1944_v45 = vpop.f32.mrf.mxu1 }
 0x168   : > { %2158 = vtanh.f32 %v1432_v42  ;;  %v1287_v46 = vadd.f32 %v1943_v43, %v1831_v40  ;;  %v1833_v47 = vpop.f32.mrf.mxu0 }
 0x169   : > { %v2153_v48 = vpop.eup %2152  ;;  %v1834_v49 = vadd.f32 %v1833_v47, %v1832_v44  ;;  %v1945_v50 = vpop.f32.mrf.mxu1 }
 0x16a   : > { %1493 = vst [vmem:[%s2412_s20 + $0xc8] sm:$0xff] %v2153_v48  ;;  %v1433_v51 = vadd.f32 %v2402_v39, %v1287_v46  ;;  %v1946_v52 = vadd.f32 %v1945_v50, %v1944_v45  ;;  %v1835_v53 = vpop.f32.mrf.mxu0 }
 0x16b   : > { %v1947_v54 = vpop.f32.mrf.mxu1 }
 0x16c   : > { %2160 = vtanh.f32 %v1433_v51  ;;  %v1292_v55 = vadd.f32 %v1946_v52, %v1834_v49  ;;  %v1836_v56 = vpop.f32.mrf.mxu0 }
 0x16d   : > { %v2155_v57 = vpop.eup %2154  ;;  %v1837_v58 = vadd.f32 %v1836_v56, %v1835_v53  ;;  %v1948_v59 = vpop.f32.mrf.mxu1 }
 0x16e   : > { %1494 = vst [vmem:[%s2412_s20 + $0xd0] sm:$0xff] %v2155_v57  ;;  %v1434_v60 = vadd.f32 %v2402_v39, %v1292_v55  ;;  %v1949_v61 = vadd.f32 %v1948_v59, %v1947_v54 }
 0x170   : > { %2162 = vtanh.f32 %v1434_v60  ;;  %v1295_v62 = vadd.f32 %v1949_v61, %v1837_v58 }
 0x171   : > { %v2157_v63 = vpop.eup %2156 }
 0x172   : > { %1495 = vst [vmem:[%s2412_s20 + $0xd8] sm:$0xff] %v2157_v63  ;;  %v1435_v0 = vadd.f32 %v2402_v39, %v1295_v62 }
 0x174   : > { %2164 = vtanh.f32 %v1435_v0 }
 0x175   : > { %v2159_v1 = vpop.eup %2158 }
 0x176   : > { %1496 = vst [vmem:[%s2412_s20 + $0xe0] sm:$0xff] %v2159_v1 }
 0x179   : > { %v2161_v2 = vpop.eup %2160 }
 0x17a   : > { %1497 = vst [vmem:[%s2412_s20 + $0xe8] sm:$0xff] %v2161_v2 }
 0x17d   : > { %v2163_v3 = vpop.eup %2162 }
 0x17e   : > { %1498 = vst [vmem:[%s2412_s20 + $0xf0] sm:$0xff] %v2163_v3 }
 0x181   : > { %v2165_v4 = vpop.eup %2164 }
 0x182   : > { %1499 = vst [vmem:[%s2412_s20 + $0xf8] sm:$0xff] %v2165_v4 }
 0x183 PF: > { %s13_s14 = sadd.s32 1, %s2188_s14   ;;  %s2487_s12 = smov %s2184_s13 }
 0x184   : > { %p10_p5 = scmp.ge.s32.totalorder %s13_s14, 4   ;;  %s2488_s13 = smov %s2490_s15 }
 0x186   :  { %12 = sbr.rel (!%p10_p5) target bundleno = 2 (0x2), region = 76 }

</bundles_post_ra>
